<compile_context>
chip_gen: v6e
topology: v6e:2x2x1
jax: 0.10.0
libtpu: 0.0.40
codegen_flags: <defaults>
</compile_context>

<pallas_src>
import functools

import jax
import jax.numpy as jnp
from jax import lax
from jax.experimental import pallas as pl
from jax.experimental.pallas import tpu as pltpu

LEAKY_SLOPE = 0.01   # nn.LeakyReLU() default negative_slope
BN_EPS = 1e-5

MAX_TK = 1024                     # K tile upper bound (multiple of 128)
VMEM_LIMIT = 32 * 1024 * 1024     # safe on v5e/v6e (128 MiB) and v7x (64 MiB)


def _round_up(x, m):
    return (x + m - 1) // m * m


def _choose_tk(kp):
    """Largest 128-multiple divisor of kp (kp is a multiple of 128) <= MAX_TK."""
    if kp <= MAX_TK:
        return kp
    for t in range(MAX_TK, 127, -128):
        if kp % t == 0:
            return t
    return 128


def _choose_tm(m):
    """Lane (M) tile: prefer >=2 parallel blocks (v7x megacore), 128-multiple."""
    if m < 128:
        return m                           # full-extent lane block (tiny layer)
    for tm in (512, 256, 128):
        if m % tm == 0 and m // tm >= 2:
            return tm
    return 128


# ----------------------------------------------------------------------------
# Pallas kernels
# ----------------------------------------------------------------------------
def _gemm_kernel(w_ref, p_ref, b_ref, o_ref, acc_ref, *, leaky):
    """One (phase, M-tile) block: acc += W @ P, K-tiled; bias+LeakyReLU at end."""
    @pl.when(pl.program_id(2) == 0)
    def _init():
        acc_ref[...] = jnp.zeros_like(acc_ref)

    acc_ref[...] += jnp.dot(w_ref[0], p_ref[0],
                            preferred_element_type=jnp.float32)

    @pl.when(pl.program_id(2) == pl.num_programs(2) - 1)
    def _finalize():
        y = acc_ref[...] + b_ref[...]
        if leaky:
            y = jnp.where(y >= 0.0, y, LEAKY_SLOPE * y)
        o_ref[0] = y.astype(o_ref.dtype)


def _gemm_bias_act(wmat, bias, patches, *, tm, leaky, out_dtype):
    """wmat (B, Co, Kp) bf16, bias (Co, 1) f32, patches (B, Kp, Mp) bf16.
    Returns leaky_relu(wmat @ patches + bias), shape (B, Co, Mp), out_dtype."""
    B, Co, Kp = wmat.shape
    Mp = patches.shape[2]
    assert patches.shape == (B, Kp, Mp) and Mp % tm == 0
    tk = _choose_tk(Kp)
    nm, nk = Mp // tm, Kp // tk

    cost = pl.CostEstimate(
        flops=2 * B * Co * Kp * Mp,
        transcendentals=0,
        bytes_accessed=int(wmat.size * 2 + patches.size * 2 + bias.size * 4
                           + B * Co * Mp * jnp.dtype(out_dtype).itemsize))

    return pl.pallas_call(
        functools.partial(_gemm_kernel, leaky=leaky),
        out_shape=jax.ShapeDtypeStruct((B, Co, Mp), out_dtype),
        grid=(B, nm, nk),
        in_specs=[
            pl.BlockSpec((1, Co, tk), lambda p, i, k: (p, 0, k)),
            pl.BlockSpec((1, tk, tm), lambda p, i, k: (p, k, i)),
            pl.BlockSpec((Co, 1), lambda p, i, k: (0, 0)),
        ],
        out_specs=pl.BlockSpec((1, Co, tm), lambda p, i, k: (p, 0, i)),
        scratch_shapes=[pltpu.VMEM((Co, tm), jnp.float32)],
        compiler_params=pltpu.CompilerParams(
            dimension_semantics=("parallel", "parallel", "arbitrary"),
            vmem_limit_bytes=VMEM_LIMIT),
        cost_estimate=cost,
    )(wmat, patches, bias)


def _cat1x1_kernel(w1_ref, w2_ref, x1_ref, x2_ref, b_ref, o_ref):
    """Fused channel-concat + 1x1 conv + BN + LeakyReLU (two dots, one acc)."""
    y = jnp.dot(w1_ref[...], x1_ref[...], preferred_element_type=jnp.float32)
    y = y + jnp.dot(w2_ref[...], x2_ref[...], preferred_element_type=jnp.float32)
    y = y + b_ref[...]
    y = jnp.where(y >= 0.0, y, LEAKY_SLOPE * y)
    o_ref[...] = y.astype(o_ref.dtype)


def cat_conv1x1_cf(x1_cf, x2_cf, layer, *, out_dtype=jnp.bfloat16):
    """agg*_a: Conv1x1(BN,LeakyReLU) over concat([x1, x2], channel) without
    materializing the concatenation.  Inputs/outputs are channels-first."""
    c1, n, d, h, w = x1_cf.shape
    c2 = x2_cf.shape[0]
    assert x2_cf.shape[1:] == (n, d, h, w)
    m = n * d * h * w
    x1 = x1_cf.astype(jnp.bfloat16).reshape(c1, m)
    x2 = x2_cf.astype(jnp.bfloat16).reshape(c2, m)
    tm = _choose_tm(m)
    mp = _round_up(m, tm)
    if mp != m:
        x1 = jnp.pad(x1, ((0, 0), (0, mp - m)))
        x2 = jnp.pad(x2, ((0, 0), (0, mp - m)))
    w1, w2, bias = layer["wmat1"], layer["wmat2"], layer["bias"]
    assert w1.shape[1] == c1 and w2.shape[1] == c2
    co = w1.shape[0]
    nm = mp // tm

    cost = pl.CostEstimate(
        flops=2 * co * (c1 + c2) * mp, transcendentals=0,
        bytes_accessed=int((c1 + c2) * mp * 2 + co * (c1 + c2) * 2
                           + co * mp * jnp.dtype(out_dtype).itemsize))

    out = pl.pallas_call(
        _cat1x1_kernel,
        out_shape=jax.ShapeDtypeStruct((co, mp), out_dtype),
        grid=(nm,),
        in_specs=[
            pl.BlockSpec((co, c1), lambda i: (0, 0)),
            pl.BlockSpec((co, c2), lambda i: (0, 0)),
            pl.BlockSpec((c1, tm), lambda i: (0, i)),
            pl.BlockSpec((c2, tm), lambda i: (0, i)),
            pl.BlockSpec((co, 1), lambda i: (0, 0)),
        ],
        out_specs=pl.BlockSpec((co, tm), lambda i: (0, i)),
        compiler_params=pltpu.CompilerParams(
            dimension_semantics=("parallel",),
            vmem_limit_bytes=VMEM_LIMIT),
        cost_estimate=cost,
    )(w1, w2, x1, x2, bias)
    if mp != m:
        out = out[:, :m]
    return out.reshape(co, n, d, h, w)


# ----------------------------------------------------------------------------
# Channels-first im2col glue (plain JAX: pad + strided slices + reshape only)
# ----------------------------------------------------------------------------
def _extract_patches_cf(xp, ksize, stride, origin, osize):
    """xp: pre-padded channels-first (C, N, Dp, Hp, Wp) -> (T*C, N*Do*Ho*Wo)."""
    c = xp.shape[0]
    n = xp.shape[1]
    kd, kh, kw = ksize
    sd, sh, sw = stride
    od, oh, ow = origin
    do, ho, wo = osize
    taps = []
    for a in range(kd):
        for b in range(kh):
            for e in range(kw):
                taps.append(xp[:, :,
                               od + a:od + a + sd * (do - 1) + 1:sd,
                               oh + b:oh + b + sh * (ho - 1) + 1:sh,
                               ow + e:ow + e + sw * (wo - 1) + 1:sw])
    pat = jnp.stack(taps, axis=0)                     # (T, C, N, Do, Ho, Wo)
    return pat.reshape(kd * kh * kw * c, n * do * ho * wo)


def conv3d_cf(x_cf, layer, *, stride, padding, leaky=True, out_dtype=jnp.bfloat16):
    """BasicConv(is_3d=True): Conv3d(bias=False)+BN+LeakyReLU, channels-first."""
    cin_p, n, d, h, w = x_cf.shape
    k = layer["k"]
    wmat, bias = layer["wmat"], layer["bias"]          # (1, Co, Kp), (Co, 1)
    co, kp = wmat.shape[1], wmat.shape[2]
    xp = jnp.pad(x_cf.astype(jnp.bfloat16),
                 ((0, 0), (0, 0), (padding,) * 2, (padding,) * 2, (padding,) * 2))
    do = (d + 2 * padding - k) // stride + 1
    ho = (h + 2 * padding - k) // stride + 1
    wo = (w + 2 * padding - k) // stride + 1
    patches = _extract_patches_cf(xp, (k,) * 3, (stride,) * 3, (0, 0, 0),
                                  (do, ho, wo))
    kk, m = patches.shape
    assert kp == _round_up(kk, 128), (kp, kk)          # weight/patch K lock-step
    tm = _choose_tm(m)
    mp = _round_up(m, tm)
    if (kp, mp) != (kk, m):
        patches = jnp.pad(patches, ((0, kp - kk), (0, mp - m)))
    out = _gemm_bias_act(wmat, bias, patches[None], tm=tm, leaky=leaky,
                         out_dtype=out_dtype)[0]
    if mp != m:
        out = out[:, :m]
    return out.reshape(co, n, do, ho, wo)


def deconv3d_cf(x_cf, layer, *, leaky=True, out_dtype=jnp.bfloat16):
    """BasicConv(deconv=True): ConvTranspose3d(k=4,s=2,p=1,bias=False)+[BN+LReLU].

    Sub-pixel decomposition: 8 stride-1 kernel-2 phase convolutions on the
    undilated input, all computed by ONE batched pallas_call, outputs
    interleaved by phase parity.
    """
    cin_p, n, d, h, w = x_cf.shape
    wmat, bias = layer["wmat"], layer["bias"]          # (8, Co, Kp), (Co, 1)
    co, kp = wmat.shape[1], wmat.shape[2]
    xp = jnp.pad(x_cf.astype(jnp.bfloat16),
                 ((0, 0), (0, 0), (1, 1), (1, 1), (1, 1)))
    phases = []
    for pd in range(2):
        for ph in range(2):
            for pw in range(2):
                phases.append(_extract_patches_cf(
                    xp, (2, 2, 2), (1, 1, 1), (pd, ph, pw), (d, h, w)))
    patches = jnp.stack(phases, axis=0)                # (8, K, M)
    kk, m = patches.shape[1], patches.shape[2]
    assert kp == _round_up(kk, 128), (kp, kk)
    tm = _choose_tm(m)
    mp = _round_up(m, tm)
    if (kp, mp) != (kk, m):
        patches = jnp.pad(patches, ((0, 0), (0, kp - kk), (0, mp - m)))
    out = _gemm_bias_act(wmat, bias, patches, tm=tm, leaky=leaky,
                         out_dtype=out_dtype)          # (8, Co, Mp)
    if mp != m:
        out = out[:, :, :m]
    out = out.reshape(2, 2, 2, co, n, d, h, w)
    out = jnp.transpose(out, (3, 4, 5, 0, 6, 1, 7, 2))  # (C,N,D,pd,H,ph,W,pw)
    return out.reshape(co, n, 2 * d, 2 * h, 2 * w)


# ----------------------------------------------------------------------------
# Parameters (deterministic synthetic init) + one-time kernel-form preparation
# ----------------------------------------------------------------------------
def _layer_defs(c):
    return [
        # name        kind      cin    cout   k  bn
        ("conv1_a",  "conv",   c,     2 * c, 3, True),
        ("conv1_b",  "conv",   2 * c, 2 * c, 3, True),
        ("conv2_a",  "conv",   2 * c, 4 * c, 3, True),
        ("conv2_b",  "conv",   4 * c, 4 * c, 3, True),
        ("conv3_a",  "conv",   4 * c, 6 * c, 3, True),
        ("conv3_b",  "conv",   6 * c, 6 * c, 3, True),
        ("conv3_up", "deconv", 6 * c, 4 * c, 4, True),
        ("conv2_up", "deconv", 4 * c, 2 * c, 4, True),
        ("conv1_up", "deconv", 2 * c, 1,     4, False),
        ("agg0_a",   "conv",   8 * c, 4 * c, 1, True),
        ("agg0_b",   "conv",   4 * c, 4 * c, 3, True),
        ("agg0_c",   "conv",   4 * c, 4 * c, 3, True),
        ("agg1_a",   "conv",   4 * c, 2 * c, 1, True),
        ("agg1_b",   "conv",   2 * c, 2 * c, 3, True),
        ("agg1_c",   "conv",   2 * c, 2 * c, 3, True),
    ]


def _bn_params(key, c):
    k1, k2, k3, k4 = jax.random.split(key, 4)
    gamma = 1.0 + 0.1 * jax.random.normal(k1, (c,), jnp.float32)
    beta = 0.1 * jax.random.normal(k2, (c,), jnp.float32)
    mean = 0.1 * jax.random.normal(k3, (c,), jnp.float32)
    var = 1.0 + 0.1 * jax.random.uniform(k4, (c,), jnp.float32)
    return gamma, beta, mean, var


def init_hourglass_params(key, c):
    params = {}
    for name, kind, cin, cout, k, _bn in _layer_defs(c):
        key, kw, kb = jax.random.split(key, 3)
        if kind == "conv":
            w = 0.05 * jax.random.normal(kw, (cout, cin, k, k, k), jnp.float32)
        else:  # ConvTranspose3d weight layout: (Cin, Cout, kd, kh, kw)
            w = 0.05 * jax.random.normal(kw, (cin, cout, k, k, k), jnp.float32)
        params[name] = {"w": w, "bn": _bn_params(kb, cout)}
    return params


def _bn_affine(params, bn_on, cout):
    if bn_on:
        gamma, beta, mean, var = params["bn"]
        scale = gamma / jnp.sqrt(var + BN_EPS)
        return scale, beta - mean * scale
    return jnp.ones((cout,), jnp.float32), jnp.zeros((cout,), jnp.float32)


def _prep_conv_wmat(w_oidhw, scale, cin_pad):
    """(O, I, kd, kh, kw) conv weight -> (round_up(O,8), round_up(T*cin_pad,128))
    bf16, BN scale folded into output-channel rows; K is tap-major, ch-minor."""
    o, i, kd, kh, kw = w_oidhw.shape
    w = jnp.transpose(w_oidhw, (0, 2, 3, 4, 1))            # (O, kd, kh, kw, I)
    w = jnp.pad(w, ((0, 0),) * 4 + ((0, cin_pad - i),))
    w = w.reshape(o, kd * kh * kw * cin_pad) * scale[:, None]
    co_p = _round_up(o, 8)
    k_p = _round_up(w.shape[1], 128)
    w = jnp.pad(w, ((0, co_p - o), (0, k_p - w.shape[1])))
    return w.astype(jnp.bfloat16)


def _prep_bias(bias_vec, cout):
    co_p = _round_up(cout, 8)
    return jnp.pad(bias_vec, (0, co_p - cout)).reshape(co_p, 1).astype(jnp.float32)


def prepare_params(raw, c):
    """One-time conversion: PyTorch-layout weights -> padded bf16 GEMM form."""
    prep = {}
    for name, kind, cin, cout, k, bn in _layer_defs(c):
        p = raw[name]
        scale, bias = _bn_affine(p, bn, cout)
        if kind == "conv" and k == 1:
            # concat + 1x1 conv is fused: split W's input channels over sources
            half = cin // 2
            half_p = _round_up(half, 8)
            co_p = _round_up(cout, 8)
            w = p["w"].reshape(cout, cin)

            def _half(wh):
                wh = jnp.pad(wh, ((0, 0), (0, half_p - half))) * scale[:, None]
                wh = jnp.pad(wh, ((0, co_p - cout), (0, 0)))
                return wh.astype(jnp.bfloat16)

            prep[name] = {"wmat1": _half(w[:, :half]),
                          "wmat2": _half(w[:, half:]),
                          "bias": _prep_bias(bias, cout)}
        elif kind == "conv":
            cin_p = _round_up(cin, 8)
            wm = _prep_conv_wmat(p["w"], scale, cin_p)
            prep[name] = {"wmat": wm[None], "bias": _prep_bias(bias, cout), "k": k}
        else:
            # conv-equivalent (OIDHW) weight: flip spatially, swap in/out chans;
            # slice into the 8 sub-pixel phase kernels (2x2x2 each).
            cin_p = _round_up(cin, 8)
            w_eq = jnp.transpose(jnp.flip(p["w"], axis=(2, 3, 4)), (1, 0, 2, 3, 4))
            wms = []
            for pd in range(2):
                for ph in range(2):
                    for pw in range(2):
                        wms.append(_prep_conv_wmat(
                            w_eq[:, :, pd::2, ph::2, pw::2], scale, cin_p))
            prep[name] = {"wmat": jnp.stack(wms, axis=0),
                          "bias": _prep_bias(bias, cout)}
    return prep


# ----------------------------------------------------------------------------
# hourglass_1.forward (channels-first transposed layout internally)
# ----------------------------------------------------------------------------
def hourglass_1_forward(prep, x):
    c = x.shape[1]
    cp = _round_up(c, 8)
    x_cf = jnp.transpose(x, (1, 0, 2, 3, 4))                 # (C, N, D, H, W)
    if cp != c:
        x_cf = jnp.pad(x_cf, ((0, cp - c),) + ((0, 0),) * 4)

    conv1 = conv3d_cf(x_cf, prep["conv1_a"], stride=2, padding=1)
    conv1 = conv3d_cf(conv1, prep["conv1_b"], stride=1, padding=1)

    conv2 = conv3d_cf(conv1, prep["conv2_a"], stride=2, padding=1)
    conv2 = conv3d_cf(conv2, prep["conv2_b"], stride=1, padding=1)

    conv3 = conv3d_cf(conv2, prep["conv3_a"], stride=2, padding=1)
    conv3 = conv3d_cf(conv3, prep["conv3_b"], stride=1, padding=1,
                      out_dtype=jnp.float32)                 # module boundary

    conv3_up = deconv3d_cf(conv3, prep["conv3_up"])
    conv2 = cat_conv1x1_cf(conv3_up, conv2, prep["agg0_a"])  # fused concat+1x1
    conv2 = conv3d_cf(conv2, prep["agg0_b"], stride=1, padding=1)
    conv2 = conv3d_cf(conv2, prep["agg0_c"], stride=1, padding=1,
                      out_dtype=jnp.float32)                 # module boundary

    conv2_up = deconv3d_cf(conv2, prep["conv2_up"])
    conv1 = cat_conv1x1_cf(conv2_up, conv1, prep["agg1_a"])  # fused concat+1x1
    conv1 = conv3d_cf(conv1, prep["agg1_b"], stride=1, padding=1)
    conv1 = conv3d_cf(conv1, prep["agg1_c"], stride=1, padding=1,
                      out_dtype=jnp.float32)                 # module boundary

    conv = deconv3d_cf(conv1, prep["conv1_up"], leaky=False,
                       out_dtype=jnp.float32)                # bn=False, relu=False

    def to_ncdhw(t, cout):
        return jnp.transpose(t[:cout], (1, 0, 2, 3, 4)).astype(jnp.float32)

    return (to_ncdhw(conv3, 6 * c), to_ncdhw(conv2, 4 * c),
            to_ncdhw(conv1, 2 * c), to_ncdhw(conv, 1))


# ----------------------------------------------------------------------------
# Pure-JAX f32 reference (lax.conv, NCDHW) for a correctness check
# ----------------------------------------------------------------------------
def _ref_post(y, params, bn, relu):
    cout = y.shape[1]
    scale, bias = _bn_affine(params, bn, cout)
    y = y * scale[None, :, None, None, None] + bias[None, :, None, None, None]
    if relu:
        y = jnp.where(y >= 0.0, y, LEAKY_SLOPE * y)
    return y


def _ref_conv(x, params, stride, padding, bn=True, relu=True):
    y = lax.conv_general_dilated(
        x, params["w"], (stride,) * 3, [(padding, padding)] * 3,
        dimension_numbers=("NCDHW", "OIDHW", "NCDHW"),
        precision=lax.Precision.HIGHEST)
    return _ref_post(y, params, bn, relu)


def _ref_deconv(x, params, stride=2, padding=1, bn=True, relu=True):
    wt = params["w"]
    k = wt.shape[2]
    w_eq = jnp.transpose(jnp.flip(wt, axis=(2, 3, 4)), (1, 0, 2, 3, 4))
    y = lax.conv_general_dilated(
        x, w_eq, (1, 1, 1), [(k - 1 - padding, k - 1 - padding)] * 3,
        lhs_dilation=(stride,) * 3,
        dimension_numbers=("NCDHW", "OIDHW", "NCDHW"),
        precision=lax.Precision.HIGHEST)
    return _ref_post(y, params, bn, relu)


def hourglass_1_reference(params, x):
    conv1 = _ref_conv(x, params["conv1_a"], 2, 1)
    conv1 = _ref_conv(conv1, params["conv1_b"], 1, 1)
    conv2 = _ref_conv(conv1, params["conv2_a"], 2, 1)
    conv2 = _ref_conv(conv2, params["conv2_b"], 1, 1)
    conv3 = _ref_conv(conv2, params["conv3_a"], 2, 1)
    conv3 = _ref_conv(conv3, params["conv3_b"], 1, 1)
    conv3_up = _ref_deconv(conv3, params["conv3_up"])
    conv2 = jnp.concatenate([conv3_up, conv2], axis=1)
    conv2 = _ref_conv(conv2, params["agg0_a"], 1, 0)
    conv2 = _ref_conv(conv2, params["agg0_b"], 1, 1)
    conv2 = _ref_conv(conv2, params["agg0_c"], 1, 1)
    conv2_up = _ref_deconv(conv2, params["conv2_up"])
    conv1 = jnp.concatenate([conv2_up, conv1], axis=1)
    conv1 = _ref_conv(conv1, params["agg1_a"], 1, 0)
    conv1 = _ref_conv(conv1, params["agg1_b"], 1, 1)
    conv1 = _ref_conv(conv1, params["agg1_c"], 1, 1)
    conv = _ref_deconv(conv1, params["conv1_up"], bn=False, relu=False)
    return conv3, conv2, conv1, conv


if __name__ == "__main__":
    C = 4                                   # in_channels
    key = jax.random.PRNGKey(0)
    kx, kp = jax.random.split(key)
    # cost volume (N, C, D, H, W); D,H,W divisible by 8 so three stride-2
    # downsamples and three stride-2 deconvs round-trip exactly.
    x = jax.random.normal(kx, (2, C, 8, 16, 16), jnp.float32)
    raw_params = init_hourglass_params(kp, C)
    prep = prepare_params(raw_params, C)

    fwd = jax.jit(functools.partial(hourglass_1_forward, prep))
    outs = jax.block_until_ready(fwd(x))
    refs = jax.block_until_ready(hourglass_1_reference(raw_params, x))

    expected_shapes = [(2, 6 * C, 1, 2, 2), (2, 4 * C, 2, 4, 4),
                       (2, 2 * C, 4, 8, 8), (2, 1, 8, 16, 16)]
    for o, r, es in zip(outs, refs, expected_shapes):
        assert o.shape == es and r.shape == es, (o.shape, r.shape, es)
        rel = float(jnp.linalg.norm(o.astype(jnp.float32) - r)
                    / (jnp.linalg.norm(r) + 1e-6))
        # bf16 matmul inputs + f32 accumulation across ~15 layers.
        assert rel < 3e-2, f"relative error too large: {rel}"

    print("KERNEL_OK")
</pallas_src>

<mosaic_0001>
module attributes {stable_mosaic.version = 11 : i64} {
  func.func @_gemm_kernel(%arg0: i32, %arg1: i32, %arg2: i32, %arg3: memref<1x8x256xbf16, #tpu.memory_space<vmem>>, %arg4: memref<1x256x256xbf16, #tpu.memory_space<vmem>>, %arg5: memref<8x1xf32, #tpu.memory_space<vmem>>, %arg6: memref<1x8x256xbf16, #tpu.memory_space<vmem>>, %arg7: memref<8x256xf32, #tpu.memory_space<vmem>>) attributes {dimension_semantics = [#tpu.dimension_semantics<parallel>, #tpu.dimension_semantics<parallel>, #tpu.dimension_semantics<arbitrary>], iteration_bounds = array<i64: 1, 2, 1>, scalar_prefetch = 0 : i64, scratch_operands = 1 : i64, tpu.core_type = #tpu.core_type<tc>, window_params = [{transform_indices = @transform_0, window_bounds = array<i64: 1, 8, 256>}, {transform_indices = @transform_1, window_bounds = array<i64: 1, 256, 256>}, {pipeline_mode = #tpu.pipeline_mode<synchronous>, transform_indices = @transform_2, window_bounds = array<i64: 8, 1>}, {transform_indices = @transform_3, window_bounds = array<i64: 1, 8, 256>}]} {
    %c0_i32 = arith.constant 0 : i32
    %0 = arith.cmpi eq, %arg2, %c0_i32 : i32
    %1 = arith.extui %0 : i1 to i32
    %c0_i32_0 = arith.constant 0 : i32
    %2 = arith.cmpi ne, %1, %c0_i32_0 : i32
    scf.if %2 {
      %cst_12 = arith.constant 0.000000e+00 : f32
      %14 = vector.broadcast %cst_12 : f32 to vector<8x256xf32>
      %c0_13 = arith.constant 0 : index
      %c0_14 = arith.constant 0 : index
      %15 = vector.load %arg7[%c0_13, %c0_14] : memref<8x256xf32, #tpu.memory_space<vmem>>, vector<8x256xf32>
      tpu.vector_store %arg7[%c0_13, %c0_14], %14 {strides = array<i32>} : memref<8x256xf32, #tpu.memory_space<vmem>>, vector<8x256xf32>,
    } else {
    }
    %c0 = arith.constant 0 : index
    %c0_1 = arith.constant 0 : index
    %3 = vector.load %arg7[%c0, %c0_1] : memref<8x256xf32, #tpu.memory_space<vmem>>, vector<8x256xf32>
    %c0_2 = arith.constant 0 : index
    %c0_3 = arith.constant 0 : index
    %c0_4 = arith.constant 0 : index
    %4 = vector.load %arg3[%c0_2, %c0_3, %c0_4] : memref<1x8x256xbf16, #tpu.memory_space<vmem>>, vector<1x8x256xbf16>
    %5 = vector.shape_cast %4 : vector<1x8x256xbf16> to vector<8x256xbf16>
    %c0_5 = arith.constant 0 : index
    %c0_6 = arith.constant 0 : index
    %c0_7 = arith.constant 0 : index
    %6 = vector.load %arg4[%c0_5, %c0_6, %c0_7] : memref<1x256x256xbf16, #tpu.memory_space<vmem>>, vector<1x256x256xbf16>
    %7 = vector.shape_cast %6 : vector<1x256x256xbf16> to vector<256x256xbf16>
    %cst = arith.constant dense<0.000000e+00> : vector<8x256xf32>
    %8 = tpu.matmul %5, %7, %cst {dimension_numbers = #tpu.dot_dimension_numbers<[1], [0], [0], [1], [0, 0, 1, 1], [], []>} : vector<8x256xbf16>, vector<256x256xbf16>, vector<8x256xf32> -> vector<8x256xf32>
    %9 = arith.addf %3, %8 : vector<8x256xf32>
    %c0_8 = arith.constant 0 : index
    %c0_9 = arith.constant 0 : index
    %10 = vector.load %arg7[%c0_8, %c0_9] : memref<8x256xf32, #tpu.memory_space<vmem>>, vector<8x256xf32>
    tpu.vector_store %arg7[%c0_8, %c0_9], %9 {strides = array<i32>} : memref<8x256xf32, #tpu.memory_space<vmem>>, vector<8x256xf32>,
    %c0_i32_10 = arith.constant 0 : i32
    %11 = arith.cmpi eq, %arg2, %c0_i32_10 : i32
    %12 = arith.extui %11 : i1 to i32
    %c0_i32_11 = arith.constant 0 : i32
    %13 = arith.cmpi ne, %12, %c0_i32_11 : i32
    scf.if %13 {
      %c0_12 = arith.constant 0 : index
      %c0_13 = arith.constant 0 : index
      %14 = vector.load %arg7[%c0_12, %c0_13] : memref<8x256xf32, #tpu.memory_space<vmem>>, vector<8x256xf32>
      %c0_14 = arith.constant 0 : index
      %c0_15 = arith.constant 0 : index
      %15 = vector.load %arg5[%c0_14, %c0_15] : memref<8x1xf32, #tpu.memory_space<vmem>>, vector<8x1xf32>
      %16 = vector.broadcast %15 : vector<8x1xf32> to vector<8x256xf32>
      %17 = arith.addf %14, %16 : vector<8x256xf32>
      %cst_16 = arith.constant 0.000000e+00 : f32
      %18 = vector.broadcast %cst_16 : f32 to vector<8x256xf32>
      %19 = arith.cmpf oge, %17, %18 : vector<8x256xf32>
      %cst_17 = arith.constant 0.00999999977 : f32
      %20 = vector.broadcast %cst_17 : f32 to vector<8x256xf32>
      %21 = arith.mulf %20, %17 : vector<8x256xf32>
      %22 = arith.select %19, %17, %21 : vector<8x256xi1>, vector<8x256xf32>
      %23 = arith.truncf %22 : vector<8x256xf32> to vector<8x256xbf16>
      %c0_18 = arith.constant 0 : index
      %c0_19 = arith.constant 0 : index
      %c0_20 = arith.constant 0 : index
      %24 = vector.load %arg6[%c0_18, %c0_19, %c0_20] : memref<1x8x256xbf16, #tpu.memory_space<vmem>>, vector<1x8x256xbf16>
      %25 = vector.shape_cast %24 : vector<1x8x256xbf16> to vector<8x256xbf16>
      %26 = vector.shape_cast %23 : vector<8x256xbf16> to vector<1x8x256xbf16>
      tpu.vector_store %arg6[%c0_18, %c0_19, %c0_20], %26 {strides = array<i32>} : memref<1x8x256xbf16, #tpu.memory_space<vmem>>, vector<1x8x256xbf16>,
    } else {
    }
    return
  }
  func.func @transform_0(%arg0: i32, %arg1: i32, %arg2: i32) -> (i32, i32, i32) {
    %c0_i32 = arith.constant 0 : i32
    %c0_i32_0 = arith.constant 0 : i32
    return %arg0, %c0_i32, %arg2 : i32, i32, i32
  }
  func.func @transform_1(%arg0: i32, %arg1: i32, %arg2: i32) -> (i32, i32, i32) {
    %c0_i32 = arith.constant 0 : i32
    return %arg0, %arg2, %arg1 : i32, i32, i32
  }
  func.func @transform_2(%arg0: i32, %arg1: i32, %arg2: i32) -> (i32, i32) {
    %c0_i32 = arith.constant 0 : i32
    %c0_i32_0 = arith.constant 0 : i32
    %c0_i32_1 = arith.constant 0 : i32
    return %c0_i32, %c0_i32_0 : i32, i32
  }
  func.func @transform_3(%arg0: i32, %arg1: i32, %arg2: i32) -> (i32, i32, i32) {
    %c0_i32 = arith.constant 0 : i32
    %c0_i32_0 = arith.constant 0 : i32
    return %arg0, %c0_i32, %arg1 : i32, i32, i32
  }
}

module attributes {stable_mosaic.version = 11 : i64} {
  func.func @_gemm_kernel(%arg0: i32, %arg1: i32, %arg2: i32, %arg3: memref<1x16x256xbf16, #tpu.memory_space<vmem>>, %arg4: memref<1x256x64xbf16, #tpu.memory_space<vmem>>, %arg5: memref<16x1xf32, #tpu.memory_space<vmem>>, %arg6: memref<1x16x64xbf16, #tpu.memory_space<vmem>>, %arg7: memref<16x64xf32, #tpu.memory_space<vmem>>) attributes {dimension_semantics = [#tpu.dimension_semantics<parallel>, #tpu.dimension_semantics<parallel>, #tpu.dimension_semantics<arbitrary>], iteration_bounds = array<i64: 1, 1, 1>, scalar_prefetch = 0 : i64, scratch_operands = 1 : i64, tpu.core_type = #tpu.core_type<tc>, window_params = [{transform_indices = @transform_0, window_bounds = array<i64: 1, 16, 256>}, {transform_indices = @transform_1, window_bounds = array<i64: 1, 256, 64>}, {pipeline_mode = #tpu.pipeline_mode<synchronous>, transform_indices = @transform_2, window_bounds = array<i64: 16, 1>}, {transform_indices = @transform_3, window_bounds = array<i64: 1, 16, 64>}]} {
    %c0_i32 = arith.constant 0 : i32
    %0 = arith.cmpi eq, %arg2, %c0_i32 : i32
    %1 = arith.extui %0 : i1 to i32
    %c0_i32_0 = arith.constant 0 : i32
    %2 = arith.cmpi ne, %1, %c0_i32_0 : i32
    scf.if %2 {
      %cst_12 = arith.constant 0.000000e+00 : f32
      %14 = vector.broadcast %cst_12 : f32 to vector<16x64xf32>
      %c0_13 = arith.constant 0 : index
      %c0_14 = arith.constant 0 : index
      %15 = vector.load %arg7[%c0_13, %c0_14] : memref<16x64xf32, #tpu.memory_space<vmem>>, vector<16x64xf32>
      tpu.vector_store %arg7[%c0_13, %c0_14], %14 {strides = array<i32>} : memref<16x64xf32, #tpu.memory_space<vmem>>, vector<16x64xf32>,
    } else {
    }
    %c0 = arith.constant 0 : index
    %c0_1 = arith.constant 0 : index
    %3 = vector.load %arg7[%c0, %c0_1] : memref<16x64xf32, #tpu.memory_space<vmem>>, vector<16x64xf32>
    %c0_2 = arith.constant 0 : index
    %c0_3 = arith.constant 0 : index
    %c0_4 = arith.constant 0 : index
    %4 = vector.load %arg3[%c0_2, %c0_3, %c0_4] : memref<1x16x256xbf16, #tpu.memory_space<vmem>>, vector<1x16x256xbf16>
    %5 = vector.shape_cast %4 : vector<1x16x256xbf16> to vector<16x256xbf16>
    %c0_5 = arith.constant 0 : index
    %c0_6 = arith.constant 0 : index
    %c0_7 = arith.constant 0 : index
    %6 = vector.load %arg4[%c0_5, %c0_6, %c0_7] : memref<1x256x64xbf16, #tpu.memory_space<vmem>>, vector<1x256x64xbf16>
    %7 = vector.shape_cast %6 : vector<1x256x64xbf16> to vector<256x64xbf16>
    %cst = arith.constant dense<0.000000e+00> : vector<16x64xf32>
    %8 = tpu.matmul %5, %7, %cst {dimension_numbers = #tpu.dot_dimension_numbers<[1], [0], [0], [1], [0, 0, 1, 1], [], []>} : vector<16x256xbf16>, vector<256x64xbf16>, vector<16x64xf32> -> vector<16x64xf32>
    %9 = arith.addf %3, %8 : vector<16x64xf32>
    %c0_8 = arith.constant 0 : index
    %c0_9 = arith.constant 0 : index
    %10 = vector.load %arg7[%c0_8, %c0_9] : memref<16x64xf32, #tpu.memory_space<vmem>>, vector<16x64xf32>
    tpu.vector_store %arg7[%c0_8, %c0_9], %9 {strides = array<i32>} : memref<16x64xf32, #tpu.memory_space<vmem>>, vector<16x64xf32>,
    %c0_i32_10 = arith.constant 0 : i32
    %11 = arith.cmpi eq, %arg2, %c0_i32_10 : i32
    %12 = arith.extui %11 : i1 to i32
    %c0_i32_11 = arith.constant 0 : i32
    %13 = arith.cmpi ne, %12, %c0_i32_11 : i32
    scf.if %13 {
      %c0_12 = arith.constant 0 : index
      %c0_13 = arith.constant 0 : index
      %14 = vector.load %arg7[%c0_12, %c0_13] : memref<16x64xf32, #tpu.memory_space<vmem>>, vector<16x64xf32>
      %c0_14 = arith.constant 0 : index
      %c0_15 = arith.constant 0 : index
      %15 = vector.load %arg5[%c0_14, %c0_15] : memref<16x1xf32, #tpu.memory_space<vmem>>, vector<16x1xf32>
      %16 = vector.broadcast %15 : vector<16x1xf32> to vector<16x64xf32>
      %17 = arith.addf %14, %16 : vector<16x64xf32>
      %cst_16 = arith.constant 0.000000e+00 : f32
      %18 = vector.broadcast %cst_16 : f32 to vector<16x64xf32>
      %19 = arith.cmpf oge, %17, %18 : vector<16x64xf32>
      %cst_17 = arith.constant 0.00999999977 : f32
      %20 = vector.broadcast %cst_17 : f32 to vector<16x64xf32>
      %21 = arith.mulf %20, %17 : vector<16x64xf32>
      %22 = arith.select %19, %17, %21 : vector<16x64xi1>, vector<16x64xf32>
      %23 = arith.truncf %22 : vector<16x64xf32> to vector<16x64xbf16>
      %c0_18 = arith.constant 0 : index
      %c0_19 = arith.constant 0 : index
      %c0_20 = arith.constant 0 : index
      %24 = vector.load %arg6[%c0_18, %c0_19, %c0_20] : memref<1x16x64xbf16, #tpu.memory_space<vmem>>, vector<1x16x64xbf16>
      %25 = vector.shape_cast %24 : vector<1x16x64xbf16> to vector<16x64xbf16>
      %26 = vector.shape_cast %23 : vector<16x64xbf16> to vector<1x16x64xbf16>
      tpu.vector_store %arg6[%c0_18, %c0_19, %c0_20], %26 {strides = array<i32>} : memref<1x16x64xbf16, #tpu.memory_space<vmem>>, vector<1x16x64xbf16>,
    } else {
    }
    return
  }
  func.func @transform_0(%arg0: i32, %arg1: i32, %arg2: i32) -> (i32, i32, i32) {
    %c0_i32 = arith.constant 0 : i32
    %c0_i32_0 = arith.constant 0 : i32
    return %arg0, %c0_i32, %arg2 : i32, i32, i32
  }
  func.func @transform_1(%arg0: i32, %arg1: i32, %arg2: i32) -> (i32, i32, i32) {
    %c0_i32 = arith.constant 0 : i32
    return %arg0, %arg2, %arg1 : i32, i32, i32
  }
  func.func @transform_2(%arg0: i32, %arg1: i32, %arg2: i32) -> (i32, i32) {
    %c0_i32 = arith.constant 0 : i32
    %c0_i32_0 = arith.constant 0 : i32
    %c0_i32_1 = arith.constant 0 : i32
    return %c0_i32, %c0_i32_0 : i32, i32
  }
  func.func @transform_3(%arg0: i32, %arg1: i32, %arg2: i32) -> (i32, i32, i32) {
    %c0_i32 = arith.constant 0 : i32
    %c0_i32_0 = arith.constant 0 : i32
    return %arg0, %c0_i32, %arg1 : i32, i32, i32
  }
}

module attributes {stable_mosaic.version = 11 : i64} {
  func.func @_gemm_kernel(%arg0: i32, %arg1: i32, %arg2: i32, %arg3: memref<1x16x512xbf16, #tpu.memory_space<vmem>>, %arg4: memref<1x512x64xbf16, #tpu.memory_space<vmem>>, %arg5: memref<16x1xf32, #tpu.memory_space<vmem>>, %arg6: memref<1x16x64xbf16, #tpu.memory_space<vmem>>, %arg7: memref<16x64xf32, #tpu.memory_space<vmem>>) attributes {dimension_semantics = [#tpu.dimension_semantics<parallel>, #tpu.dimension_semantics<parallel>, #tpu.dimension_semantics<arbitrary>], iteration_bounds = array<i64: 1, 1, 1>, scalar_prefetch = 0 : i64, scratch_operands = 1 : i64, tpu.core_type = #tpu.core_type<tc>, window_params = [{transform_indices = @transform_0, window_bounds = array<i64: 1, 16, 512>}, {transform_indices = @transform_1, window_bounds = array<i64: 1, 512, 64>}, {pipeline_mode = #tpu.pipeline_mode<synchronous>, transform_indices = @transform_2, window_bounds = array<i64: 16, 1>}, {transform_indices = @transform_3, window_bounds = array<i64: 1, 16, 64>}]} {
    %c0_i32 = arith.constant 0 : i32
    %0 = arith.cmpi eq, %arg2, %c0_i32 : i32
    %1 = arith.extui %0 : i1 to i32
    %c0_i32_0 = arith.constant 0 : i32
    %2 = arith.cmpi ne, %1, %c0_i32_0 : i32
    scf.if %2 {
      %cst_12 = arith.constant 0.000000e+00 : f32
      %14 = vector.broadcast %cst_12 : f32 to vector<16x64xf32>
      %c0_13 = arith.constant 0 : index
      %c0_14 = arith.constant 0 : index
      %15 = vector.load %arg7[%c0_13, %c0_14] : memref<16x64xf32, #tpu.memory_space<vmem>>, vector<16x64xf32>
      tpu.vector_store %arg7[%c0_13, %c0_14], %14 {strides = array<i32>} : memref<16x64xf32, #tpu.memory_space<vmem>>, vector<16x64xf32>,
    } else {
    }
    %c0 = arith.constant 0 : index
    %c0_1 = arith.constant 0 : index
    %3 = vector.load %arg7[%c0, %c0_1] : memref<16x64xf32, #tpu.memory_space<vmem>>, vector<16x64xf32>
    %c0_2 = arith.constant 0 : index
    %c0_3 = arith.constant 0 : index
    %c0_4 = arith.constant 0 : index
    %4 = vector.load %arg3[%c0_2, %c0_3, %c0_4] : memref<1x16x512xbf16, #tpu.memory_space<vmem>>, vector<1x16x512xbf16>
    %5 = vector.shape_cast %4 : vector<1x16x512xbf16> to vector<16x512xbf16>
    %c0_5 = arith.constant 0 : index
    %c0_6 = arith.constant 0 : index
    %c0_7 = arith.constant 0 : index
    %6 = vector.load %arg4[%c0_5, %c0_6, %c0_7] : memref<1x512x64xbf16, #tpu.memory_space<vmem>>, vector<1x512x64xbf16>
    %7 = vector.shape_cast %6 : vector<1x512x64xbf16> to vector<512x64xbf16>
    %cst = arith.constant dense<0.000000e+00> : vector<16x64xf32>
    %8 = tpu.matmul %5, %7, %cst {dimension_numbers = #tpu.dot_dimension_numbers<[1], [0], [0], [1], [0, 0, 1, 1], [], []>} : vector<16x512xbf16>, vector<512x64xbf16>, vector<16x64xf32> -> vector<16x64xf32>
    %9 = arith.addf %3, %8 : vector<16x64xf32>
    %c0_8 = arith.constant 0 : index
    %c0_9 = arith.constant 0 : index
    %10 = vector.load %arg7[%c0_8, %c0_9] : memref<16x64xf32, #tpu.memory_space<vmem>>, vector<16x64xf32>
    tpu.vector_store %arg7[%c0_8, %c0_9], %9 {strides = array<i32>} : memref<16x64xf32, #tpu.memory_space<vmem>>, vector<16x64xf32>,
    %c0_i32_10 = arith.constant 0 : i32
    %11 = arith.cmpi eq, %arg2, %c0_i32_10 : i32
    %12 = arith.extui %11 : i1 to i32
    %c0_i32_11 = arith.constant 0 : i32
    %13 = arith.cmpi ne, %12, %c0_i32_11 : i32
    scf.if %13 {
      %c0_12 = arith.constant 0 : index
      %c0_13 = arith.constant 0 : index
      %14 = vector.load %arg7[%c0_12, %c0_13] : memref<16x64xf32, #tpu.memory_space<vmem>>, vector<16x64xf32>
      %c0_14 = arith.constant 0 : index
      %c0_15 = arith.constant 0 : index
      %15 = vector.load %arg5[%c0_14, %c0_15] : memref<16x1xf32, #tpu.memory_space<vmem>>, vector<16x1xf32>
      %16 = vector.broadcast %15 : vector<16x1xf32> to vector<16x64xf32>
      %17 = arith.addf %14, %16 : vector<16x64xf32>
      %cst_16 = arith.constant 0.000000e+00 : f32
      %18 = vector.broadcast %cst_16 : f32 to vector<16x64xf32>
      %19 = arith.cmpf oge, %17, %18 : vector<16x64xf32>
      %cst_17 = arith.constant 0.00999999977 : f32
      %20 = vector.broadcast %cst_17 : f32 to vector<16x64xf32>
      %21 = arith.mulf %20, %17 : vector<16x64xf32>
      %22 = arith.select %19, %17, %21 : vector<16x64xi1>, vector<16x64xf32>
      %23 = arith.truncf %22 : vector<16x64xf32> to vector<16x64xbf16>
      %c0_18 = arith.constant 0 : index
      %c0_19 = arith.constant 0 : index
      %c0_20 = arith.constant 0 : index
      %24 = vector.load %arg6[%c0_18, %c0_19, %c0_20] : memref<1x16x64xbf16, #tpu.memory_space<vmem>>, vector<1x16x64xbf16>
      %25 = vector.shape_cast %24 : vector<1x16x64xbf16> to vector<16x64xbf16>
      %26 = vector.shape_cast %23 : vector<16x64xbf16> to vector<1x16x64xbf16>
      tpu.vector_store %arg6[%c0_18, %c0_19, %c0_20], %26 {strides = array<i32>} : memref<1x16x64xbf16, #tpu.memory_space<vmem>>, vector<1x16x64xbf16>,
    } else {
    }
    return
  }
  func.func @transform_0(%arg0: i32, %arg1: i32, %arg2: i32) -> (i32, i32, i32) {
    %c0_i32 = arith.constant 0 : i32
    %c0_i32_0 = arith.constant 0 : i32
    return %arg0, %c0_i32, %arg2 : i32, i32, i32
  }
  func.func @transform_1(%arg0: i32, %arg1: i32, %arg2: i32) -> (i32, i32, i32) {
    %c0_i32 = arith.constant 0 : i32
    return %arg0, %arg2, %arg1 : i32, i32, i32
  }
  func.func @transform_2(%arg0: i32, %arg1: i32, %arg2: i32) -> (i32, i32) {
    %c0_i32 = arith.constant 0 : i32
    %c0_i32_0 = arith.constant 0 : i32
    %c0_i32_1 = arith.constant 0 : i32
    return %c0_i32, %c0_i32_0 : i32, i32
  }
  func.func @transform_3(%arg0: i32, %arg1: i32, %arg2: i32) -> (i32, i32, i32) {
    %c0_i32 = arith.constant 0 : i32
    %c0_i32_0 = arith.constant 0 : i32
    return %arg0, %c0_i32, %arg1 : i32, i32, i32
  }
}

module attributes {stable_mosaic.version = 11 : i64} {
  func.func @_gemm_kernel(%arg0: i32, %arg1: i32, %arg2: i32, %arg3: memref<1x24x512xbf16, #tpu.memory_space<vmem>>, %arg4: memref<1x512x8xbf16, #tpu.memory_space<vmem>>, %arg5: memref<24x1xf32, #tpu.memory_space<vmem>>, %arg6: memref<1x24x8xbf16, #tpu.memory_space<vmem>>, %arg7: memref<24x8xf32, #tpu.memory_space<vmem>>) attributes {dimension_semantics = [#tpu.dimension_semantics<parallel>, #tpu.dimension_semantics<parallel>, #tpu.dimension_semantics<arbitrary>], iteration_bounds = array<i64: 1, 1, 1>, scalar_prefetch = 0 : i64, scratch_operands = 1 : i64, tpu.core_type = #tpu.core_type<tc>, window_params = [{transform_indices = @transform_0, window_bounds = array<i64: 1, 24, 512>}, {transform_indices = @transform_1, window_bounds = array<i64: 1, 512, 8>}, {pipeline_mode = #tpu.pipeline_mode<synchronous>, transform_indices = @transform_2, window_bounds = array<i64: 24, 1>}, {transform_indices = @transform_3, window_bounds = array<i64: 1, 24, 8>}]} {
    %c0_i32 = arith.constant 0 : i32
    %0 = arith.cmpi eq, %arg2, %c0_i32 : i32
    %1 = arith.extui %0 : i1 to i32
    %c0_i32_0 = arith.constant 0 : i32
    %2 = arith.cmpi ne, %1, %c0_i32_0 : i32
    scf.if %2 {
      %cst_12 = arith.constant 0.000000e+00 : f32
      %14 = vector.broadcast %cst_12 : f32 to vector<24x8xf32>
      %c0_13 = arith.constant 0 : index
      %c0_14 = arith.constant 0 : index
      %15 = vector.load %arg7[%c0_13, %c0_14] : memref<24x8xf32, #tpu.memory_space<vmem>>, vector<24x8xf32>
      tpu.vector_store %arg7[%c0_13, %c0_14], %14 {strides = array<i32>} : memref<24x8xf32, #tpu.memory_space<vmem>>, vector<24x8xf32>,
    } else {
    }
    %c0 = arith.constant 0 : index
    %c0_1 = arith.constant 0 : index
    %3 = vector.load %arg7[%c0, %c0_1] : memref<24x8xf32, #tpu.memory_space<vmem>>, vector<24x8xf32>
    %c0_2 = arith.constant 0 : index
    %c0_3 = arith.constant 0 : index
    %c0_4 = arith.constant 0 : index
    %4 = vector.load %arg3[%c0_2, %c0_3, %c0_4] : memref<1x24x512xbf16, #tpu.memory_space<vmem>>, vector<1x24x512xbf16>
    %5 = vector.shape_cast %4 : vector<1x24x512xbf16> to vector<24x512xbf16>
    %c0_5 = arith.constant 0 : index
    %c0_6 = arith.constant 0 : index
    %c0_7 = arith.constant 0 : index
    %6 = vector.load %arg4[%c0_5, %c0_6, %c0_7] : memref<1x512x8xbf16, #tpu.memory_space<vmem>>, vector<1x512x8xbf16>
    %7 = vector.shape_cast %6 : vector<1x512x8xbf16> to vector<512x8xbf16>
    %cst = arith.constant dense<0.000000e+00> : vector<24x8xf32>
    %8 = tpu.matmul %5, %7, %cst {dimension_numbers = #tpu.dot_dimension_numbers<[1], [0], [0], [1], [0, 0, 1, 1], [], []>} : vector<24x512xbf16>, vector<512x8xbf16>, vector<24x8xf32> -> vector<24x8xf32>
    %9 = arith.addf %3, %8 : vector<24x8xf32>
    %c0_8 = arith.constant 0 : index
    %c0_9 = arith.constant 0 : index
    %10 = vector.load %arg7[%c0_8, %c0_9] : memref<24x8xf32, #tpu.memory_space<vmem>>, vector<24x8xf32>
    tpu.vector_store %arg7[%c0_8, %c0_9], %9 {strides = array<i32>} : memref<24x8xf32, #tpu.memory_space<vmem>>, vector<24x8xf32>,
    %c0_i32_10 = arith.constant 0 : i32
    %11 = arith.cmpi eq, %arg2, %c0_i32_10 : i32
    %12 = arith.extui %11 : i1 to i32
    %c0_i32_11 = arith.constant 0 : i32
    %13 = arith.cmpi ne, %12, %c0_i32_11 : i32
    scf.if %13 {
      %c0_12 = arith.constant 0 : index
      %c0_13 = arith.constant 0 : index
      %14 = vector.load %arg7[%c0_12, %c0_13] : memref<24x8xf32, #tpu.memory_space<vmem>>, vector<24x8xf32>
      %c0_14 = arith.constant 0 : index
      %c0_15 = arith.constant 0 : index
      %15 = vector.load %arg5[%c0_14, %c0_15] : memref<24x1xf32, #tpu.memory_space<vmem>>, vector<24x1xf32>
      %16 = vector.broadcast %15 : vector<24x1xf32> to vector<24x8xf32>
      %17 = arith.addf %14, %16 : vector<24x8xf32>
      %cst_16 = arith.constant 0.000000e+00 : f32
      %18 = vector.broadcast %cst_16 : f32 to vector<24x8xf32>
      %19 = arith.cmpf oge, %17, %18 : vector<24x8xf32>
      %cst_17 = arith.constant 0.00999999977 : f32
      %20 = vector.broadcast %cst_17 : f32 to vector<24x8xf32>
      %21 = arith.mulf %20, %17 : vector<24x8xf32>
      %22 = arith.select %19, %17, %21 : vector<24x8xi1>, vector<24x8xf32>
      %23 = arith.truncf %22 : vector<24x8xf32> to vector<24x8xbf16>
      %c0_18 = arith.constant 0 : index
      %c0_19 = arith.constant 0 : index
      %c0_20 = arith.constant 0 : index
      %24 = vector.load %arg6[%c0_18, %c0_19, %c0_20] : memref<1x24x8xbf16, #tpu.memory_space<vmem>>, vector<1x24x8xbf16>
      %25 = vector.shape_cast %24 : vector<1x24x8xbf16> to vector<24x8xbf16>
      %26 = vector.shape_cast %23 : vector<24x8xbf16> to vector<1x24x8xbf16>
      tpu.vector_store %arg6[%c0_18, %c0_19, %c0_20], %26 {strides = array<i32>} : memref<1x24x8xbf16, #tpu.memory_space<vmem>>, vector<1x24x8xbf16>,
    } else {
    }
    return
  }
  func.func @transform_0(%arg0: i32, %arg1: i32, %arg2: i32) -> (i32, i32, i32) {
    %c0_i32 = arith.constant 0 : i32
    %c0_i32_0 = arith.constant 0 : i32
    return %arg0, %c0_i32, %arg2 : i32, i32, i32
  }
  func.func @transform_1(%arg0: i32, %arg1: i32, %arg2: i32) -> (i32, i32, i32) {
    %c0_i32 = arith.constant 0 : i32
    return %arg0, %arg2, %arg1 : i32, i32, i32
  }
  func.func @transform_2(%arg0: i32, %arg1: i32, %arg2: i32) -> (i32, i32) {
    %c0_i32 = arith.constant 0 : i32
    %c0_i32_0 = arith.constant 0 : i32
    %c0_i32_1 = arith.constant 0 : i32
    return %c0_i32, %c0_i32_0 : i32, i32
  }
  func.func @transform_3(%arg0: i32, %arg1: i32, %arg2: i32) -> (i32, i32, i32) {
    %c0_i32 = arith.constant 0 : i32
    %c0_i32_0 = arith.constant 0 : i32
    return %arg0, %c0_i32, %arg1 : i32, i32, i32
  }
}

module attributes {stable_mosaic.version = 11 : i64} {
  func.func @_gemm_kernel(%arg0: i32, %arg1: i32, %arg2: i32, %arg3: memref<1x24x768xbf16, #tpu.memory_space<vmem>>, %arg4: memref<1x768x8xbf16, #tpu.memory_space<vmem>>, %arg5: memref<24x1xf32, #tpu.memory_space<vmem>>, %arg6: memref<1x24x8xf32, #tpu.memory_space<vmem>>, %arg7: memref<24x8xf32, #tpu.memory_space<vmem>>) attributes {dimension_semantics = [#tpu.dimension_semantics<parallel>, #tpu.dimension_semantics<parallel>, #tpu.dimension_semantics<arbitrary>], iteration_bounds = array<i64: 1, 1, 1>, scalar_prefetch = 0 : i64, scratch_operands = 1 : i64, tpu.core_type = #tpu.core_type<tc>, window_params = [{transform_indices = @transform_0, window_bounds = array<i64: 1, 24, 768>}, {transform_indices = @transform_1, window_bounds = array<i64: 1, 768, 8>}, {pipeline_mode = #tpu.pipeline_mode<synchronous>, transform_indices = @transform_2, window_bounds = array<i64: 24, 1>}, {transform_indices = @transform_3, window_bounds = array<i64: 1, 24, 8>}]} {
    %c0_i32 = arith.constant 0 : i32
    %0 = arith.cmpi eq, %arg2, %c0_i32 : i32
    %1 = arith.extui %0 : i1 to i32
    %c0_i32_0 = arith.constant 0 : i32
    %2 = arith.cmpi ne, %1, %c0_i32_0 : i32
    scf.if %2 {
      %cst_12 = arith.constant 0.000000e+00 : f32
      %14 = vector.broadcast %cst_12 : f32 to vector<24x8xf32>
      %c0_13 = arith.constant 0 : index
      %c0_14 = arith.constant 0 : index
      %15 = vector.load %arg7[%c0_13, %c0_14] : memref<24x8xf32, #tpu.memory_space<vmem>>, vector<24x8xf32>
      tpu.vector_store %arg7[%c0_13, %c0_14], %14 {strides = array<i32>} : memref<24x8xf32, #tpu.memory_space<vmem>>, vector<24x8xf32>,
    } else {
    }
    %c0 = arith.constant 0 : index
    %c0_1 = arith.constant 0 : index
    %3 = vector.load %arg7[%c0, %c0_1] : memref<24x8xf32, #tpu.memory_space<vmem>>, vector<24x8xf32>
    %c0_2 = arith.constant 0 : index
    %c0_3 = arith.constant 0 : index
    %c0_4 = arith.constant 0 : index
    %4 = vector.load %arg3[%c0_2, %c0_3, %c0_4] : memref<1x24x768xbf16, #tpu.memory_space<vmem>>, vector<1x24x768xbf16>
    %5 = vector.shape_cast %4 : vector<1x24x768xbf16> to vector<24x768xbf16>
    %c0_5 = arith.constant 0 : index
    %c0_6 = arith.constant 0 : index
    %c0_7 = arith.constant 0 : index
    %6 = vector.load %arg4[%c0_5, %c0_6, %c0_7] : memref<1x768x8xbf16, #tpu.memory_space<vmem>>, vector<1x768x8xbf16>
    %7 = vector.shape_cast %6 : vector<1x768x8xbf16> to vector<768x8xbf16>
    %cst = arith.constant dense<0.000000e+00> : vector<24x8xf32>
    %8 = tpu.matmul %5, %7, %cst {dimension_numbers = #tpu.dot_dimension_numbers<[1], [0], [0], [1], [0, 0, 1, 1], [], []>} : vector<24x768xbf16>, vector<768x8xbf16>, vector<24x8xf32> -> vector<24x8xf32>
    %9 = arith.addf %3, %8 : vector<24x8xf32>
    %c0_8 = arith.constant 0 : index
    %c0_9 = arith.constant 0 : index
    %10 = vector.load %arg7[%c0_8, %c0_9] : memref<24x8xf32, #tpu.memory_space<vmem>>, vector<24x8xf32>
    tpu.vector_store %arg7[%c0_8, %c0_9], %9 {strides = array<i32>} : memref<24x8xf32, #tpu.memory_space<vmem>>, vector<24x8xf32>,
    %c0_i32_10 = arith.constant 0 : i32
    %11 = arith.cmpi eq, %arg2, %c0_i32_10 : i32
    %12 = arith.extui %11 : i1 to i32
    %c0_i32_11 = arith.constant 0 : i32
    %13 = arith.cmpi ne, %12, %c0_i32_11 : i32
    scf.if %13 {
      %c0_12 = arith.constant 0 : index
      %c0_13 = arith.constant 0 : index
      %14 = vector.load %arg7[%c0_12, %c0_13] : memref<24x8xf32, #tpu.memory_space<vmem>>, vector<24x8xf32>
      %c0_14 = arith.constant 0 : index
      %c0_15 = arith.constant 0 : index
      %15 = vector.load %arg5[%c0_14, %c0_15] : memref<24x1xf32, #tpu.memory_space<vmem>>, vector<24x1xf32>
      %16 = vector.broadcast %15 : vector<24x1xf32> to vector<24x8xf32>
      %17 = arith.addf %14, %16 : vector<24x8xf32>
      %cst_16 = arith.constant 0.000000e+00 : f32
      %18 = vector.broadcast %cst_16 : f32 to vector<24x8xf32>
      %19 = arith.cmpf oge, %17, %18 : vector<24x8xf32>
      %cst_17 = arith.constant 0.00999999977 : f32
      %20 = vector.broadcast %cst_17 : f32 to vector<24x8xf32>
      %21 = arith.mulf %20, %17 : vector<24x8xf32>
      %22 = arith.select %19, %17, %21 : vector<24x8xi1>, vector<24x8xf32>
      %c0_18 = arith.constant 0 : index
      %c0_19 = arith.constant 0 : index
      %c0_20 = arith.constant 0 : index
      %23 = vector.load %arg6[%c0_18, %c0_19, %c0_20] : memref<1x24x8xf32, #tpu.memory_space<vmem>>, vector<1x24x8xf32>
      %24 = vector.shape_cast %23 : vector<1x24x8xf32> to vector<24x8xf32>
      %25 = vector.shape_cast %22 : vector<24x8xf32> to vector<1x24x8xf32>
      tpu.vector_store %arg6[%c0_18, %c0_19, %c0_20], %25 {strides = array<i32>} : memref<1x24x8xf32, #tpu.memory_space<vmem>>, vector<1x24x8xf32>,
    } else {
    }
    return
  }
  func.func @transform_0(%arg0: i32, %arg1: i32, %arg2: i32) -> (i32, i32, i32) {
    %c0_i32 = arith.constant 0 : i32
    %c0_i32_0 = arith.constant 0 : i32
    return %arg0, %c0_i32, %arg2 : i32, i32, i32
  }
  func.func @transform_1(%arg0: i32, %arg1: i32, %arg2: i32) -> (i32, i32, i32) {
    %c0_i32 = arith.constant 0 : i32
    return %arg0, %arg2, %arg1 : i32, i32, i32
  }
  func.func @transform_2(%arg0: i32, %arg1: i32, %arg2: i32) -> (i32, i32) {
    %c0_i32 = arith.constant 0 : i32
    %c0_i32_0 = arith.constant 0 : i32
    %c0_i32_1 = arith.constant 0 : i32
    return %c0_i32, %c0_i32_0 : i32, i32
  }
  func.func @transform_3(%arg0: i32, %arg1: i32, %arg2: i32) -> (i32, i32, i32) {
    %c0_i32 = arith.constant 0 : i32
    %c0_i32_0 = arith.constant 0 : i32
    return %arg0, %c0_i32, %arg1 : i32, i32, i32
  }
}

module attributes {stable_mosaic.version = 11 : i64} {
  func.func @_gemm_kernel(%arg0: i32, %arg1: i32, %arg2: i32, %arg3: memref<1x16x256xbf16, #tpu.memory_space<vmem>>, %arg4: memref<1x256x8xbf16, #tpu.memory_space<vmem>>, %arg5: memref<16x1xf32, #tpu.memory_space<vmem>>, %arg6: memref<1x16x8xbf16, #tpu.memory_space<vmem>>, %arg7: memref<16x8xf32, #tpu.memory_space<vmem>>) attributes {dimension_semantics = [#tpu.dimension_semantics<parallel>, #tpu.dimension_semantics<parallel>, #tpu.dimension_semantics<arbitrary>], iteration_bounds = array<i64: 8, 1, 1>, scalar_prefetch = 0 : i64, scratch_operands = 1 : i64, tpu.core_type = #tpu.core_type<tc>, window_params = [{transform_indices = @transform_0, window_bounds = array<i64: 1, 16, 256>}, {transform_indices = @transform_1, window_bounds = array<i64: 1, 256, 8>}, {pipeline_mode = #tpu.pipeline_mode<synchronous>, transform_indices = @transform_2, window_bounds = array<i64: 16, 1>}, {transform_indices = @transform_3, window_bounds = array<i64: 1, 16, 8>}]} {
    %c0_i32 = arith.constant 0 : i32
    %0 = arith.cmpi eq, %arg2, %c0_i32 : i32
    %1 = arith.extui %0 : i1 to i32
    %c0_i32_0 = arith.constant 0 : i32
    %2 = arith.cmpi ne, %1, %c0_i32_0 : i32
    scf.if %2 {
      %cst_12 = arith.constant 0.000000e+00 : f32
      %14 = vector.broadcast %cst_12 : f32 to vector<16x8xf32>
      %c0_13 = arith.constant 0 : index
      %c0_14 = arith.constant 0 : index
      %15 = vector.load %arg7[%c0_13, %c0_14] : memref<16x8xf32, #tpu.memory_space<vmem>>, vector<16x8xf32>
      tpu.vector_store %arg7[%c0_13, %c0_14], %14 {strides = array<i32>} : memref<16x8xf32, #tpu.memory_space<vmem>>, vector<16x8xf32>,
    } else {
    }
    %c0 = arith.constant 0 : index
    %c0_1 = arith.constant 0 : index
    %3 = vector.load %arg7[%c0, %c0_1] : memref<16x8xf32, #tpu.memory_space<vmem>>, vector<16x8xf32>
    %c0_2 = arith.constant 0 : index
    %c0_3 = arith.constant 0 : index
    %c0_4 = arith.constant 0 : index
    %4 = vector.load %arg3[%c0_2, %c0_3, %c0_4] : memref<1x16x256xbf16, #tpu.memory_space<vmem>>, vector<1x16x256xbf16>
    %5 = vector.shape_cast %4 : vector<1x16x256xbf16> to vector<16x256xbf16>
    %c0_5 = arith.constant 0 : index
    %c0_6 = arith.constant 0 : index
    %c0_7 = arith.constant 0 : index
    %6 = vector.load %arg4[%c0_5, %c0_6, %c0_7] : memref<1x256x8xbf16, #tpu.memory_space<vmem>>, vector<1x256x8xbf16>
    %7 = vector.shape_cast %6 : vector<1x256x8xbf16> to vector<256x8xbf16>
    %cst = arith.constant dense<0.000000e+00> : vector<16x8xf32>
    %8 = tpu.matmul %5, %7, %cst {dimension_numbers = #tpu.dot_dimension_numbers<[1], [0], [0], [1], [0, 0, 1, 1], [], []>} : vector<16x256xbf16>, vector<256x8xbf16>, vector<16x8xf32> -> vector<16x8xf32>
    %9 = arith.addf %3, %8 : vector<16x8xf32>
    %c0_8 = arith.constant 0 : index
    %c0_9 = arith.constant 0 : index
    %10 = vector.load %arg7[%c0_8, %c0_9] : memref<16x8xf32, #tpu.memory_space<vmem>>, vector<16x8xf32>
    tpu.vector_store %arg7[%c0_8, %c0_9], %9 {strides = array<i32>} : memref<16x8xf32, #tpu.memory_space<vmem>>, vector<16x8xf32>,
    %c0_i32_10 = arith.constant 0 : i32
    %11 = arith.cmpi eq, %arg2, %c0_i32_10 : i32
    %12 = arith.extui %11 : i1 to i32
    %c0_i32_11 = arith.constant 0 : i32
    %13 = arith.cmpi ne, %12, %c0_i32_11 : i32
    scf.if %13 {
      %c0_12 = arith.constant 0 : index
      %c0_13 = arith.constant 0 : index
      %14 = vector.load %arg7[%c0_12, %c0_13] : memref<16x8xf32, #tpu.memory_space<vmem>>, vector<16x8xf32>
      %c0_14 = arith.constant 0 : index
      %c0_15 = arith.constant 0 : index
      %15 = vector.load %arg5[%c0_14, %c0_15] : memref<16x1xf32, #tpu.memory_space<vmem>>, vector<16x1xf32>
      %16 = vector.broadcast %15 : vector<16x1xf32> to vector<16x8xf32>
      %17 = arith.addf %14, %16 : vector<16x8xf32>
      %cst_16 = arith.constant 0.000000e+00 : f32
      %18 = vector.broadcast %cst_16 : f32 to vector<16x8xf32>
      %19 = arith.cmpf oge, %17, %18 : vector<16x8xf32>
      %cst_17 = arith.constant 0.00999999977 : f32
      %20 = vector.broadcast %cst_17 : f32 to vector<16x8xf32>
      %21 = arith.mulf %20, %17 : vector<16x8xf32>
      %22 = arith.select %19, %17, %21 : vector<16x8xi1>, vector<16x8xf32>
      %23 = arith.truncf %22 : vector<16x8xf32> to vector<16x8xbf16>
      %c0_18 = arith.constant 0 : index
      %c0_19 = arith.constant 0 : index
      %c0_20 = arith.constant 0 : index
      %24 = vector.load %arg6[%c0_18, %c0_19, %c0_20] : memref<1x16x8xbf16, #tpu.memory_space<vmem>>, vector<1x16x8xbf16>
      %25 = vector.shape_cast %24 : vector<1x16x8xbf16> to vector<16x8xbf16>
      %26 = vector.shape_cast %23 : vector<16x8xbf16> to vector<1x16x8xbf16>
      tpu.vector_store %arg6[%c0_18, %c0_19, %c0_20], %26 {strides = array<i32>} : memref<1x16x8xbf16, #tpu.memory_space<vmem>>, vector<1x16x8xbf16>,
    } else {
    }
    return
  }
  func.func @transform_0(%arg0: i32, %arg1: i32, %arg2: i32) -> (i32, i32, i32) {
    %c0_i32 = arith.constant 0 : i32
    %c0_i32_0 = arith.constant 0 : i32
    return %arg0, %c0_i32, %arg2 : i32, i32, i32
  }
  func.func @transform_1(%arg0: i32, %arg1: i32, %arg2: i32) -> (i32, i32, i32) {
    %c0_i32 = arith.constant 0 : i32
    return %arg0, %arg2, %arg1 : i32, i32, i32
  }
  func.func @transform_2(%arg0: i32, %arg1: i32, %arg2: i32) -> (i32, i32) {
    %c0_i32 = arith.constant 0 : i32
    %c0_i32_0 = arith.constant 0 : i32
    %c0_i32_1 = arith.constant 0 : i32
    return %c0_i32, %c0_i32_0 : i32, i32
  }
  func.func @transform_3(%arg0: i32, %arg1: i32, %arg2: i32) -> (i32, i32, i32) {
    %c0_i32 = arith.constant 0 : i32
    %c0_i32_0 = arith.constant 0 : i32
    return %arg0, %c0_i32, %arg1 : i32, i32, i32
  }
}

module attributes {stable_mosaic.version = 11 : i64} {
  func.func @_cat1x1_kernel(%arg0: i32, %arg1: memref<16x16xbf16, #tpu.memory_space<vmem>>, %arg2: memref<16x16xbf16, #tpu.memory_space<vmem>>, %arg3: memref<16x64xbf16, #tpu.memory_space<vmem>>, %arg4: memref<16x64xbf16, #tpu.memory_space<vmem>>, %arg5: memref<16x1xf32, #tpu.memory_space<vmem>>, %arg6: memref<16x64xbf16, #tpu.memory_space<vmem>>) attributes {dimension_semantics = [#tpu.dimension_semantics<parallel>], iteration_bounds = array<i64: 1>, scalar_prefetch = 0 : i64, scratch_operands = 0 : i64, tpu.core_type = #tpu.core_type<tc>, window_params = [{pipeline_mode = #tpu.pipeline_mode<synchronous>, transform_indices = @transform_0, window_bounds = array<i64: 16, 16>}, {pipeline_mode = #tpu.pipeline_mode<synchronous>, transform_indices = @transform_1, window_bounds = array<i64: 16, 16>}, {transform_indices = @transform_2, window_bounds = array<i64: 16, 64>}, {transform_indices = @transform_3, window_bounds = array<i64: 16, 64>}, {pipeline_mode = #tpu.pipeline_mode<synchronous>, transform_indices = @transform_4, window_bounds = array<i64: 16, 1>}, {transform_indices = @transform_5, window_bounds = array<i64: 16, 64>}]} {
    %c0 = arith.constant 0 : index
    %c0_0 = arith.constant 0 : index
    %0 = vector.load %arg1[%c0, %c0_0] : memref<16x16xbf16, #tpu.memory_space<vmem>>, vector<16x16xbf16>
    %c0_1 = arith.constant 0 : index
    %c0_2 = arith.constant 0 : index
    %1 = vector.load %arg3[%c0_1, %c0_2] : memref<16x64xbf16, #tpu.memory_space<vmem>>, vector<16x64xbf16>
    %cst = arith.constant dense<0.000000e+00> : vector<16x64xf32>
    %2 = tpu.matmul %0, %1, %cst {dimension_numbers = #tpu.dot_dimension_numbers<[1], [0], [0], [1], [0, 0, 1, 1], [], []>} : vector<16x16xbf16>, vector<16x64xbf16>, vector<16x64xf32> -> vector<16x64xf32>
    %c0_3 = arith.constant 0 : index
    %c0_4 = arith.constant 0 : index
    %3 = vector.load %arg2[%c0_3, %c0_4] : memref<16x16xbf16, #tpu.memory_space<vmem>>, vector<16x16xbf16>
    %c0_5 = arith.constant 0 : index
    %c0_6 = arith.constant 0 : index
    %4 = vector.load %arg4[%c0_5, %c0_6] : memref<16x64xbf16, #tpu.memory_space<vmem>>, vector<16x64xbf16>
    %cst_7 = arith.constant dense<0.000000e+00> : vector<16x64xf32>
    %5 = tpu.matmul %3, %4, %cst_7 {dimension_numbers = #tpu.dot_dimension_numbers<[1], [0], [0], [1], [0, 0, 1, 1], [], []>} : vector<16x16xbf16>, vector<16x64xbf16>, vector<16x64xf32> -> vector<16x64xf32>
    %6 = arith.addf %2, %5 : vector<16x64xf32>
    %c0_8 = arith.constant 0 : index
    %c0_9 = arith.constant 0 : index
    %7 = vector.load %arg5[%c0_8, %c0_9] : memref<16x1xf32, #tpu.memory_space<vmem>>, vector<16x1xf32>
    %8 = vector.broadcast %7 : vector<16x1xf32> to vector<16x64xf32>
    %9 = arith.addf %6, %8 : vector<16x64xf32>
    %cst_10 = arith.constant 0.000000e+00 : f32
    %10 = vector.broadcast %cst_10 : f32 to vector<16x64xf32>
    %11 = arith.cmpf oge, %9, %10 : vector<16x64xf32>
    %cst_11 = arith.constant 0.00999999977 : f32
    %12 = vector.broadcast %cst_11 : f32 to vector<16x64xf32>
    %13 = arith.mulf %12, %9 : vector<16x64xf32>
    %14 = arith.select %11, %9, %13 : vector<16x64xi1>, vector<16x64xf32>
    %15 = arith.truncf %14 : vector<16x64xf32> to vector<16x64xbf16>
    %c0_12 = arith.constant 0 : index
    %c0_13 = arith.constant 0 : index
    %16 = vector.load %arg6[%c0_12, %c0_13] : memref<16x64xbf16, #tpu.memory_space<vmem>>, vector<16x64xbf16>
    tpu.vector_store %arg6[%c0_12, %c0_13], %15 {strides = array<i32>} : memref<16x64xbf16, #tpu.memory_space<vmem>>, vector<16x64xbf16>,
    return
  }
  func.func @transform_0(%arg0: i32) -> (i32, i32) {
    %c0_i32 = arith.constant 0 : i32
    %c0_i32_0 = arith.constant 0 : i32
    %c0_i32_1 = arith.constant 0 : i32
    return %c0_i32, %c0_i32_0 : i32, i32
  }
  func.func @transform_1(%arg0: i32) -> (i32, i32) {
    %c0_i32 = arith.constant 0 : i32
    %c0_i32_0 = arith.constant 0 : i32
    %c0_i32_1 = arith.constant 0 : i32
    return %c0_i32, %c0_i32_0 : i32, i32
  }
  func.func @transform_2(%arg0: i32) -> (i32, i32) {
    %c0_i32 = arith.constant 0 : i32
    %c0_i32_0 = arith.constant 0 : i32
    return %c0_i32, %arg0 : i32, i32
  }
  func.func @transform_3(%arg0: i32) -> (i32, i32) {
    %c0_i32 = arith.constant 0 : i32
    %c0_i32_0 = arith.constant 0 : i32
    return %c0_i32, %arg0 : i32, i32
  }
  func.func @transform_4(%arg0: i32) -> (i32, i32) {
    %c0_i32 = arith.constant 0 : i32
    %c0_i32_0 = arith.constant 0 : i32
    %c0_i32_1 = arith.constant 0 : i32
    return %c0_i32, %c0_i32_0 : i32, i32
  }
  func.func @transform_5(%arg0: i32) -> (i32, i32) {
    %c0_i32 = arith.constant 0 : i32
    %c0_i32_0 = arith.constant 0 : i32
    return %c0_i32, %arg0 : i32, i32
  }
}

module attributes {stable_mosaic.version = 11 : i64} {
  func.func @_gemm_kernel(%arg0: i32, %arg1: i32, %arg2: i32, %arg3: memref<1x16x512xbf16, #tpu.memory_space<vmem>>, %arg4: memref<1x512x64xbf16, #tpu.memory_space<vmem>>, %arg5: memref<16x1xf32, #tpu.memory_space<vmem>>, %arg6: memref<1x16x64xf32, #tpu.memory_space<vmem>>, %arg7: memref<16x64xf32, #tpu.memory_space<vmem>>) attributes {dimension_semantics = [#tpu.dimension_semantics<parallel>, #tpu.dimension_semantics<parallel>, #tpu.dimension_semantics<arbitrary>], iteration_bounds = array<i64: 1, 1, 1>, scalar_prefetch = 0 : i64, scratch_operands = 1 : i64, tpu.core_type = #tpu.core_type<tc>, window_params = [{transform_indices = @transform_0, window_bounds = array<i64: 1, 16, 512>}, {transform_indices = @transform_1, window_bounds = array<i64: 1, 512, 64>}, {pipeline_mode = #tpu.pipeline_mode<synchronous>, transform_indices = @transform_2, window_bounds = array<i64: 16, 1>}, {transform_indices = @transform_3, window_bounds = array<i64: 1, 16, 64>}]} {
    %c0_i32 = arith.constant 0 : i32
    %0 = arith.cmpi eq, %arg2, %c0_i32 : i32
    %1 = arith.extui %0 : i1 to i32
    %c0_i32_0 = arith.constant 0 : i32
    %2 = arith.cmpi ne, %1, %c0_i32_0 : i32
    scf.if %2 {
      %cst_12 = arith.constant 0.000000e+00 : f32
      %14 = vector.broadcast %cst_12 : f32 to vector<16x64xf32>
      %c0_13 = arith.constant 0 : index
      %c0_14 = arith.constant 0 : index
      %15 = vector.load %arg7[%c0_13, %c0_14] : memref<16x64xf32, #tpu.memory_space<vmem>>, vector<16x64xf32>
      tpu.vector_store %arg7[%c0_13, %c0_14], %14 {strides = array<i32>} : memref<16x64xf32, #tpu.memory_space<vmem>>, vector<16x64xf32>,
    } else {
    }
    %c0 = arith.constant 0 : index
    %c0_1 = arith.constant 0 : index
    %3 = vector.load %arg7[%c0, %c0_1] : memref<16x64xf32, #tpu.memory_space<vmem>>, vector<16x64xf32>
    %c0_2 = arith.constant 0 : index
    %c0_3 = arith.constant 0 : index
    %c0_4 = arith.constant 0 : index
    %4 = vector.load %arg3[%c0_2, %c0_3, %c0_4] : memref<1x16x512xbf16, #tpu.memory_space<vmem>>, vector<1x16x512xbf16>
    %5 = vector.shape_cast %4 : vector<1x16x512xbf16> to vector<16x512xbf16>
    %c0_5 = arith.constant 0 : index
    %c0_6 = arith.constant 0 : index
    %c0_7 = arith.constant 0 : index
    %6 = vector.load %arg4[%c0_5, %c0_6, %c0_7] : memref<1x512x64xbf16, #tpu.memory_space<vmem>>, vector<1x512x64xbf16>
    %7 = vector.shape_cast %6 : vector<1x512x64xbf16> to vector<512x64xbf16>
    %cst = arith.constant dense<0.000000e+00> : vector<16x64xf32>
    %8 = tpu.matmul %5, %7, %cst {dimension_numbers = #tpu.dot_dimension_numbers<[1], [0], [0], [1], [0, 0, 1, 1], [], []>} : vector<16x512xbf16>, vector<512x64xbf16>, vector<16x64xf32> -> vector<16x64xf32>
    %9 = arith.addf %3, %8 : vector<16x64xf32>
    %c0_8 = arith.constant 0 : index
    %c0_9 = arith.constant 0 : index
    %10 = vector.load %arg7[%c0_8, %c0_9] : memref<16x64xf32, #tpu.memory_space<vmem>>, vector<16x64xf32>
    tpu.vector_store %arg7[%c0_8, %c0_9], %9 {strides = array<i32>} : memref<16x64xf32, #tpu.memory_space<vmem>>, vector<16x64xf32>,
    %c0_i32_10 = arith.constant 0 : i32
    %11 = arith.cmpi eq, %arg2, %c0_i32_10 : i32
    %12 = arith.extui %11 : i1 to i32
    %c0_i32_11 = arith.constant 0 : i32
    %13 = arith.cmpi ne, %12, %c0_i32_11 : i32
    scf.if %13 {
      %c0_12 = arith.constant 0 : index
      %c0_13 = arith.constant 0 : index
      %14 = vector.load %arg7[%c0_12, %c0_13] : memref<16x64xf32, #tpu.memory_space<vmem>>, vector<16x64xf32>
      %c0_14 = arith.constant 0 : index
      %c0_15 = arith.constant 0 : index
      %15 = vector.load %arg5[%c0_14, %c0_15] : memref<16x1xf32, #tpu.memory_space<vmem>>, vector<16x1xf32>
      %16 = vector.broadcast %15 : vector<16x1xf32> to vector<16x64xf32>
      %17 = arith.addf %14, %16 : vector<16x64xf32>
      %cst_16 = arith.constant 0.000000e+00 : f32
      %18 = vector.broadcast %cst_16 : f32 to vector<16x64xf32>
      %19 = arith.cmpf oge, %17, %18 : vector<16x64xf32>
      %cst_17 = arith.constant 0.00999999977 : f32
      %20 = vector.broadcast %cst_17 : f32 to vector<16x64xf32>
      %21 = arith.mulf %20, %17 : vector<16x64xf32>
      %22 = arith.select %19, %17, %21 : vector<16x64xi1>, vector<16x64xf32>
      %c0_18 = arith.constant 0 : index
      %c0_19 = arith.constant 0 : index
      %c0_20 = arith.constant 0 : index
      %23 = vector.load %arg6[%c0_18, %c0_19, %c0_20] : memref<1x16x64xf32, #tpu.memory_space<vmem>>, vector<1x16x64xf32>
      %24 = vector.shape_cast %23 : vector<1x16x64xf32> to vector<16x64xf32>
      %25 = vector.shape_cast %22 : vector<16x64xf32> to vector<1x16x64xf32>
      tpu.vector_store %arg6[%c0_18, %c0_19, %c0_20], %25 {strides = array<i32>} : memref<1x16x64xf32, #tpu.memory_space<vmem>>, vector<1x16x64xf32>,
    } else {
    }
    return
  }
  func.func @transform_0(%arg0: i32, %arg1: i32, %arg2: i32) -> (i32, i32, i32) {
    %c0_i32 = arith.constant 0 : i32
    %c0_i32_0 = arith.constant 0 : i32
    return %arg0, %c0_i32, %arg2 : i32, i32, i32
  }
  func.func @transform_1(%arg0: i32, %arg1: i32, %arg2: i32) -> (i32, i32, i32) {
    %c0_i32 = arith.constant 0 : i32
    return %arg0, %arg2, %arg1 : i32, i32, i32
  }
  func.func @transform_2(%arg0: i32, %arg1: i32, %arg2: i32) -> (i32, i32) {
    %c0_i32 = arith.constant 0 : i32
    %c0_i32_0 = arith.constant 0 : i32
    %c0_i32_1 = arith.constant 0 : i32
    return %c0_i32, %c0_i32_0 : i32, i32
  }
  func.func @transform_3(%arg0: i32, %arg1: i32, %arg2: i32) -> (i32, i32, i32) {
    %c0_i32 = arith.constant 0 : i32
    %c0_i32_0 = arith.constant 0 : i32
    return %arg0, %c0_i32, %arg1 : i32, i32, i32
  }
}

module attributes {stable_mosaic.version = 11 : i64} {
  func.func @_gemm_kernel(%arg0: i32, %arg1: i32, %arg2: i32, %arg3: memref<1x8x128xbf16, #tpu.memory_space<vmem>>, %arg4: memref<1x128x64xbf16, #tpu.memory_space<vmem>>, %arg5: memref<8x1xf32, #tpu.memory_space<vmem>>, %arg6: memref<1x8x64xbf16, #tpu.memory_space<vmem>>, %arg7: memref<8x64xf32, #tpu.memory_space<vmem>>) attributes {dimension_semantics = [#tpu.dimension_semantics<parallel>, #tpu.dimension_semantics<parallel>, #tpu.dimension_semantics<arbitrary>], iteration_bounds = array<i64: 8, 1, 1>, scalar_prefetch = 0 : i64, scratch_operands = 1 : i64, tpu.core_type = #tpu.core_type<tc>, window_params = [{transform_indices = @transform_0, window_bounds = array<i64: 1, 8, 128>}, {transform_indices = @transform_1, window_bounds = array<i64: 1, 128, 64>}, {pipeline_mode = #tpu.pipeline_mode<synchronous>, transform_indices = @transform_2, window_bounds = array<i64: 8, 1>}, {transform_indices = @transform_3, window_bounds = array<i64: 1, 8, 64>}]} {
    %c0_i32 = arith.constant 0 : i32
    %0 = arith.cmpi eq, %arg2, %c0_i32 : i32
    %1 = arith.extui %0 : i1 to i32
    %c0_i32_0 = arith.constant 0 : i32
    %2 = arith.cmpi ne, %1, %c0_i32_0 : i32
    scf.if %2 {
      %cst_12 = arith.constant 0.000000e+00 : f32
      %14 = vector.broadcast %cst_12 : f32 to vector<8x64xf32>
      %c0_13 = arith.constant 0 : index
      %c0_14 = arith.constant 0 : index
      %15 = vector.load %arg7[%c0_13, %c0_14] : memref<8x64xf32, #tpu.memory_space<vmem>>, vector<8x64xf32>
      tpu.vector_store %arg7[%c0_13, %c0_14], %14 {strides = array<i32>} : memref<8x64xf32, #tpu.memory_space<vmem>>, vector<8x64xf32>,
    } else {
    }
    %c0 = arith.constant 0 : index
    %c0_1 = arith.constant 0 : index
    %3 = vector.load %arg7[%c0, %c0_1] : memref<8x64xf32, #tpu.memory_space<vmem>>, vector<8x64xf32>
    %c0_2 = arith.constant 0 : index
    %c0_3 = arith.constant 0 : index
    %c0_4 = arith.constant 0 : index
    %4 = vector.load %arg3[%c0_2, %c0_3, %c0_4] : memref<1x8x128xbf16, #tpu.memory_space<vmem>>, vector<1x8x128xbf16>
    %5 = vector.shape_cast %4 : vector<1x8x128xbf16> to vector<8x128xbf16>
    %c0_5 = arith.constant 0 : index
    %c0_6 = arith.constant 0 : index
    %c0_7 = arith.constant 0 : index
    %6 = vector.load %arg4[%c0_5, %c0_6, %c0_7] : memref<1x128x64xbf16, #tpu.memory_space<vmem>>, vector<1x128x64xbf16>
    %7 = vector.shape_cast %6 : vector<1x128x64xbf16> to vector<128x64xbf16>
    %cst = arith.constant dense<0.000000e+00> : vector<8x64xf32>
    %8 = tpu.matmul %5, %7, %cst {dimension_numbers = #tpu.dot_dimension_numbers<[1], [0], [0], [1], [0, 0, 1, 1], [], []>} : vector<8x128xbf16>, vector<128x64xbf16>, vector<8x64xf32> -> vector<8x64xf32>
    %9 = arith.addf %3, %8 : vector<8x64xf32>
    %c0_8 = arith.constant 0 : index
    %c0_9 = arith.constant 0 : index
    %10 = vector.load %arg7[%c0_8, %c0_9] : memref<8x64xf32, #tpu.memory_space<vmem>>, vector<8x64xf32>
    tpu.vector_store %arg7[%c0_8, %c0_9], %9 {strides = array<i32>} : memref<8x64xf32, #tpu.memory_space<vmem>>, vector<8x64xf32>,
    %c0_i32_10 = arith.constant 0 : i32
    %11 = arith.cmpi eq, %arg2, %c0_i32_10 : i32
    %12 = arith.extui %11 : i1 to i32
    %c0_i32_11 = arith.constant 0 : i32
    %13 = arith.cmpi ne, %12, %c0_i32_11 : i32
    scf.if %13 {
      %c0_12 = arith.constant 0 : index
      %c0_13 = arith.constant 0 : index
      %14 = vector.load %arg7[%c0_12, %c0_13] : memref<8x64xf32, #tpu.memory_space<vmem>>, vector<8x64xf32>
      %c0_14 = arith.constant 0 : index
      %c0_15 = arith.constant 0 : index
      %15 = vector.load %arg5[%c0_14, %c0_15] : memref<8x1xf32, #tpu.memory_space<vmem>>, vector<8x1xf32>
      %16 = vector.broadcast %15 : vector<8x1xf32> to vector<8x64xf32>
      %17 = arith.addf %14, %16 : vector<8x64xf32>
      %cst_16 = arith.constant 0.000000e+00 : f32
      %18 = vector.broadcast %cst_16 : f32 to vector<8x64xf32>
      %19 = arith.cmpf oge, %17, %18 : vector<8x64xf32>
      %cst_17 = arith.constant 0.00999999977 : f32
      %20 = vector.broadcast %cst_17 : f32 to vector<8x64xf32>
      %21 = arith.mulf %20, %17 : vector<8x64xf32>
      %22 = arith.select %19, %17, %21 : vector<8x64xi1>, vector<8x64xf32>
      %23 = arith.truncf %22 : vector<8x64xf32> to vector<8x64xbf16>
      %c0_18 = arith.constant 0 : index
      %c0_19 = arith.constant 0 : index
      %c0_20 = arith.constant 0 : index
      %24 = vector.load %arg6[%c0_18, %c0_19, %c0_20] : memref<1x8x64xbf16, #tpu.memory_space<vmem>>, vector<1x8x64xbf16>
      %25 = vector.shape_cast %24 : vector<1x8x64xbf16> to vector<8x64xbf16>
      %26 = vector.shape_cast %23 : vector<8x64xbf16> to vector<1x8x64xbf16>
      tpu.vector_store %arg6[%c0_18, %c0_19, %c0_20], %26 {strides = array<i32>} : memref<1x8x64xbf16, #tpu.memory_space<vmem>>, vector<1x8x64xbf16>,
    } else {
    }
    return
  }
  func.func @transform_0(%arg0: i32, %arg1: i32, %arg2: i32) -> (i32, i32, i32) {
    %c0_i32 = arith.constant 0 : i32
    %c0_i32_0 = arith.constant 0 : i32
    return %arg0, %c0_i32, %arg2 : i32, i32, i32
  }
  func.func @transform_1(%arg0: i32, %arg1: i32, %arg2: i32) -> (i32, i32, i32) {
    %c0_i32 = arith.constant 0 : i32
    return %arg0, %arg2, %arg1 : i32, i32, i32
  }
  func.func @transform_2(%arg0: i32, %arg1: i32, %arg2: i32) -> (i32, i32) {
    %c0_i32 = arith.constant 0 : i32
    %c0_i32_0 = arith.constant 0 : i32
    %c0_i32_1 = arith.constant 0 : i32
    return %c0_i32, %c0_i32_0 : i32, i32
  }
  func.func @transform_3(%arg0: i32, %arg1: i32, %arg2: i32) -> (i32, i32, i32) {
    %c0_i32 = arith.constant 0 : i32
    %c0_i32_0 = arith.constant 0 : i32
    return %arg0, %c0_i32, %arg1 : i32, i32, i32
  }
}

module attributes {stable_mosaic.version = 11 : i64} {
  func.func @_cat1x1_kernel(%arg0: i32, %arg1: memref<8x8xbf16, #tpu.memory_space<vmem>>, %arg2: memref<8x8xbf16, #tpu.memory_space<vmem>>, %arg3: memref<8x256xbf16, #tpu.memory_space<vmem>>, %arg4: memref<8x256xbf16, #tpu.memory_space<vmem>>, %arg5: memref<8x1xf32, #tpu.memory_space<vmem>>, %arg6: memref<8x256xbf16, #tpu.memory_space<vmem>>) attributes {dimension_semantics = [#tpu.dimension_semantics<parallel>], iteration_bounds = array<i64: 2>, scalar_prefetch = 0 : i64, scratch_operands = 0 : i64, tpu.core_type = #tpu.core_type<tc>, window_params = [{pipeline_mode = #tpu.pipeline_mode<synchronous>, transform_indices = @transform_0, window_bounds = array<i64: 8, 8>}, {pipeline_mode = #tpu.pipeline_mode<synchronous>, transform_indices = @transform_1, window_bounds = array<i64: 8, 8>}, {transform_indices = @transform_2, window_bounds = array<i64: 8, 256>}, {transform_indices = @transform_3, window_bounds = array<i64: 8, 256>}, {pipeline_mode = #tpu.pipeline_mode<synchronous>, transform_indices = @transform_4, window_bounds = array<i64: 8, 1>}, {transform_indices = @transform_5, window_bounds = array<i64: 8, 256>}]} {
    %c0 = arith.constant 0 : index
    %c0_0 = arith.constant 0 : index
    %0 = vector.load %arg1[%c0, %c0_0] : memref<8x8xbf16, #tpu.memory_space<vmem>>, vector<8x8xbf16>
    %c0_1 = arith.constant 0 : index
    %c0_2 = arith.constant 0 : index
    %1 = vector.load %arg3[%c0_1, %c0_2] : memref<8x256xbf16, #tpu.memory_space<vmem>>, vector<8x256xbf16>
    %cst = arith.constant dense<0.000000e+00> : vector<8x256xf32>
    %2 = tpu.matmul %0, %1, %cst {dimension_numbers = #tpu.dot_dimension_numbers<[1], [0], [0], [1], [0, 0, 1, 1], [], []>} : vector<8x8xbf16>, vector<8x256xbf16>, vector<8x256xf32> -> vector<8x256xf32>
    %c0_3 = arith.constant 0 : index
    %c0_4 = arith.constant 0 : index
    %3 = vector.load %arg2[%c0_3, %c0_4] : memref<8x8xbf16, #tpu.memory_space<vmem>>, vector<8x8xbf16>
    %c0_5 = arith.constant 0 : index
    %c0_6 = arith.constant 0 : index
    %4 = vector.load %arg4[%c0_5, %c0_6] : memref<8x256xbf16, #tpu.memory_space<vmem>>, vector<8x256xbf16>
    %cst_7 = arith.constant dense<0.000000e+00> : vector<8x256xf32>
    %5 = tpu.matmul %3, %4, %cst_7 {dimension_numbers = #tpu.dot_dimension_numbers<[1], [0], [0], [1], [0, 0, 1, 1], [], []>} : vector<8x8xbf16>, vector<8x256xbf16>, vector<8x256xf32> -> vector<8x256xf32>
    %6 = arith.addf %2, %5 : vector<8x256xf32>
    %c0_8 = arith.constant 0 : index
    %c0_9 = arith.constant 0 : index
    %7 = vector.load %arg5[%c0_8, %c0_9] : memref<8x1xf32, #tpu.memory_space<vmem>>, vector<8x1xf32>
    %8 = vector.broadcast %7 : vector<8x1xf32> to vector<8x256xf32>
    %9 = arith.addf %6, %8 : vector<8x256xf32>
    %cst_10 = arith.constant 0.000000e+00 : f32
    %10 = vector.broadcast %cst_10 : f32 to vector<8x256xf32>
    %11 = arith.cmpf oge, %9, %10 : vector<8x256xf32>
    %cst_11 = arith.constant 0.00999999977 : f32
    %12 = vector.broadcast %cst_11 : f32 to vector<8x256xf32>
    %13 = arith.mulf %12, %9 : vector<8x256xf32>
    %14 = arith.select %11, %9, %13 : vector<8x256xi1>, vector<8x256xf32>
    %15 = arith.truncf %14 : vector<8x256xf32> to vector<8x256xbf16>
    %c0_12 = arith.constant 0 : index
    %c0_13 = arith.constant 0 : index
    %16 = vector.load %arg6[%c0_12, %c0_13] : memref<8x256xbf16, #tpu.memory_space<vmem>>, vector<8x256xbf16>
    tpu.vector_store %arg6[%c0_12, %c0_13], %15 {strides = array<i32>} : memref<8x256xbf16, #tpu.memory_space<vmem>>, vector<8x256xbf16>,
    return
  }
  func.func @transform_0(%arg0: i32) -> (i32, i32) {
    %c0_i32 = arith.constant 0 : i32
    %c0_i32_0 = arith.constant 0 : i32
    %c0_i32_1 = arith.constant 0 : i32
    return %c0_i32, %c0_i32_0 : i32, i32
  }
  func.func @transform_1(%arg0: i32) -> (i32, i32) {
    %c0_i32 = arith.constant 0 : i32
    %c0_i32_0 = arith.constant 0 : i32
    %c0_i32_1 = arith.constant 0 : i32
    return %c0_i32, %c0_i32_0 : i32, i32
  }
  func.func @transform_2(%arg0: i32) -> (i32, i32) {
    %c0_i32 = arith.constant 0 : i32
    %c0_i32_0 = arith.constant 0 : i32
    return %c0_i32, %arg0 : i32, i32
  }
  func.func @transform_3(%arg0: i32) -> (i32, i32) {
    %c0_i32 = arith.constant 0 : i32
    %c0_i32_0 = arith.constant 0 : i32
    return %c0_i32, %arg0 : i32, i32
  }
  func.func @transform_4(%arg0: i32) -> (i32, i32) {
    %c0_i32 = arith.constant 0 : i32
    %c0_i32_0 = arith.constant 0 : i32
    %c0_i32_1 = arith.constant 0 : i32
    return %c0_i32, %c0_i32_0 : i32, i32
  }
  func.func @transform_5(%arg0: i32) -> (i32, i32) {
    %c0_i32 = arith.constant 0 : i32
    %c0_i32_0 = arith.constant 0 : i32
    return %c0_i32, %arg0 : i32, i32
  }
}

module attributes {stable_mosaic.version = 11 : i64} {
  func.func @_gemm_kernel(%arg0: i32, %arg1: i32, %arg2: i32, %arg3: memref<1x8x256xbf16, #tpu.memory_space<vmem>>, %arg4: memref<1x256x256xbf16, #tpu.memory_space<vmem>>, %arg5: memref<8x1xf32, #tpu.memory_space<vmem>>, %arg6: memref<1x8x256xf32, #tpu.memory_space<vmem>>, %arg7: memref<8x256xf32, #tpu.memory_space<vmem>>) attributes {dimension_semantics = [#tpu.dimension_semantics<parallel>, #tpu.dimension_semantics<parallel>, #tpu.dimension_semantics<arbitrary>], iteration_bounds = array<i64: 1, 2, 1>, scalar_prefetch = 0 : i64, scratch_operands = 1 : i64, tpu.core_type = #tpu.core_type<tc>, window_params = [{transform_indices = @transform_0, window_bounds = array<i64: 1, 8, 256>}, {transform_indices = @transform_1, window_bounds = array<i64: 1, 256, 256>}, {pipeline_mode = #tpu.pipeline_mode<synchronous>, transform_indices = @transform_2, window_bounds = array<i64: 8, 1>}, {transform_indices = @transform_3, window_bounds = array<i64: 1, 8, 256>}]} {
    %c0_i32 = arith.constant 0 : i32
    %0 = arith.cmpi eq, %arg2, %c0_i32 : i32
    %1 = arith.extui %0 : i1 to i32
    %c0_i32_0 = arith.constant 0 : i32
    %2 = arith.cmpi ne, %1, %c0_i32_0 : i32
    scf.if %2 {
      %cst_12 = arith.constant 0.000000e+00 : f32
      %14 = vector.broadcast %cst_12 : f32 to vector<8x256xf32>
      %c0_13 = arith.constant 0 : index
      %c0_14 = arith.constant 0 : index
      %15 = vector.load %arg7[%c0_13, %c0_14] : memref<8x256xf32, #tpu.memory_space<vmem>>, vector<8x256xf32>
      tpu.vector_store %arg7[%c0_13, %c0_14], %14 {strides = array<i32>} : memref<8x256xf32, #tpu.memory_space<vmem>>, vector<8x256xf32>,
    } else {
    }
    %c0 = arith.constant 0 : index
    %c0_1 = arith.constant 0 : index
    %3 = vector.load %arg7[%c0, %c0_1] : memref<8x256xf32, #tpu.memory_space<vmem>>, vector<8x256xf32>
    %c0_2 = arith.constant 0 : index
    %c0_3 = arith.constant 0 : index
    %c0_4 = arith.constant 0 : index
    %4 = vector.load %arg3[%c0_2, %c0_3, %c0_4] : memref<1x8x256xbf16, #tpu.memory_space<vmem>>, vector<1x8x256xbf16>
    %5 = vector.shape_cast %4 : vector<1x8x256xbf16> to vector<8x256xbf16>
    %c0_5 = arith.constant 0 : index
    %c0_6 = arith.constant 0 : index
    %c0_7 = arith.constant 0 : index
    %6 = vector.load %arg4[%c0_5, %c0_6, %c0_7] : memref<1x256x256xbf16, #tpu.memory_space<vmem>>, vector<1x256x256xbf16>
    %7 = vector.shape_cast %6 : vector<1x256x256xbf16> to vector<256x256xbf16>
    %cst = arith.constant dense<0.000000e+00> : vector<8x256xf32>
    %8 = tpu.matmul %5, %7, %cst {dimension_numbers = #tpu.dot_dimension_numbers<[1], [0], [0], [1], [0, 0, 1, 1], [], []>} : vector<8x256xbf16>, vector<256x256xbf16>, vector<8x256xf32> -> vector<8x256xf32>
    %9 = arith.addf %3, %8 : vector<8x256xf32>
    %c0_8 = arith.constant 0 : index
    %c0_9 = arith.constant 0 : index
    %10 = vector.load %arg7[%c0_8, %c0_9] : memref<8x256xf32, #tpu.memory_space<vmem>>, vector<8x256xf32>
    tpu.vector_store %arg7[%c0_8, %c0_9], %9 {strides = array<i32>} : memref<8x256xf32, #tpu.memory_space<vmem>>, vector<8x256xf32>,
    %c0_i32_10 = arith.constant 0 : i32
    %11 = arith.cmpi eq, %arg2, %c0_i32_10 : i32
    %12 = arith.extui %11 : i1 to i32
    %c0_i32_11 = arith.constant 0 : i32
    %13 = arith.cmpi ne, %12, %c0_i32_11 : i32
    scf.if %13 {
      %c0_12 = arith.constant 0 : index
      %c0_13 = arith.constant 0 : index
      %14 = vector.load %arg7[%c0_12, %c0_13] : memref<8x256xf32, #tpu.memory_space<vmem>>, vector<8x256xf32>
      %c0_14 = arith.constant 0 : index
      %c0_15 = arith.constant 0 : index
      %15 = vector.load %arg5[%c0_14, %c0_15] : memref<8x1xf32, #tpu.memory_space<vmem>>, vector<8x1xf32>
      %16 = vector.broadcast %15 : vector<8x1xf32> to vector<8x256xf32>
      %17 = arith.addf %14, %16 : vector<8x256xf32>
      %cst_16 = arith.constant 0.000000e+00 : f32
      %18 = vector.broadcast %cst_16 : f32 to vector<8x256xf32>
      %19 = arith.cmpf oge, %17, %18 : vector<8x256xf32>
      %cst_17 = arith.constant 0.00999999977 : f32
      %20 = vector.broadcast %cst_17 : f32 to vector<8x256xf32>
      %21 = arith.mulf %20, %17 : vector<8x256xf32>
      %22 = arith.select %19, %17, %21 : vector<8x256xi1>, vector<8x256xf32>
      %c0_18 = arith.constant 0 : index
      %c0_19 = arith.constant 0 : index
      %c0_20 = arith.constant 0 : index
      %23 = vector.load %arg6[%c0_18, %c0_19, %c0_20] : memref<1x8x256xf32, #tpu.memory_space<vmem>>, vector<1x8x256xf32>
      %24 = vector.shape_cast %23 : vector<1x8x256xf32> to vector<8x256xf32>
      %25 = vector.shape_cast %22 : vector<8x256xf32> to vector<1x8x256xf32>
      tpu.vector_store %arg6[%c0_18, %c0_19, %c0_20], %25 {strides = array<i32>} : memref<1x8x256xf32, #tpu.memory_space<vmem>>, vector<1x8x256xf32>,
    } else {
    }
    return
  }
  func.func @transform_0(%arg0: i32, %arg1: i32, %arg2: i32) -> (i32, i32, i32) {
    %c0_i32 = arith.constant 0 : i32
    %c0_i32_0 = arith.constant 0 : i32
    return %arg0, %c0_i32, %arg2 : i32, i32, i32
  }
  func.func @transform_1(%arg0: i32, %arg1: i32, %arg2: i32) -> (i32, i32, i32) {
    %c0_i32 = arith.constant 0 : i32
    return %arg0, %arg2, %arg1 : i32, i32, i32
  }
  func.func @transform_2(%arg0: i32, %arg1: i32, %arg2: i32) -> (i32, i32) {
    %c0_i32 = arith.constant 0 : i32
    %c0_i32_0 = arith.constant 0 : i32
    %c0_i32_1 = arith.constant 0 : i32
    return %c0_i32, %c0_i32_0 : i32, i32
  }
  func.func @transform_3(%arg0: i32, %arg1: i32, %arg2: i32) -> (i32, i32, i32) {
    %c0_i32 = arith.constant 0 : i32
    %c0_i32_0 = arith.constant 0 : i32
    return %arg0, %c0_i32, %arg1 : i32, i32, i32
  }
}

module attributes {stable_mosaic.version = 11 : i64} {
  func.func @_gemm_kernel(%arg0: i32, %arg1: i32, %arg2: i32, %arg3: memref<1x8x128xbf16, #tpu.memory_space<vmem>>, %arg4: memref<1x128x256xbf16, #tpu.memory_space<vmem>>, %arg5: memref<8x1xf32, #tpu.memory_space<vmem>>, %arg6: memref<1x8x256xf32, #tpu.memory_space<vmem>>, %arg7: memref<8x256xf32, #tpu.memory_space<vmem>>) attributes {dimension_semantics = [#tpu.dimension_semantics<parallel>, #tpu.dimension_semantics<parallel>, #tpu.dimension_semantics<arbitrary>], iteration_bounds = array<i64: 8, 2, 1>, scalar_prefetch = 0 : i64, scratch_operands = 1 : i64, tpu.core_type = #tpu.core_type<tc>, window_params = [{transform_indices = @transform_0, window_bounds = array<i64: 1, 8, 128>}, {transform_indices = @transform_1, window_bounds = array<i64: 1, 128, 256>}, {pipeline_mode = #tpu.pipeline_mode<synchronous>, transform_indices = @transform_2, window_bounds = array<i64: 8, 1>}, {transform_indices = @transform_3, window_bounds = array<i64: 1, 8, 256>}]} {
    %c0_i32 = arith.constant 0 : i32
    %0 = arith.cmpi eq, %arg2, %c0_i32 : i32
    %1 = arith.extui %0 : i1 to i32
    %c0_i32_0 = arith.constant 0 : i32
    %2 = arith.cmpi ne, %1, %c0_i32_0 : i32
    scf.if %2 {
      %cst_12 = arith.constant 0.000000e+00 : f32
      %14 = vector.broadcast %cst_12 : f32 to vector<8x256xf32>
      %c0_13 = arith.constant 0 : index
      %c0_14 = arith.constant 0 : index
      %15 = vector.load %arg7[%c0_13, %c0_14] : memref<8x256xf32, #tpu.memory_space<vmem>>, vector<8x256xf32>
      tpu.vector_store %arg7[%c0_13, %c0_14], %14 {strides = array<i32>} : memref<8x256xf32, #tpu.memory_space<vmem>>, vector<8x256xf32>,
    } else {
    }
    %c0 = arith.constant 0 : index
    %c0_1 = arith.constant 0 : index
    %3 = vector.load %arg7[%c0, %c0_1] : memref<8x256xf32, #tpu.memory_space<vmem>>, vector<8x256xf32>
    %c0_2 = arith.constant 0 : index
    %c0_3 = arith.constant 0 : index
    %c0_4 = arith.constant 0 : index
    %4 = vector.load %arg3[%c0_2, %c0_3, %c0_4] : memref<1x8x128xbf16, #tpu.memory_space<vmem>>, vector<1x8x128xbf16>
    %5 = vector.shape_cast %4 : vector<1x8x128xbf16> to vector<8x128xbf16>
    %c0_5 = arith.constant 0 : index
    %c0_6 = arith.constant 0 : index
    %c0_7 = arith.constant 0 : index
    %6 = vector.load %arg4[%c0_5, %c0_6, %c0_7] : memref<1x128x256xbf16, #tpu.memory_space<vmem>>, vector<1x128x256xbf16>
    %7 = vector.shape_cast %6 : vector<1x128x256xbf16> to vector<128x256xbf16>
    %cst = arith.constant dense<0.000000e+00> : vector<8x256xf32>
    %8 = tpu.matmul %5, %7, %cst {dimension_numbers = #tpu.dot_dimension_numbers<[1], [0], [0], [1], [0, 0, 1, 1], [], []>} : vector<8x128xbf16>, vector<128x256xbf16>, vector<8x256xf32> -> vector<8x256xf32>
    %9 = arith.addf %3, %8 : vector<8x256xf32>
    %c0_8 = arith.constant 0 : index
    %c0_9 = arith.constant 0 : index
    %10 = vector.load %arg7[%c0_8, %c0_9] : memref<8x256xf32, #tpu.memory_space<vmem>>, vector<8x256xf32>
    tpu.vector_store %arg7[%c0_8, %c0_9], %9 {strides = array<i32>} : memref<8x256xf32, #tpu.memory_space<vmem>>, vector<8x256xf32>,
    %c0_i32_10 = arith.constant 0 : i32
    %11 = arith.cmpi eq, %arg2, %c0_i32_10 : i32
    %12 = arith.extui %11 : i1 to i32
    %c0_i32_11 = arith.constant 0 : i32
    %13 = arith.cmpi ne, %12, %c0_i32_11 : i32
    scf.if %13 {
      %c0_12 = arith.constant 0 : index
      %c0_13 = arith.constant 0 : index
      %14 = vector.load %arg7[%c0_12, %c0_13] : memref<8x256xf32, #tpu.memory_space<vmem>>, vector<8x256xf32>
      %c0_14 = arith.constant 0 : index
      %c0_15 = arith.constant 0 : index
      %15 = vector.load %arg5[%c0_14, %c0_15] : memref<8x1xf32, #tpu.memory_space<vmem>>, vector<8x1xf32>
      %16 = vector.broadcast %15 : vector<8x1xf32> to vector<8x256xf32>
      %17 = arith.addf %14, %16 : vector<8x256xf32>
      %c0_16 = arith.constant 0 : index
      %c0_17 = arith.constant 0 : index
      %c0_18 = arith.constant 0 : index
      %18 = vector.load %arg6[%c0_16, %c0_17, %c0_18] : memref<1x8x256xf32, #tpu.memory_space<vmem>>, vector<1x8x256xf32>
      %19 = vector.shape_cast %18 : vector<1x8x256xf32> to vector<8x256xf32>
      %20 = vector.shape_cast %17 : vector<8x256xf32> to vector<1x8x256xf32>
      tpu.vector_store %arg6[%c0_16, %c0_17, %c0_18], %20 {strides = array<i32>} : memref<1x8x256xf32, #tpu.memory_space<vmem>>, vector<1x8x256xf32>,
    } else {
    }
    return
  }
  func.func @transform_0(%arg0: i32, %arg1: i32, %arg2: i32) -> (i32, i32, i32) {
    %c0_i32 = arith.constant 0 : i32
    %c0_i32_0 = arith.constant 0 : i32
    return %arg0, %c0_i32, %arg2 : i32, i32, i32
  }
  func.func @transform_1(%arg0: i32, %arg1: i32, %arg2: i32) -> (i32, i32, i32) {
    %c0_i32 = arith.constant 0 : i32
    return %arg0, %arg2, %arg1 : i32, i32, i32
  }
  func.func @transform_2(%arg0: i32, %arg1: i32, %arg2: i32) -> (i32, i32) {
    %c0_i32 = arith.constant 0 : i32
    %c0_i32_0 = arith.constant 0 : i32
    %c0_i32_1 = arith.constant 0 : i32
    return %c0_i32, %c0_i32_0 : i32, i32
  }
  func.func @transform_3(%arg0: i32, %arg1: i32, %arg2: i32) -> (i32, i32, i32) {
    %c0_i32 = arith.constant 0 : i32
    %c0_i32_0 = arith.constant 0 : i32
    return %arg0, %c0_i32, %arg1 : i32, i32, i32
  }
}

</mosaic_0001>

<bundles_post_ra>
// kernel: squeeze.12
= control target key start
LH: loop header
LB: loop body
LE: loop exit
PB: predicated region body
PF: predicated region fallthrough
CT: control target
= control target key end

     0   :  { %vm67_vm0 = vcmask 64512   ;;  %s1914_s10 = smov 120   ;;  %s1915_s11 = smov 104   ;;  %s2312_s0 = inlined_call_operand.vmem [shape: bf16[1,8,512], index: 0, kind: input, shape index: {}]   ;;  %s2313_s1 = inlined_call_operand.vmem [shape: bf16[8,2,4,8,8], index: 1, kind: output, shape index: {}]  }
   0x1   :  { %v1553_v0 = vld [vmem:[%s2312_s0] sm:$0xff]   ;;  %v1716_v1 = vld [vmem:[%s2312_s0 + $0x8] sm:$0xff]   ;;  %s1913_s0 = smov 112   ;;  %s1916_s12 = smov 96  }
   0x2   :  { %v1554_v2 = vunpack.c.l.bf16 %v1553_v0  ;;  %v1555_v3 = vunpack.c.h.bf16 %v1553_v0  ;;  %v1550_v4 = vunpack.c.l.bf16 %v1716_v1  ;;  %v1551_v5 = vunpack.c.h.bf16 %v1716_v1  ;;  %s1917_s13 = smov 88   ;;  %s1918_s14 = smov 80  }
   0x3   :  { %s1919_s15 = smov 72   ;;  %s1920_s16 = smov 64  }
   0x4   :  { %52 = vst [vmem:[#allocation1 + $0x8] sm:$0xff] %v1555_v3  ;;  %65 = vst [vmem:[#allocation1] sm:$0xff] %v1554_v2  ;;  %s1921_s17 = smov 56   ;;  %s1922_s18 = smov 48  }
   0x5   :  { %21 = vst [vmem:[#allocation1 + $0x18] sm:$0xff] %v1551_v5  ;;  %37 = vst [vmem:[#allocation1 + $0x10] sm:$0xff] %v1550_v4  ;;  %s1923_s19 = smov 40   ;;  %s1924_s20 = smov 32  }
   0x6   :  { %89 = vst.msk [vmem:[#allocation0 + $0x4f] sm:$0x2] %vm67_vm0, %v1555_v3   ;;  %95 = vst.msk [vmem:[#allocation0 + $0x10c] sm:$0x10] %vm67_vm0, %v1555_v3   ;;  %s1925_s21 = smov 24   ;;  %s1926_s22 = smov 16  }
   0x7   :  { %97 = vst.msk [vmem:[#allocation0 + $0x14b] sm:$0x20] %vm67_vm0, %v1555_v3   ;;  %99 = vst.msk [vmem:[#allocation0 + $0x18a] sm:$0x40] %vm67_vm0, %v1555_v3   ;;  %s1927_s23 = smov 8  }
   0x8   :  { %101 = vst.msk [vmem:[#allocation0 + $0x1c9] sm:$0x80] %vm67_vm0, %v1555_v3   ;;  %70 = vst.msk [vmem:[#allocation0 + $0x3f] sm:$0x2] %vm67_vm0, %v1554_v2  }
   0x9   :  { %76 = vst.msk [vmem:[#allocation0 + $0xfc] sm:$0x10] %vm67_vm0, %v1554_v2   ;;  %78 = vst.msk [vmem:[#allocation0 + $0x13b] sm:$0x20] %vm67_vm0, %v1554_v2  }
   0xa   :  { %80 = vst.msk [vmem:[#allocation0 + $0x17a] sm:$0x40] %vm67_vm0, %v1554_v2   ;;  %82 = vst.msk [vmem:[#allocation0 + $0x1b9] sm:$0x80] %vm67_vm0, %v1554_v2  }
   0xb   :  { %68 = vst.msk [vmem:[#allocation0] sm:$0x1] %vm67_vm0, %v1554_v2   ;;  %72 = vst.msk [vmem:[#allocation0 + $0x7e] sm:$0x4] %vm67_vm0, %v1554_v2  }
   0xc   :  { %74 = vst.msk [vmem:[#allocation0 + $0xbd] sm:$0x8] %vm67_vm0, %v1554_v2   ;;  %87 = vst.msk [vmem:[#allocation0 + $0x10] sm:$0x1] %vm67_vm0, %v1555_v3  }
   0xd   :  { %91 = vst.msk [vmem:[#allocation0 + $0x8e] sm:$0x4] %vm67_vm0, %v1555_v3   ;;  %93 = vst.msk [vmem:[#allocation0 + $0xcd] sm:$0x8] %vm67_vm0, %v1555_v3  }
   0xe   :  { %137 = vst.msk [vmem:[#allocation0 + $0x1aa] sm:$0x40] %vm67_vm0, %v1551_v5   ;;  %118 = vst.msk [vmem:[#allocation0 + $0x19a] sm:$0x40] %vm67_vm0, %v1550_v4  }
   0xf   :  { %106 = vst.msk [vmem:[#allocation0 + $0x20] sm:$0x1] %vm67_vm0, %v1550_v4   ;;  %108 = vst.msk [vmem:[#allocation0 + $0x5f] sm:$0x2] %vm67_vm0, %v1550_v4  }
  0x10   :  { %110 = vst.msk [vmem:[#allocation0 + $0x9e] sm:$0x4] %vm67_vm0, %v1550_v4   ;;  %112 = vst.msk [vmem:[#allocation0 + $0xdd] sm:$0x8] %vm67_vm0, %v1550_v4  }
  0x11   :  { %114 = vst.msk [vmem:[#allocation0 + $0x11c] sm:$0x10] %vm67_vm0, %v1550_v4   ;;  %116 = vst.msk [vmem:[#allocation0 + $0x15b] sm:$0x20] %vm67_vm0, %v1550_v4  }
  0x12   :  { %120 = vst.msk [vmem:[#allocation0 + $0x1d9] sm:$0x80] %vm67_vm0, %v1550_v4   ;;  %125 = vst.msk [vmem:[#allocation0 + $0x30] sm:$0x1] %vm67_vm0, %v1551_v5  }
  0x13   :  { %127 = vst.msk [vmem:[#allocation0 + $0x6f] sm:$0x2] %vm67_vm0, %v1551_v5   ;;  %129 = vst.msk [vmem:[#allocation0 + $0xae] sm:$0x4] %vm67_vm0, %v1551_v5  }
  0x14   :  { %131 = vst.msk [vmem:[#allocation0 + $0xed] sm:$0x8] %vm67_vm0, %v1551_v5   ;;  %133 = vst.msk [vmem:[#allocation0 + $0x12c] sm:$0x10] %vm67_vm0, %v1551_v5  }
  0x15   :  { %135 = vst.msk [vmem:[#allocation0 + $0x16b] sm:$0x20] %vm67_vm0, %v1551_v5   ;;  %139 = vst.msk [vmem:[#allocation0 + $0x1e9] sm:$0x80] %vm67_vm0, %v1551_v5  }
  0x16   :  { %v191_v6 = vld.sshfl [vmem:[#allocation1] sm:$0xff pattern:$0xb3a29180]   ;;  %v204_v7 = vld.sshfl [vmem:[#allocation1 + $0x4] sm:$0xff pattern:$0xb3a29180]  }
  0x17   :  { %v1773_v8 = vpack.i.bf16 %v204_v7, %v191_v6  ;;  %v217_v9 = vld.sshfl [vmem:[#allocation1 + $0x10] sm:$0xff pattern:$0xb3a29180]   ;;  %v230_v10 = vld.sshfl [vmem:[#allocation1 + $0x14] sm:$0xff pattern:$0xb3a29180]  }
  0x18   :  { %v1778_v11 = vpack.i.bf16 %v230_v10, %v217_v9 }
  0x19   :  { %1774 = vrot.lane.b32.xlu1 %v1773_v8, %s1913_s0  ;;  %1764 = vrot.lane.b32.xlu0 %v1773_v8, %s1914_s10 }
  0x1d   :  { %1779 = vrot.lane.b32.xlu1 %v1778_v11, %s1913_s0  ;;  %1769 = vrot.lane.b32.xlu0 %v1778_v11, %s1914_s10 }
  0x21   :  { %1789 = vrot.lane.b32.xlu1 %v1778_v11, %s1915_s11  ;;  %1784 = vrot.lane.b32.xlu0 %v1773_v8, %s1915_s11 }
  0x25   :  { %1799 = vrot.lane.b32.xlu1 %v1778_v11, %s1916_s12  ;;  %1794 = vrot.lane.b32.xlu0 %v1773_v8, %s1916_s12 }
  0x29   :  { %1809 = vrot.lane.b32.xlu1 %v1778_v11, %s1917_s13  ;;  %1804 = vrot.lane.b32.xlu0 %v1773_v8, %s1917_s13 }
  0x2d   :  { %1819 = vrot.lane.b32.xlu1 %v1778_v11, %s1918_s14  ;;  %1814 = vrot.lane.b32.xlu0 %v1773_v8, %s1918_s14 }
  0x31   :  { %1829 = vrot.lane.b32.xlu1 %v1778_v11, %s1919_s15  ;;  %1824 = vrot.lane.b32.xlu0 %v1773_v8, %s1919_s15 }
  0x35   :  { %1839 = vrot.lane.b32.xlu1 %v1778_v11, %s1920_s16  ;;  %1834 = vrot.lane.b32.xlu0 %v1773_v8, %s1920_s16 }
  0x39   :  { %1849 = vrot.lane.b32.xlu1 %v1778_v11, %s1921_s17  ;;  %1844 = vrot.lane.b32.xlu0 %v1773_v8, %s1921_s17 }
  0x3d   :  { %1859 = vrot.lane.b32.xlu1 %v1778_v11, %s1922_s18  ;;  %1854 = vrot.lane.b32.xlu0 %v1773_v8, %s1922_s18 }
  0x41   :  { %1869 = vrot.lane.b32.xlu1 %v1778_v11, %s1923_s19  ;;  %1864 = vrot.lane.b32.xlu0 %v1773_v8, %s1923_s19 }
  0x45   :  { %1879 = vrot.lane.b32.xlu1 %v1778_v11, %s1924_s20  ;;  %1874 = vrot.lane.b32.xlu0 %v1773_v8, %s1924_s20 }
  0x49   :  { %1889 = vrot.lane.b32.xlu1 %v1778_v11, %s1925_s21  ;;  %1884 = vrot.lane.b32.xlu0 %v1773_v8, %s1925_s21 }
  0x4d   :  { %1899 = vrot.lane.b32.xlu1 %v1778_v11, %s1926_s22  ;;  %1894 = vrot.lane.b32.xlu0 %v1773_v8, %s1926_s22 }
  0x51   :  { %1909 = vrot.lane.b32.xlu1 %v1778_v11, %s1927_s23  ;;  %1904 = vrot.lane.b32.xlu0 %v1773_v8, %s1927_s23 }
  0x8b   :  { %v1775_v12 = vpop.permute.xlu1 %1774  ;;  %v1765_v13 = vpop.permute.xlu0 %1764 }
  0x8c   :  { %v1777_v14 = vunpack.i.h.bf16 %v1775_v12  ;;  %v1776_v15 = vunpack.i.l.bf16 %v1775_v12  ;;  %v1767_v16 = vunpack.i.h.bf16 %v1765_v13  ;;  %v1766_v17 = vunpack.i.l.bf16 %v1765_v13 }
  0x8e   :  { %209 = vst.msk [vmem:[#allocation0 + $0x102] ss:$16 sm:$0x3] %vm67_vm0, %v1777_v14   ;;  %211 = vst.msk [vmem:[#allocation0 + $0x122] ss:$16 sm:$0xc] %vm67_vm0, %v1777_v14  }
  0x8f   :  { %213 = vst.msk [vmem:[#allocation0 + $0x142] ss:$16 sm:$0x30] %vm67_vm0, %v1777_v14   ;;  %215 = vst.msk [vmem:[#allocation0 + $0x162] ss:$16 sm:$0xc0] %vm67_vm0, %v1777_v14   ;;  %v1780_v18 = vpop.permute.xlu1 %1779  ;;  %v1770_v19 = vpop.permute.xlu0 %1769 }
  0x90   :  { %196 = vst.msk [vmem:[#allocation0 + $0x2] ss:$16 sm:$0x3] %vm67_vm0, %v1776_v15   ;;  %198 = vst.msk [vmem:[#allocation0 + $0x22] ss:$16 sm:$0xc] %vm67_vm0, %v1776_v15   ;;  %v1782_v20 = vunpack.i.h.bf16 %v1780_v18  ;;  %v1781_v21 = vunpack.i.l.bf16 %v1780_v18  ;;  %v1772_v22 = vunpack.i.h.bf16 %v1770_v19  ;;  %v1771_v23 = vunpack.i.l.bf16 %v1770_v19 }
  0x91   :  { %200 = vst.msk [vmem:[#allocation0 + $0x42] ss:$16 sm:$0x30] %vm67_vm0, %v1776_v15   ;;  %202 = vst.msk [vmem:[#allocation0 + $0x62] ss:$16 sm:$0xc0] %vm67_vm0, %v1776_v15  }
  0x92   :  { %158 = vst.msk [vmem:[#allocation0 + $0x101] ss:$16 sm:$0x3] %vm67_vm0, %v1767_v16   ;;  %160 = vst.msk [vmem:[#allocation0 + $0x121] ss:$16 sm:$0xc] %vm67_vm0, %v1767_v16  }
  0x93   :  { %162 = vst.msk [vmem:[#allocation0 + $0x141] ss:$16 sm:$0x30] %vm67_vm0, %v1767_v16   ;;  %164 = vst.msk [vmem:[#allocation0 + $0x161] ss:$16 sm:$0xc0] %vm67_vm0, %v1767_v16   ;;  %v1790_v24 = vpop.permute.xlu1 %1789  ;;  %v1785_v25 = vpop.permute.xlu0 %1784 }
  0x94   :  { %145 = vst.msk [vmem:[#allocation0 + $0x1] ss:$16 sm:$0x3] %vm67_vm0, %v1766_v17   ;;  %147 = vst.msk [vmem:[#allocation0 + $0x21] ss:$16 sm:$0xc] %vm67_vm0, %v1766_v17   ;;  %v1792_v26 = vunpack.i.h.bf16 %v1790_v24  ;;  %v1791_v27 = vunpack.i.l.bf16 %v1790_v24  ;;  %v1787_v28 = vunpack.i.h.bf16 %v1785_v25  ;;  %v1786_v29 = vunpack.i.l.bf16 %v1785_v25 }
  0x95   :  { %149 = vst.msk [vmem:[#allocation0 + $0x41] ss:$16 sm:$0x30] %vm67_vm0, %v1766_v17   ;;  %151 = vst.msk [vmem:[#allocation0 + $0x61] ss:$16 sm:$0xc0] %vm67_vm0, %v1766_v17  }
  0x96   :  { %235 = vst.msk [vmem:[#allocation0 + $0x122] ss:$16 sm:$0x3] %vm67_vm0, %v1782_v20   ;;  %237 = vst.msk [vmem:[#allocation0 + $0x142] ss:$16 sm:$0xc] %vm67_vm0, %v1782_v20  }
  0x97   :  { %239 = vst.msk [vmem:[#allocation0 + $0x162] ss:$16 sm:$0x30] %vm67_vm0, %v1782_v20   ;;  %241 = vst.msk [vmem:[#allocation0 + $0x182] ss:$16 sm:$0xc0] %vm67_vm0, %v1782_v20   ;;  %v1800_v30 = vpop.permute.xlu1 %1799  ;;  %v1795_v31 = vpop.permute.xlu0 %1794 }
  0x98   :  { %222 = vst.msk [vmem:[#allocation0 + $0x22] ss:$16 sm:$0x3] %vm67_vm0, %v1781_v21   ;;  %224 = vst.msk [vmem:[#allocation0 + $0x42] ss:$16 sm:$0xc] %vm67_vm0, %v1781_v21   ;;  %v1802_v32 = vunpack.i.h.bf16 %v1800_v30  ;;  %v1801_v33 = vunpack.i.l.bf16 %v1800_v30  ;;  %v1797_v34 = vunpack.i.h.bf16 %v1795_v31  ;;  %v1796_v35 = vunpack.i.l.bf16 %v1795_v31 }
  0x99   :  { %226 = vst.msk [vmem:[#allocation0 + $0x62] ss:$16 sm:$0x30] %vm67_vm0, %v1781_v21   ;;  %228 = vst.msk [vmem:[#allocation0 + $0x82] ss:$16 sm:$0xc0] %vm67_vm0, %v1781_v21  }
  0x9a   :  { %184 = vst.msk [vmem:[#allocation0 + $0x121] ss:$16 sm:$0x3] %vm67_vm0, %v1772_v22   ;;  %186 = vst.msk [vmem:[#allocation0 + $0x141] ss:$16 sm:$0xc] %vm67_vm0, %v1772_v22  }
  0x9b   :  { %188 = vst.msk [vmem:[#allocation0 + $0x161] ss:$16 sm:$0x30] %vm67_vm0, %v1772_v22   ;;  %190 = vst.msk [vmem:[#allocation0 + $0x181] ss:$16 sm:$0xc0] %vm67_vm0, %v1772_v22   ;;  %v1810_v36 = vpop.permute.xlu1 %1809  ;;  %v1805_v37 = vpop.permute.xlu0 %1804 }
  0x9c   :  { %171 = vst.msk [vmem:[#allocation0 + $0x21] ss:$16 sm:$0x3] %vm67_vm0, %v1771_v23   ;;  %173 = vst.msk [vmem:[#allocation0 + $0x41] ss:$16 sm:$0xc] %vm67_vm0, %v1771_v23   ;;  %v1812_v38 = vunpack.i.h.bf16 %v1810_v36  ;;  %v1811_v39 = vunpack.i.l.bf16 %v1810_v36  ;;  %v1807_v40 = vunpack.i.h.bf16 %v1805_v37  ;;  %v1806_v41 = vunpack.i.l.bf16 %v1805_v37 }
  0x9d   :  { %175 = vst.msk [vmem:[#allocation0 + $0x61] ss:$16 sm:$0x30] %vm67_vm0, %v1771_v23   ;;  %177 = vst.msk [vmem:[#allocation0 + $0x81] ss:$16 sm:$0xc0] %vm67_vm0, %v1771_v23  }
  0x9e   :  { %286 = vst.msk [vmem:[#allocation0 + $0x123] ss:$16 sm:$0x3] %vm67_vm0, %v1792_v26   ;;  %288 = vst.msk [vmem:[#allocation0 + $0x143] ss:$16 sm:$0xc] %vm67_vm0, %v1792_v26  }
  0x9f   :  { %290 = vst.msk [vmem:[#allocation0 + $0x163] ss:$16 sm:$0x30] %vm67_vm0, %v1792_v26   ;;  %292 = vst.msk [vmem:[#allocation0 + $0x183] ss:$16 sm:$0xc0] %vm67_vm0, %v1792_v26   ;;  %v1820_v42 = vpop.permute.xlu1 %1819  ;;  %v1815_v43 = vpop.permute.xlu0 %1814 }
  0xa0   :  { %273 = vst.msk [vmem:[#allocation0 + $0x23] ss:$16 sm:$0x3] %vm67_vm0, %v1791_v27   ;;  %275 = vst.msk [vmem:[#allocation0 + $0x43] ss:$16 sm:$0xc] %vm67_vm0, %v1791_v27   ;;  %v1822_v44 = vunpack.i.h.bf16 %v1820_v42  ;;  %v1821_v45 = vunpack.i.l.bf16 %v1820_v42  ;;  %v1817_v46 = vunpack.i.h.bf16 %v1815_v43  ;;  %v1816_v47 = vunpack.i.l.bf16 %v1815_v43 }
  0xa1   :  { %277 = vst.msk [vmem:[#allocation0 + $0x63] ss:$16 sm:$0x30] %vm67_vm0, %v1791_v27   ;;  %279 = vst.msk [vmem:[#allocation0 + $0x83] ss:$16 sm:$0xc0] %vm67_vm0, %v1791_v27  }
  0xa2   :  { %260 = vst.msk [vmem:[#allocation0 + $0x103] ss:$16 sm:$0x3] %vm67_vm0, %v1787_v28   ;;  %262 = vst.msk [vmem:[#allocation0 + $0x123] ss:$16 sm:$0xc] %vm67_vm0, %v1787_v28  }
  0xa3   :  { %264 = vst.msk [vmem:[#allocation0 + $0x143] ss:$16 sm:$0x30] %vm67_vm0, %v1787_v28   ;;  %266 = vst.msk [vmem:[#allocation0 + $0x163] ss:$16 sm:$0xc0] %vm67_vm0, %v1787_v28   ;;  %v1830_v48 = vpop.permute.xlu1 %1829  ;;  %v1825_v49 = vpop.permute.xlu0 %1824 }
  0xa4   :  { %247 = vst.msk [vmem:[#allocation0 + $0x3] ss:$16 sm:$0x3] %vm67_vm0, %v1786_v29   ;;  %249 = vst.msk [vmem:[#allocation0 + $0x23] ss:$16 sm:$0xc] %vm67_vm0, %v1786_v29   ;;  %v1832_v50 = vunpack.i.h.bf16 %v1830_v48  ;;  %v1831_v51 = vunpack.i.l.bf16 %v1830_v48  ;;  %v1827_v52 = vunpack.i.h.bf16 %v1825_v49  ;;  %v1826_v53 = vunpack.i.l.bf16 %v1825_v49 }
  0xa5   :  { %251 = vst.msk [vmem:[#allocation0 + $0x43] ss:$16 sm:$0x30] %vm67_vm0, %v1786_v29   ;;  %253 = vst.msk [vmem:[#allocation0 + $0x63] ss:$16 sm:$0xc0] %vm67_vm0, %v1786_v29  }
  0xa6   :  { %337 = vst.msk [vmem:[#allocation0 + $0x124] ss:$16 sm:$0x3] %vm67_vm0, %v1802_v32   ;;  %339 = vst.msk [vmem:[#allocation0 + $0x144] ss:$16 sm:$0xc] %vm67_vm0, %v1802_v32  }
  0xa7   :  { %341 = vst.msk [vmem:[#allocation0 + $0x164] ss:$16 sm:$0x30] %vm67_vm0, %v1802_v32   ;;  %343 = vst.msk [vmem:[#allocation0 + $0x184] ss:$16 sm:$0xc0] %vm67_vm0, %v1802_v32   ;;  %v1840_v54 = vpop.permute.xlu1 %1839  ;;  %v1835_v55 = vpop.permute.xlu0 %1834 }
  0xa8   :  { %324 = vst.msk [vmem:[#allocation0 + $0x24] ss:$16 sm:$0x3] %vm67_vm0, %v1801_v33   ;;  %326 = vst.msk [vmem:[#allocation0 + $0x44] ss:$16 sm:$0xc] %vm67_vm0, %v1801_v33   ;;  %v1842_v56 = vunpack.i.h.bf16 %v1840_v54  ;;  %v1841_v57 = vunpack.i.l.bf16 %v1840_v54  ;;  %v1837_v58 = vunpack.i.h.bf16 %v1835_v55  ;;  %v1836_v59 = vunpack.i.l.bf16 %v1835_v55 }
  0xa9   :  { %328 = vst.msk [vmem:[#allocation0 + $0x64] ss:$16 sm:$0x30] %vm67_vm0, %v1801_v33   ;;  %330 = vst.msk [vmem:[#allocation0 + $0x84] ss:$16 sm:$0xc0] %vm67_vm0, %v1801_v33  }
  0xaa   :  { %311 = vst.msk [vmem:[#allocation0 + $0x104] ss:$16 sm:$0x3] %vm67_vm0, %v1797_v34   ;;  %313 = vst.msk [vmem:[#allocation0 + $0x124] ss:$16 sm:$0xc] %vm67_vm0, %v1797_v34  }
  0xab   :  { %315 = vst.msk [vmem:[#allocation0 + $0x144] ss:$16 sm:$0x30] %vm67_vm0, %v1797_v34   ;;  %317 = vst.msk [vmem:[#allocation0 + $0x164] ss:$16 sm:$0xc0] %vm67_vm0, %v1797_v34   ;;  %v1850_v60 = vpop.permute.xlu1 %1849  ;;  %v1845_v61 = vpop.permute.xlu0 %1844 }
  0xac   :  { %298 = vst.msk [vmem:[#allocation0 + $0x4] ss:$16 sm:$0x3] %vm67_vm0, %v1796_v35   ;;  %300 = vst.msk [vmem:[#allocation0 + $0x24] ss:$16 sm:$0xc] %vm67_vm0, %v1796_v35   ;;  %v1852_v62 = vunpack.i.h.bf16 %v1850_v60  ;;  %v1851_v63 = vunpack.i.l.bf16 %v1850_v60  ;;  %v1847_v0 = vunpack.i.h.bf16 %v1845_v61  ;;  %v1846_v1 = vunpack.i.l.bf16 %v1845_v61 }
  0xad   :  { %302 = vst.msk [vmem:[#allocation0 + $0x44] ss:$16 sm:$0x30] %vm67_vm0, %v1796_v35   ;;  %304 = vst.msk [vmem:[#allocation0 + $0x64] ss:$16 sm:$0xc0] %vm67_vm0, %v1796_v35  }
  0xae   :  { %388 = vst.msk [vmem:[#allocation0 + $0x125] ss:$16 sm:$0x3] %vm67_vm0, %v1812_v38   ;;  %390 = vst.msk [vmem:[#allocation0 + $0x145] ss:$16 sm:$0xc] %vm67_vm0, %v1812_v38  }
  0xaf   :  { %392 = vst.msk [vmem:[#allocation0 + $0x165] ss:$16 sm:$0x30] %vm67_vm0, %v1812_v38   ;;  %394 = vst.msk [vmem:[#allocation0 + $0x185] ss:$16 sm:$0xc0] %vm67_vm0, %v1812_v38   ;;  %v1860_v2 = vpop.permute.xlu1 %1859  ;;  %v1855_v3 = vpop.permute.xlu0 %1854 }
  0xb0   :  { %375 = vst.msk [vmem:[#allocation0 + $0x25] ss:$16 sm:$0x3] %vm67_vm0, %v1811_v39   ;;  %377 = vst.msk [vmem:[#allocation0 + $0x45] ss:$16 sm:$0xc] %vm67_vm0, %v1811_v39   ;;  %v1862_v4 = vunpack.i.h.bf16 %v1860_v2  ;;  %v1861_v5 = vunpack.i.l.bf16 %v1860_v2  ;;  %v1857_v6 = vunpack.i.h.bf16 %v1855_v3  ;;  %v1856_v7 = vunpack.i.l.bf16 %v1855_v3 }
  0xb1   :  { %379 = vst.msk [vmem:[#allocation0 + $0x65] ss:$16 sm:$0x30] %vm67_vm0, %v1811_v39   ;;  %381 = vst.msk [vmem:[#allocation0 + $0x85] ss:$16 sm:$0xc0] %vm67_vm0, %v1811_v39  }
  0xb2   :  { %362 = vst.msk [vmem:[#allocation0 + $0x105] ss:$16 sm:$0x3] %vm67_vm0, %v1807_v40   ;;  %364 = vst.msk [vmem:[#allocation0 + $0x125] ss:$16 sm:$0xc] %vm67_vm0, %v1807_v40  }
  0xb3   :  { %366 = vst.msk [vmem:[#allocation0 + $0x145] ss:$16 sm:$0x30] %vm67_vm0, %v1807_v40   ;;  %368 = vst.msk [vmem:[#allocation0 + $0x165] ss:$16 sm:$0xc0] %vm67_vm0, %v1807_v40   ;;  %v1870_v8 = vpop.permute.xlu1 %1869  ;;  %v1865_v9 = vpop.permute.xlu0 %1864 }
  0xb4   :  { %349 = vst.msk [vmem:[#allocation0 + $0x5] ss:$16 sm:$0x3] %vm67_vm0, %v1806_v41   ;;  %351 = vst.msk [vmem:[#allocation0 + $0x25] ss:$16 sm:$0xc] %vm67_vm0, %v1806_v41   ;;  %v1872_v10 = vunpack.i.h.bf16 %v1870_v8  ;;  %v1871_v11 = vunpack.i.l.bf16 %v1870_v8  ;;  %v1867_v12 = vunpack.i.h.bf16 %v1865_v9  ;;  %v1866_v13 = vunpack.i.l.bf16 %v1865_v9 }
  0xb5   :  { %353 = vst.msk [vmem:[#allocation0 + $0x45] ss:$16 sm:$0x30] %vm67_vm0, %v1806_v41   ;;  %355 = vst.msk [vmem:[#allocation0 + $0x65] ss:$16 sm:$0xc0] %vm67_vm0, %v1806_v41  }
  0xb6   :  { %439 = vst.msk [vmem:[#allocation0 + $0x126] ss:$16 sm:$0x3] %vm67_vm0, %v1822_v44   ;;  %441 = vst.msk [vmem:[#allocation0 + $0x146] ss:$16 sm:$0xc] %vm67_vm0, %v1822_v44  }
  0xb7   :  { %443 = vst.msk [vmem:[#allocation0 + $0x166] ss:$16 sm:$0x30] %vm67_vm0, %v1822_v44   ;;  %445 = vst.msk [vmem:[#allocation0 + $0x186] ss:$16 sm:$0xc0] %vm67_vm0, %v1822_v44   ;;  %v1880_v14 = vpop.permute.xlu1 %1879  ;;  %v1875_v15 = vpop.permute.xlu0 %1874 }
  0xb8   :  { %426 = vst.msk [vmem:[#allocation0 + $0x26] ss:$16 sm:$0x3] %vm67_vm0, %v1821_v45   ;;  %428 = vst.msk [vmem:[#allocation0 + $0x46] ss:$16 sm:$0xc] %vm67_vm0, %v1821_v45   ;;  %v1882_v16 = vunpack.i.h.bf16 %v1880_v14  ;;  %v1881_v17 = vunpack.i.l.bf16 %v1880_v14  ;;  %v1877_v18 = vunpack.i.h.bf16 %v1875_v15  ;;  %v1876_v19 = vunpack.i.l.bf16 %v1875_v15 }
  0xb9   :  { %430 = vst.msk [vmem:[#allocation0 + $0x66] ss:$16 sm:$0x30] %vm67_vm0, %v1821_v45   ;;  %432 = vst.msk [vmem:[#allocation0 + $0x86] ss:$16 sm:$0xc0] %vm67_vm0, %v1821_v45  }
  0xba   :  { %413 = vst.msk [vmem:[#allocation0 + $0x106] ss:$16 sm:$0x3] %vm67_vm0, %v1817_v46   ;;  %415 = vst.msk [vmem:[#allocation0 + $0x126] ss:$16 sm:$0xc] %vm67_vm0, %v1817_v46  }
  0xbb   :  { %417 = vst.msk [vmem:[#allocation0 + $0x146] ss:$16 sm:$0x30] %vm67_vm0, %v1817_v46   ;;  %419 = vst.msk [vmem:[#allocation0 + $0x166] ss:$16 sm:$0xc0] %vm67_vm0, %v1817_v46   ;;  %v1890_v20 = vpop.permute.xlu1 %1889  ;;  %v1885_v21 = vpop.permute.xlu0 %1884 }
  0xbc   :  { %400 = vst.msk [vmem:[#allocation0 + $0x6] ss:$16 sm:$0x3] %vm67_vm0, %v1816_v47   ;;  %402 = vst.msk [vmem:[#allocation0 + $0x26] ss:$16 sm:$0xc] %vm67_vm0, %v1816_v47   ;;  %v1892_v22 = vunpack.i.h.bf16 %v1890_v20  ;;  %v1891_v23 = vunpack.i.l.bf16 %v1890_v20  ;;  %v1887_v24 = vunpack.i.h.bf16 %v1885_v21  ;;  %v1886_v25 = vunpack.i.l.bf16 %v1885_v21 }
  0xbd   :  { %404 = vst.msk [vmem:[#allocation0 + $0x46] ss:$16 sm:$0x30] %vm67_vm0, %v1816_v47   ;;  %406 = vst.msk [vmem:[#allocation0 + $0x66] ss:$16 sm:$0xc0] %vm67_vm0, %v1816_v47  }
  0xbe   :  { %490 = vst.msk [vmem:[#allocation0 + $0x127] ss:$16 sm:$0x3] %vm67_vm0, %v1832_v50   ;;  %492 = vst.msk [vmem:[#allocation0 + $0x147] ss:$16 sm:$0xc] %vm67_vm0, %v1832_v50  }
  0xbf   :  { %494 = vst.msk [vmem:[#allocation0 + $0x167] ss:$16 sm:$0x30] %vm67_vm0, %v1832_v50   ;;  %496 = vst.msk [vmem:[#allocation0 + $0x187] ss:$16 sm:$0xc0] %vm67_vm0, %v1832_v50   ;;  %v1900_v26 = vpop.permute.xlu1 %1899  ;;  %v1895_v27 = vpop.permute.xlu0 %1894 }
  0xc0   :  { %477 = vst.msk [vmem:[#allocation0 + $0x27] ss:$16 sm:$0x3] %vm67_vm0, %v1831_v51   ;;  %479 = vst.msk [vmem:[#allocation0 + $0x47] ss:$16 sm:$0xc] %vm67_vm0, %v1831_v51   ;;  %v1902_v28 = vunpack.i.h.bf16 %v1900_v26  ;;  %v1901_v29 = vunpack.i.l.bf16 %v1900_v26  ;;  %v1897_v30 = vunpack.i.h.bf16 %v1895_v27  ;;  %v1896_v31 = vunpack.i.l.bf16 %v1895_v27 }
  0xc1   :  { %481 = vst.msk [vmem:[#allocation0 + $0x67] ss:$16 sm:$0x30] %vm67_vm0, %v1831_v51   ;;  %483 = vst.msk [vmem:[#allocation0 + $0x87] ss:$16 sm:$0xc0] %vm67_vm0, %v1831_v51  }
  0xc2   :  { %464 = vst.msk [vmem:[#allocation0 + $0x107] ss:$16 sm:$0x3] %vm67_vm0, %v1827_v52   ;;  %466 = vst.msk [vmem:[#allocation0 + $0x127] ss:$16 sm:$0xc] %vm67_vm0, %v1827_v52  }
  0xc3   :  { %468 = vst.msk [vmem:[#allocation0 + $0x147] ss:$16 sm:$0x30] %vm67_vm0, %v1827_v52   ;;  %470 = vst.msk [vmem:[#allocation0 + $0x167] ss:$16 sm:$0xc0] %vm67_vm0, %v1827_v52   ;;  %v1910_v32 = vpop.permute.xlu1 %1909  ;;  %v1905_v33 = vpop.permute.xlu0 %1904 }
  0xc4   :  { %451 = vst.msk [vmem:[#allocation0 + $0x7] ss:$16 sm:$0x3] %vm67_vm0, %v1826_v53   ;;  %453 = vst.msk [vmem:[#allocation0 + $0x27] ss:$16 sm:$0xc] %vm67_vm0, %v1826_v53   ;;  %v1912_v34 = vunpack.i.h.bf16 %v1910_v32  ;;  %v1911_v35 = vunpack.i.l.bf16 %v1910_v32  ;;  %v1907_v36 = vunpack.i.h.bf16 %v1905_v33  ;;  %v1906_v37 = vunpack.i.l.bf16 %v1905_v33 }
  0xc5   :  { %455 = vst.msk [vmem:[#allocation0 + $0x47] ss:$16 sm:$0x30] %vm67_vm0, %v1826_v53   ;;  %457 = vst.msk [vmem:[#allocation0 + $0x67] ss:$16 sm:$0xc0] %vm67_vm0, %v1826_v53  }
  0xc6   :  { %541 = vst.msk [vmem:[#allocation0 + $0x128] ss:$16 sm:$0x3] %vm67_vm0, %v1842_v56   ;;  %543 = vst.msk [vmem:[#allocation0 + $0x148] ss:$16 sm:$0xc] %vm67_vm0, %v1842_v56  }
  0xc7   :  { %545 = vst.msk [vmem:[#allocation0 + $0x168] ss:$16 sm:$0x30] %vm67_vm0, %v1842_v56   ;;  %547 = vst.msk [vmem:[#allocation0 + $0x188] ss:$16 sm:$0xc0] %vm67_vm0, %v1842_v56  }
  0xc8   :  { %528 = vst.msk [vmem:[#allocation0 + $0x28] ss:$16 sm:$0x3] %vm67_vm0, %v1841_v57   ;;  %530 = vst.msk [vmem:[#allocation0 + $0x48] ss:$16 sm:$0xc] %vm67_vm0, %v1841_v57  }
  0xc9   :  { %532 = vst.msk [vmem:[#allocation0 + $0x68] ss:$16 sm:$0x30] %vm67_vm0, %v1841_v57   ;;  %534 = vst.msk [vmem:[#allocation0 + $0x88] ss:$16 sm:$0xc0] %vm67_vm0, %v1841_v57  }
  0xca   :  { %515 = vst.msk [vmem:[#allocation0 + $0x108] ss:$16 sm:$0x3] %vm67_vm0, %v1837_v58   ;;  %517 = vst.msk [vmem:[#allocation0 + $0x128] ss:$16 sm:$0xc] %vm67_vm0, %v1837_v58  }
  0xcb   :  { %519 = vst.msk [vmem:[#allocation0 + $0x148] ss:$16 sm:$0x30] %vm67_vm0, %v1837_v58   ;;  %521 = vst.msk [vmem:[#allocation0 + $0x168] ss:$16 sm:$0xc0] %vm67_vm0, %v1837_v58  }
  0xcc   :  { %502 = vst.msk [vmem:[#allocation0 + $0x8] ss:$16 sm:$0x3] %vm67_vm0, %v1836_v59   ;;  %504 = vst.msk [vmem:[#allocation0 + $0x28] ss:$16 sm:$0xc] %vm67_vm0, %v1836_v59  }
  0xcd   :  { %506 = vst.msk [vmem:[#allocation0 + $0x48] ss:$16 sm:$0x30] %vm67_vm0, %v1836_v59   ;;  %508 = vst.msk [vmem:[#allocation0 + $0x68] ss:$16 sm:$0xc0] %vm67_vm0, %v1836_v59  }
  0xce   :  { %592 = vst.msk [vmem:[#allocation0 + $0x129] ss:$16 sm:$0x3] %vm67_vm0, %v1852_v62   ;;  %594 = vst.msk [vmem:[#allocation0 + $0x149] ss:$16 sm:$0xc] %vm67_vm0, %v1852_v62  }
  0xcf   :  { %596 = vst.msk [vmem:[#allocation0 + $0x169] ss:$16 sm:$0x30] %vm67_vm0, %v1852_v62   ;;  %598 = vst.msk [vmem:[#allocation0 + $0x189] ss:$16 sm:$0xc0] %vm67_vm0, %v1852_v62  }
  0xd0   :  { %579 = vst.msk [vmem:[#allocation0 + $0x29] ss:$16 sm:$0x3] %vm67_vm0, %v1851_v63   ;;  %581 = vst.msk [vmem:[#allocation0 + $0x49] ss:$16 sm:$0xc] %vm67_vm0, %v1851_v63  }
  0xd1   :  { %583 = vst.msk [vmem:[#allocation0 + $0x69] ss:$16 sm:$0x30] %vm67_vm0, %v1851_v63   ;;  %585 = vst.msk [vmem:[#allocation0 + $0x89] ss:$16 sm:$0xc0] %vm67_vm0, %v1851_v63  }
  0xd2   :  { %566 = vst.msk [vmem:[#allocation0 + $0x109] ss:$16 sm:$0x3] %vm67_vm0, %v1847_v0   ;;  %568 = vst.msk [vmem:[#allocation0 + $0x129] ss:$16 sm:$0xc] %vm67_vm0, %v1847_v0  }
  0xd3   :  { %570 = vst.msk [vmem:[#allocation0 + $0x149] ss:$16 sm:$0x30] %vm67_vm0, %v1847_v0   ;;  %572 = vst.msk [vmem:[#allocation0 + $0x169] ss:$16 sm:$0xc0] %vm67_vm0, %v1847_v0  }
  0xd4   :  { %553 = vst.msk [vmem:[#allocation0 + $0x9] ss:$16 sm:$0x3] %vm67_vm0, %v1846_v1   ;;  %555 = vst.msk [vmem:[#allocation0 + $0x29] ss:$16 sm:$0xc] %vm67_vm0, %v1846_v1  }
  0xd5   :  { %557 = vst.msk [vmem:[#allocation0 + $0x49] ss:$16 sm:$0x30] %vm67_vm0, %v1846_v1   ;;  %559 = vst.msk [vmem:[#allocation0 + $0x69] ss:$16 sm:$0xc0] %vm67_vm0, %v1846_v1  }
  0xd6   :  { %643 = vst.msk [vmem:[#allocation0 + $0x12a] ss:$16 sm:$0x3] %vm67_vm0, %v1862_v4   ;;  %645 = vst.msk [vmem:[#allocation0 + $0x14a] ss:$16 sm:$0xc] %vm67_vm0, %v1862_v4  }
  0xd7   :  { %647 = vst.msk [vmem:[#allocation0 + $0x16a] ss:$16 sm:$0x30] %vm67_vm0, %v1862_v4   ;;  %649 = vst.msk [vmem:[#allocation0 + $0x18a] ss:$16 sm:$0xc0] %vm67_vm0, %v1862_v4  }
  0xd8   :  { %630 = vst.msk [vmem:[#allocation0 + $0x2a] ss:$16 sm:$0x3] %vm67_vm0, %v1861_v5   ;;  %632 = vst.msk [vmem:[#allocation0 + $0x4a] ss:$16 sm:$0xc] %vm67_vm0, %v1861_v5  }
  0xd9   :  { %634 = vst.msk [vmem:[#allocation0 + $0x6a] ss:$16 sm:$0x30] %vm67_vm0, %v1861_v5   ;;  %636 = vst.msk [vmem:[#allocation0 + $0x8a] ss:$16 sm:$0xc0] %vm67_vm0, %v1861_v5  }
  0xda   :  { %617 = vst.msk [vmem:[#allocation0 + $0x10a] ss:$16 sm:$0x3] %vm67_vm0, %v1857_v6   ;;  %619 = vst.msk [vmem:[#allocation0 + $0x12a] ss:$16 sm:$0xc] %vm67_vm0, %v1857_v6  }
  0xdb   :  { %621 = vst.msk [vmem:[#allocation0 + $0x14a] ss:$16 sm:$0x30] %vm67_vm0, %v1857_v6   ;;  %623 = vst.msk [vmem:[#allocation0 + $0x16a] ss:$16 sm:$0xc0] %vm67_vm0, %v1857_v6  }
  0xdc   :  { %604 = vst.msk [vmem:[#allocation0 + $0xa] ss:$16 sm:$0x3] %vm67_vm0, %v1856_v7   ;;  %606 = vst.msk [vmem:[#allocation0 + $0x2a] ss:$16 sm:$0xc] %vm67_vm0, %v1856_v7  }
  0xdd   :  { %608 = vst.msk [vmem:[#allocation0 + $0x4a] ss:$16 sm:$0x30] %vm67_vm0, %v1856_v7   ;;  %610 = vst.msk [vmem:[#allocation0 + $0x6a] ss:$16 sm:$0xc0] %vm67_vm0, %v1856_v7  }
  0xde   :  { %694 = vst.msk [vmem:[#allocation0 + $0x12b] ss:$16 sm:$0x3] %vm67_vm0, %v1872_v10   ;;  %696 = vst.msk [vmem:[#allocation0 + $0x14b] ss:$16 sm:$0xc] %vm67_vm0, %v1872_v10  }
  0xdf   :  { %698 = vst.msk [vmem:[#allocation0 + $0x16b] ss:$16 sm:$0x30] %vm67_vm0, %v1872_v10   ;;  %700 = vst.msk [vmem:[#allocation0 + $0x18b] ss:$16 sm:$0xc0] %vm67_vm0, %v1872_v10  }
  0xe0   :  { %681 = vst.msk [vmem:[#allocation0 + $0x2b] ss:$16 sm:$0x3] %vm67_vm0, %v1871_v11   ;;  %683 = vst.msk [vmem:[#allocation0 + $0x4b] ss:$16 sm:$0xc] %vm67_vm0, %v1871_v11  }
  0xe1   :  { %685 = vst.msk [vmem:[#allocation0 + $0x6b] ss:$16 sm:$0x30] %vm67_vm0, %v1871_v11   ;;  %687 = vst.msk [vmem:[#allocation0 + $0x8b] ss:$16 sm:$0xc0] %vm67_vm0, %v1871_v11  }
  0xe2   :  { %668 = vst.msk [vmem:[#allocation0 + $0x10b] ss:$16 sm:$0x3] %vm67_vm0, %v1867_v12   ;;  %670 = vst.msk [vmem:[#allocation0 + $0x12b] ss:$16 sm:$0xc] %vm67_vm0, %v1867_v12  }
  0xe3   :  { %672 = vst.msk [vmem:[#allocation0 + $0x14b] ss:$16 sm:$0x30] %vm67_vm0, %v1867_v12   ;;  %674 = vst.msk [vmem:[#allocation0 + $0x16b] ss:$16 sm:$0xc0] %vm67_vm0, %v1867_v12  }
  0xe4   :  { %655 = vst.msk [vmem:[#allocation0 + $0xb] ss:$16 sm:$0x3] %vm67_vm0, %v1866_v13   ;;  %657 = vst.msk [vmem:[#allocation0 + $0x2b] ss:$16 sm:$0xc] %vm67_vm0, %v1866_v13  }
  0xe5   :  { %659 = vst.msk [vmem:[#allocation0 + $0x4b] ss:$16 sm:$0x30] %vm67_vm0, %v1866_v13   ;;  %661 = vst.msk [vmem:[#allocation0 + $0x6b] ss:$16 sm:$0xc0] %vm67_vm0, %v1866_v13  }
  0xe6   :  { %745 = vst.msk [vmem:[#allocation0 + $0x12c] ss:$16 sm:$0x3] %vm67_vm0, %v1882_v16   ;;  %747 = vst.msk [vmem:[#allocation0 + $0x14c] ss:$16 sm:$0xc] %vm67_vm0, %v1882_v16  }
  0xe7   :  { %749 = vst.msk [vmem:[#allocation0 + $0x16c] ss:$16 sm:$0x30] %vm67_vm0, %v1882_v16   ;;  %751 = vst.msk [vmem:[#allocation0 + $0x18c] ss:$16 sm:$0xc0] %vm67_vm0, %v1882_v16  }
  0xe8   :  { %732 = vst.msk [vmem:[#allocation0 + $0x2c] ss:$16 sm:$0x3] %vm67_vm0, %v1881_v17   ;;  %734 = vst.msk [vmem:[#allocation0 + $0x4c] ss:$16 sm:$0xc] %vm67_vm0, %v1881_v17  }
  0xe9   :  { %736 = vst.msk [vmem:[#allocation0 + $0x6c] ss:$16 sm:$0x30] %vm67_vm0, %v1881_v17   ;;  %738 = vst.msk [vmem:[#allocation0 + $0x8c] ss:$16 sm:$0xc0] %vm67_vm0, %v1881_v17  }
  0xea   :  { %719 = vst.msk [vmem:[#allocation0 + $0x10c] ss:$16 sm:$0x3] %vm67_vm0, %v1877_v18   ;;  %721 = vst.msk [vmem:[#allocation0 + $0x12c] ss:$16 sm:$0xc] %vm67_vm0, %v1877_v18  }
  0xeb   :  { %723 = vst.msk [vmem:[#allocation0 + $0x14c] ss:$16 sm:$0x30] %vm67_vm0, %v1877_v18   ;;  %725 = vst.msk [vmem:[#allocation0 + $0x16c] ss:$16 sm:$0xc0] %vm67_vm0, %v1877_v18  }
  0xec   :  { %706 = vst.msk [vmem:[#allocation0 + $0xc] ss:$16 sm:$0x3] %vm67_vm0, %v1876_v19   ;;  %708 = vst.msk [vmem:[#allocation0 + $0x2c] ss:$16 sm:$0xc] %vm67_vm0, %v1876_v19  }
  0xed   :  { %710 = vst.msk [vmem:[#allocation0 + $0x4c] ss:$16 sm:$0x30] %vm67_vm0, %v1876_v19   ;;  %712 = vst.msk [vmem:[#allocation0 + $0x6c] ss:$16 sm:$0xc0] %vm67_vm0, %v1876_v19  }
  0xee   :  { %796 = vst.msk [vmem:[#allocation0 + $0x12d] ss:$16 sm:$0x3] %vm67_vm0, %v1892_v22   ;;  %798 = vst.msk [vmem:[#allocation0 + $0x14d] ss:$16 sm:$0xc] %vm67_vm0, %v1892_v22  }
  0xef   :  { %800 = vst.msk [vmem:[#allocation0 + $0x16d] ss:$16 sm:$0x30] %vm67_vm0, %v1892_v22   ;;  %802 = vst.msk [vmem:[#allocation0 + $0x18d] ss:$16 sm:$0xc0] %vm67_vm0, %v1892_v22  }
  0xf0   :  { %783 = vst.msk [vmem:[#allocation0 + $0x2d] ss:$16 sm:$0x3] %vm67_vm0, %v1891_v23   ;;  %785 = vst.msk [vmem:[#allocation0 + $0x4d] ss:$16 sm:$0xc] %vm67_vm0, %v1891_v23  }
  0xf1   :  { %787 = vst.msk [vmem:[#allocation0 + $0x6d] ss:$16 sm:$0x30] %vm67_vm0, %v1891_v23   ;;  %789 = vst.msk [vmem:[#allocation0 + $0x8d] ss:$16 sm:$0xc0] %vm67_vm0, %v1891_v23  }
  0xf2   :  { %770 = vst.msk [vmem:[#allocation0 + $0x10d] ss:$16 sm:$0x3] %vm67_vm0, %v1887_v24   ;;  %772 = vst.msk [vmem:[#allocation0 + $0x12d] ss:$16 sm:$0xc] %vm67_vm0, %v1887_v24  }
  0xf3   :  { %774 = vst.msk [vmem:[#allocation0 + $0x14d] ss:$16 sm:$0x30] %vm67_vm0, %v1887_v24   ;;  %776 = vst.msk [vmem:[#allocation0 + $0x16d] ss:$16 sm:$0xc0] %vm67_vm0, %v1887_v24  }
  0xf4   :  { %757 = vst.msk [vmem:[#allocation0 + $0xd] ss:$16 sm:$0x3] %vm67_vm0, %v1886_v25   ;;  %759 = vst.msk [vmem:[#allocation0 + $0x2d] ss:$16 sm:$0xc] %vm67_vm0, %v1886_v25  }
  0xf5   :  { %761 = vst.msk [vmem:[#allocation0 + $0x4d] ss:$16 sm:$0x30] %vm67_vm0, %v1886_v25   ;;  %763 = vst.msk [vmem:[#allocation0 + $0x6d] ss:$16 sm:$0xc0] %vm67_vm0, %v1886_v25  }
  0xf6   :  { %847 = vst.msk [vmem:[#allocation0 + $0x12e] ss:$16 sm:$0x3] %vm67_vm0, %v1902_v28   ;;  %849 = vst.msk [vmem:[#allocation0 + $0x14e] ss:$16 sm:$0xc] %vm67_vm0, %v1902_v28  }
  0xf7   :  { %851 = vst.msk [vmem:[#allocation0 + $0x16e] ss:$16 sm:$0x30] %vm67_vm0, %v1902_v28   ;;  %853 = vst.msk [vmem:[#allocation0 + $0x18e] ss:$16 sm:$0xc0] %vm67_vm0, %v1902_v28  }
  0xf8   :  { %834 = vst.msk [vmem:[#allocation0 + $0x2e] ss:$16 sm:$0x3] %vm67_vm0, %v1901_v29   ;;  %836 = vst.msk [vmem:[#allocation0 + $0x4e] ss:$16 sm:$0xc] %vm67_vm0, %v1901_v29  }
  0xf9   :  { %838 = vst.msk [vmem:[#allocation0 + $0x6e] ss:$16 sm:$0x30] %vm67_vm0, %v1901_v29   ;;  %840 = vst.msk [vmem:[#allocation0 + $0x8e] ss:$16 sm:$0xc0] %vm67_vm0, %v1901_v29  }
  0xfa   :  { %821 = vst.msk [vmem:[#allocation0 + $0x10e] ss:$16 sm:$0x3] %vm67_vm0, %v1897_v30   ;;  %823 = vst.msk [vmem:[#allocation0 + $0x12e] ss:$16 sm:$0xc] %vm67_vm0, %v1897_v30  }
  0xfb   :  { %825 = vst.msk [vmem:[#allocation0 + $0x14e] ss:$16 sm:$0x30] %vm67_vm0, %v1897_v30   ;;  %827 = vst.msk [vmem:[#allocation0 + $0x16e] ss:$16 sm:$0xc0] %vm67_vm0, %v1897_v30  }
  0xfc   :  { %808 = vst.msk [vmem:[#allocation0 + $0xe] ss:$16 sm:$0x3] %vm67_vm0, %v1896_v31   ;;  %810 = vst.msk [vmem:[#allocation0 + $0x2e] ss:$16 sm:$0xc] %vm67_vm0, %v1896_v31  }
  0xfd   :  { %812 = vst.msk [vmem:[#allocation0 + $0x4e] ss:$16 sm:$0x30] %vm67_vm0, %v1896_v31   ;;  %814 = vst.msk [vmem:[#allocation0 + $0x6e] ss:$16 sm:$0xc0] %vm67_vm0, %v1896_v31  }
  0xfe   :  { %898 = vst.msk [vmem:[#allocation0 + $0x12f] ss:$16 sm:$0x3] %vm67_vm0, %v1912_v34   ;;  %900 = vst.msk [vmem:[#allocation0 + $0x14f] ss:$16 sm:$0xc] %vm67_vm0, %v1912_v34  }
  0xff   :  { %902 = vst.msk [vmem:[#allocation0 + $0x16f] ss:$16 sm:$0x30] %vm67_vm0, %v1912_v34   ;;  %904 = vst.msk [vmem:[#allocation0 + $0x18f] ss:$16 sm:$0xc0] %vm67_vm0, %v1912_v34  }
 0x100   :  { %885 = vst.msk [vmem:[#allocation0 + $0x2f] ss:$16 sm:$0x3] %vm67_vm0, %v1911_v35   ;;  %887 = vst.msk [vmem:[#allocation0 + $0x4f] ss:$16 sm:$0xc] %vm67_vm0, %v1911_v35  }
 0x101   :  { %889 = vst.msk [vmem:[#allocation0 + $0x6f] ss:$16 sm:$0x30] %vm67_vm0, %v1911_v35   ;;  %891 = vst.msk [vmem:[#allocation0 + $0x8f] ss:$16 sm:$0xc0] %vm67_vm0, %v1911_v35  }
 0x102   :  { %872 = vst.msk [vmem:[#allocation0 + $0x10f] ss:$16 sm:$0x3] %vm67_vm0, %v1907_v36   ;;  %874 = vst.msk [vmem:[#allocation0 + $0x12f] ss:$16 sm:$0xc] %vm67_vm0, %v1907_v36  }
 0x103   :  { %876 = vst.msk [vmem:[#allocation0 + $0x14f] ss:$16 sm:$0x30] %vm67_vm0, %v1907_v36   ;;  %878 = vst.msk [vmem:[#allocation0 + $0x16f] ss:$16 sm:$0xc0] %vm67_vm0, %v1907_v36  }
 0x104   :  { %859 = vst.msk [vmem:[#allocation0 + $0xf] ss:$16 sm:$0x3] %vm67_vm0, %v1906_v37   ;;  %861 = vst.msk [vmem:[#allocation0 + $0x2f] ss:$16 sm:$0xc] %vm67_vm0, %v1906_v37  }
 0x105   :  { %863 = vst.msk [vmem:[#allocation0 + $0x4f] ss:$16 sm:$0x30] %vm67_vm0, %v1906_v37   ;;  %865 = vst.msk [vmem:[#allocation0 + $0x6f] ss:$16 sm:$0xc0] %vm67_vm0, %v1906_v37  }
 0x106   :  { %v939_v38 = vld [vmem:[#allocation0 + $0x20] sm:$0xff]  ;;  %v955_v39 = vld [vmem:[#allocation0 + $0x30] sm:$0xff]  ;;  %v1203_v3 = vld [vmem:[#allocation0 + $0x128] sm:$0xff] }
 0x107   :  { %v1003_v40 = vld [vmem:[#allocation0 + $0x60] sm:$0xff]  ;;  %v1019_v41 = vld [vmem:[#allocation0 + $0x70] sm:$0xff]  ;;  %v947_v47 = vld [vmem:[#allocation0 + $0x28] sm:$0xff] }
 0x108   :  { %v1067_v42 = vld [vmem:[#allocation0 + $0xa0] sm:$0xff]  ;;  %v1083_v43 = vld [vmem:[#allocation0 + $0xb0] sm:$0xff]  ;;  %v963_v48 = vld [vmem:[#allocation0 + $0x38] sm:$0xff]  ;;  %v1569_v53 = vpack.c.bf16 %v947_v47, %v939_v38 }
 0x109   :  { %v1131_v44 = vld [vmem:[#allocation0 + $0xe0] sm:$0xff]  ;;  %v1147_v45 = vld [vmem:[#allocation0 + $0xf0] sm:$0xff]  ;;  %v1011_v49 = vld [vmem:[#allocation0 + $0x68] sm:$0xff]  ;;  %v1574_v54 = vpack.c.bf16 %v963_v48, %v955_v39 }
 0x10a   :  { %v1195_v46 = vld [vmem:[#allocation0 + $0x120] sm:$0xff]  ;;  %v1211_v50 = vld [vmem:[#allocation0 + $0x130] sm:$0xff]  ;;  %v1589_v55 = vpack.c.bf16 %v1011_v49, %v1003_v40  ;;  %v1027_v56 = vld [vmem:[#allocation0 + $0x78] sm:$0xff]  ;;  %1718 = vst [vmem:[%s2313_s1 + $0x10] sm:$0xff] %v1569_v53  }
 0x10b   :  { %v1259_v51 = vld [vmem:[#allocation0 + $0x160] sm:$0xff]  ;;  %v1275_v52 = vld [vmem:[#allocation0 + $0x170] sm:$0xff]  ;;  %v1075_v57 = vld [vmem:[#allocation0 + $0xa8] sm:$0xff]  ;;  %v1594_v62 = vpack.c.bf16 %v1027_v56, %v1019_v41  ;;  %1719 = vst [vmem:[%s2313_s1 + $0x18] sm:$0xff] %v1574_v54   ;;  %v1649_v9 = vpack.c.bf16 %v1203_v3, %v1195_v46 }
 0x10c   :  { %v1091_v58 = vld [vmem:[#allocation0 + $0xb8] sm:$0xff]  ;;  %v1323_v59 = vld [vmem:[#allocation0 + $0x1a0] sm:$0xff]  ;;  %v1339_v60 = vld [vmem:[#allocation0 + $0x1b0] sm:$0xff]  ;;  %v1609_v63 = vpack.c.bf16 %v1075_v57, %v1067_v42  ;;  %1722 = vst [vmem:[%s2313_s1 + $0x30] sm:$0xff] %v1589_v55  }
 0x10d   :  { %v1387_v61 = vld [vmem:[#allocation0 + $0x1e0] sm:$0xff]  ;;  %v1614_v0 = vpack.c.bf16 %v1091_v58, %v1083_v43  ;;  %v1139_v1 = vld [vmem:[#allocation0 + $0xe8] sm:$0xff]  ;;  %v1155_v2 = vld [vmem:[#allocation0 + $0xf8] sm:$0xff]  ;;  %1723 = vst [vmem:[%s2313_s1 + $0x38] sm:$0xff] %v1594_v62  }
 0x10e   :  { %v1403_v4 = vld [vmem:[#allocation0 + $0x1f0] sm:$0xff]  ;;  %v910_v5 = vld [vmem:[#allocation0] sm:$0xff]  ;;  %v1629_v7 = vpack.c.bf16 %v1139_v1, %v1131_v44  ;;  %v1634_v8 = vpack.c.bf16 %v1155_v2, %v1147_v45  ;;  %v1219_v10 = vld [vmem:[#allocation0 + $0x138] sm:$0xff]  ;;  %1726 = vst [vmem:[%s2313_s1 + $0x50] sm:$0xff] %v1609_v63  }
 0x10f   :  { %v923_v6 = vld [vmem:[#allocation0 + $0x10] sm:$0xff]  ;;  %v1267_v11 = vld [vmem:[#allocation0 + $0x168] sm:$0xff]  ;;  %v1283_v12 = vld [vmem:[#allocation0 + $0x178] sm:$0xff]  ;;  %1727 = vst [vmem:[%s2313_s1 + $0x58] sm:$0xff] %v1614_v0   ;;  %v1654_v16 = vpack.c.bf16 %v1219_v10, %v1211_v50 }
 0x110   :  { %v971_v13 = vld [vmem:[#allocation0 + $0x40] sm:$0xff]  ;;  %v987_v14 = vld [vmem:[#allocation0 + $0x50] sm:$0xff]  ;;  %v1669_v17 = vpack.c.bf16 %v1267_v11, %v1259_v51  ;;  %v1674_v18 = vpack.c.bf16 %v1283_v12, %v1275_v52  ;;  %v1331_v19 = vld [vmem:[#allocation0 + $0x1a8] sm:$0xff]  ;;  %1730 = vst [vmem:[%s2313_s1 + $0x70] sm:$0xff] %v1629_v7  }
 0x111   :  { %v1035_v15 = vld [vmem:[#allocation0 + $0x80] sm:$0xff]  ;;  %v1347_v20 = vld [vmem:[#allocation0 + $0x1b8] sm:$0xff]  ;;  %v1395_v21 = vld [vmem:[#allocation0 + $0x1e8] sm:$0xff]  ;;  %1731 = vst [vmem:[%s2313_s1 + $0x78] sm:$0xff] %v1634_v8   ;;  %v1689_v25 = vpack.c.bf16 %v1331_v19, %v1323_v59 }
 0x112   :  { %v1051_v22 = vld [vmem:[#allocation0 + $0x90] sm:$0xff]  ;;  %v1099_v23 = vld [vmem:[#allocation0 + $0xc0] sm:$0xff]  ;;  %1734 = vst [vmem:[%s2313_s1 + $0x90] sm:$0xff] %v1649_v9   ;;  %v1694_v26 = vpack.c.bf16 %v1347_v20, %v1339_v60  ;;  %v1709_v27 = vpack.c.bf16 %v1395_v21, %v1387_v61  ;;  %v1411_v28 = vld [vmem:[#allocation0 + $0x1f8] sm:$0xff] }
 0x113   :  { %v1115_v24 = vld [vmem:[#allocation0 + $0xd0] sm:$0xff]  ;;  %v916_v29 = vld [vmem:[#allocation0 + $0x8] sm:$0xff]  ;;  %v931_v30 = vld [vmem:[#allocation0 + $0x18] sm:$0xff]  ;;  %1735 = vst [vmem:[%s2313_s1 + $0x98] sm:$0xff] %v1654_v16   ;;  %v1714_v34 = vpack.c.bf16 %v1411_v28, %v1403_v4 }
 0x114   :  { %v1163_v31 = vld [vmem:[#allocation0 + $0x100] sm:$0xff]  ;;  %v1179_v32 = vld [vmem:[#allocation0 + $0x110] sm:$0xff]  ;;  %1738 = vst [vmem:[%s2313_s1 + $0xb0] sm:$0xff] %v1669_v17   ;;  %1739 = vst [vmem:[%s2313_s1 + $0xb8] sm:$0xff] %v1674_v18   ;;  %v1559_v35 = vpack.c.bf16 %v916_v29, %v910_v5  ;;  %v1564_v36 = vpack.c.bf16 %v931_v30, %v923_v6 }
 0x115   :  { %v1227_v33 = vld [vmem:[#allocation0 + $0x140] sm:$0xff]  ;;  %v979_v37 = vld [vmem:[#allocation0 + $0x48] sm:$0xff]  ;;  %v995_v38 = vld [vmem:[#allocation0 + $0x58] sm:$0xff]  ;;  %1742 = vst [vmem:[%s2313_s1 + $0xd0] sm:$0xff] %v1689_v25  }
 0x116   :  { %v1043_v39 = vld [vmem:[#allocation0 + $0x88] sm:$0xff]  ;;  %v1243_v40 = vld [vmem:[#allocation0 + $0x150] sm:$0xff]  ;;  %v1291_v41 = vld [vmem:[#allocation0 + $0x180] sm:$0xff]  ;;  %1743 = vst [vmem:[%s2313_s1 + $0xd8] sm:$0xff] %v1694_v26   ;;  %v1579_v43 = vpack.c.bf16 %v979_v37, %v971_v13  ;;  %v1584_v44 = vpack.c.bf16 %v995_v38, %v987_v14 }
 0x117   :  { %v1307_v42 = vld [vmem:[#allocation0 + $0x190] sm:$0xff]  ;;  %1746 = vst [vmem:[%s2313_s1 + $0xf0] sm:$0xff] %v1709_v27   ;;  %v1599_v45 = vpack.c.bf16 %v1043_v39, %v1035_v15  ;;  %v1059_v46 = vld [vmem:[#allocation0 + $0x98] sm:$0xff]  ;;  %v1107_v47 = vld [vmem:[#allocation0 + $0xc8] sm:$0xff] }
 0x118   :  { %v1123_v48 = vld [vmem:[#allocation0 + $0xd8] sm:$0xff]  ;;  %v1355_v49 = vld [vmem:[#allocation0 + $0x1c0] sm:$0xff]  ;;  %1747 = vst [vmem:[%s2313_s1 + $0xf8] sm:$0xff] %v1714_v34   ;;  %1560 = vst [vmem:[%s2313_s1] sm:$0xff] %v1559_v35   ;;  %v1604_v50 = vpack.c.bf16 %v1059_v46, %v1051_v22  ;;  %v1619_v51 = vpack.c.bf16 %v1107_v47, %v1099_v23 }
 0x119   :  { %1717 = vst [vmem:[%s2313_s1 + $0x8] sm:$0xff] %v1564_v36   ;;  %v1624_v52 = vpack.c.bf16 %v1123_v48, %v1115_v24  ;;  %v1171_v53 = vld [vmem:[#allocation0 + $0x108] sm:$0xff]  ;;  %v1187_v54 = vld [vmem:[#allocation0 + $0x118] sm:$0xff]  ;;  %1720 = vst [vmem:[%s2313_s1 + $0x20] sm:$0xff] %v1579_v43  }
 0x11a   :  { %v1235_v55 = vld [vmem:[#allocation0 + $0x148] sm:$0xff]  ;;  %1721 = vst [vmem:[%s2313_s1 + $0x28] sm:$0xff] %v1584_v44   ;;  %1724 = vst [vmem:[%s2313_s1 + $0x40] sm:$0xff] %v1599_v45   ;;  %v1639_v56 = vpack.c.bf16 %v1171_v53, %v1163_v31  ;;  %v1644_v57 = vpack.c.bf16 %v1187_v54, %v1179_v32  ;;  %v1251_v59 = vld [vmem:[#allocation0 + $0x158] sm:$0xff] }
 0x11b   :  { %v1659_v58 = vpack.c.bf16 %v1235_v55, %v1227_v33  ;;  %v1299_v60 = vld [vmem:[#allocation0 + $0x188] sm:$0xff]  ;;  %v1315_v61 = vld [vmem:[#allocation0 + $0x198] sm:$0xff]  ;;  %v1371_v62 = vld [vmem:[#allocation0 + $0x1d0] sm:$0xff]  ;;  %1725 = vst [vmem:[%s2313_s1 + $0x48] sm:$0xff] %v1604_v50   ;;  %v1664_v63 = vpack.c.bf16 %v1251_v59, %v1243_v40 }
 0x11c   :  { %1728 = vst [vmem:[%s2313_s1 + $0x60] sm:$0xff] %v1619_v51   ;;  %1729 = vst [vmem:[%s2313_s1 + $0x68] sm:$0xff] %v1624_v52   ;;  %v1679_v0 = vpack.c.bf16 %v1299_v60, %v1291_v41  ;;  %v1684_v1 = vpack.c.bf16 %v1315_v61, %v1307_v42  ;;  %v1363_v2 = vld [vmem:[#allocation0 + $0x1c8] sm:$0xff]  ;;  %v1379_v3 = vld [vmem:[#allocation0 + $0x1d8] sm:$0xff] }
 0x11d   :  { %1732 = vst [vmem:[%s2313_s1 + $0x80] sm:$0xff] %v1639_v56   ;;  %1733 = vst [vmem:[%s2313_s1 + $0x88] sm:$0xff] %v1644_v57   ;;  %v1699_v4 = vpack.c.bf16 %v1363_v2, %v1355_v49  ;;  %v1704_v5 = vpack.c.bf16 %v1379_v3, %v1371_v62 }
 0x11e   :  { %1736 = vst [vmem:[%s2313_s1 + $0xa0] sm:$0xff] %v1659_v58   ;;  %1737 = vst [vmem:[%s2313_s1 + $0xa8] sm:$0xff] %v1664_v63  }
 0x11f   :  { %1740 = vst [vmem:[%s2313_s1 + $0xc0] sm:$0xff] %v1679_v0   ;;  %1741 = vst [vmem:[%s2313_s1 + $0xc8] sm:$0xff] %v1684_v1  }
 0x120   :  { %1744 = vst [vmem:[%s2313_s1 + $0xe0] sm:$0xff] %v1699_v4   ;;  %1745 = vst [vmem:[%s2313_s1 + $0xe8] sm:$0xff] %v1704_v5  }

// kernel: hourglass_1_forward.15
= control target key start
LH: loop header
LB: loop body
LE: loop exit
PB: predicated region body
PF: predicated region fallthrough
CT: control target
= control target key end

     0   :  { %s1009_s12 = smov 0   ;;  %s1011_s13 = smov 0   ;;  %s1188_s0 = inlined_call_operand.vmem [shape: bf16[1,8,256], index: 0, kind: input, shape index: {}]   ;;  %s1189_s1 = inlined_call_operand.vmem [shape: bf16[1,256,512], index: 1, kind: input, shape index: {}]   ;;  %s1190_s2 = inlined_call_operand.vmem [shape: f32[8,1], index: 2, kind: input, shape index: {}]   ;;  %s1191_s3 = inlined_call_operand.vmem [shape: bf16[1,8,512], index: 3, kind: output, shape index: {}]  }
   0x1   :  { %s1013_s14 = smov 0   ;;  %s1015_s15 = smov 0  }
   0x2   :  { %s1017_s16 = smov 0  }
   0x3 LB: > { %s28_s17 = sadd.s32 1, %s982_s15  ;;  %p78_p1 = scmp.ne.s32.totalorder %s974_s13, %s970_s12  ;;  %s986_s16 = sphi %s1017_s16, %s13_s16   ;;  %s982_s15 = sphi %s1015_s15, %s1195_s15   ;;  %s978_s14 = sphi %s1013_s14, %s1194_s14   ;;  %s974_s13 = sphi %s1011_s13, %s1193_s13   ;;  %s970_s12 = sphi %s1009_s12, %s1192_s12  }
   0x4   : > { %p30_p0 = scmp.ge.s32.totalorder %s28_s17, 2  ;;  %p79_p2 = scmp.eq.s32.totalorder %s986_s16, 0 }
   0x5   : > { %s71_s19 = sadd.s32 1, %s974_s13  ;;  %p809_p5 = scmp.ge.s32.totalorder %s986_s16, 2 }
   0x6   : > { %s1197_s17 = smov (%p30_p0, %s28_s17), 0  ;;  %p80_p3 = por %p79_p2, %p78_p1 }
   0x7   : > { %s67_s18 = ssub.s32 %s982_s15, %s1197_s17  ;;  %169 = sbr.rel (%p809_p5) target bundleno = 32 (0x20), region = 24 }
   0x8   : > { %p69_p4 = scmp.eq.s32.totalorder %s67_s18, 0 }
   0xa   : > { %s1044_s20 = scalar_select %p69_p4, %s974_s13, %s71_s19  }
   0xc   : > { %172 = sbr.rel (!%p80_p3) target bundleno = 32 (0x20), region = 28  ;;  %s174_s21 = sand.u32 (%p80_p3), 1, %s974_s13  }
   0xd   : > { %s854_s22 = sshll.u32 (%p80_p3), %s982_s15, 3  ;;  %s810_s23 = sshll.u32 (%p80_p3), %s174_s21, 8 }
   0xe   : > { %s1052_s26 = scalar_lea.vmem (%p80_p3), %s1189_s1, %s854_s22  ;;  %s1057_s27 = scalar_lea.vmem (%p80_p3), [#allocation3], %s810_s23 }
   0xf   : > { %v275_v0 = vld [vmem:[%s1052_s26] sm:$0xff] (%p80_p3)  ;;  %v277_v1 = vld [vmem:[%s1052_s26 + $0x10] sm:$0xff] (%p80_p3) }
  0x10   : > { %v279_v2 = vld [vmem:[%s1052_s26 + $0x20] sm:$0xff] (%p80_p3)  ;;  %276 = vst [vmem:[%s1057_s27] sm:$0xff] (%p80_p3), %v275_v0  ;;  %278 = vst [vmem:[%s1057_s27 + $0x8] sm:$0xff] (%p80_p3), %v277_v1  ;;  %v281_v3 = vld [vmem:[%s1052_s26 + $0x30] sm:$0xff] (%p80_p3) }
  0x11   : > { %280 = vst [vmem:[%s1057_s27 + $0x10] sm:$0xff] %v279_v2  ;;  %v283_v4 = vld [vmem:[%s1052_s26 + $0x40] sm:$0xff]  ;;  %v285_v5 = vld [vmem:[%s1052_s26 + $0x50] sm:$0xff]  ;;  %282 = vst [vmem:[%s1057_s27 + $0x18] sm:$0xff] %v281_v3 }
  0x12   : > { %284 = vst [vmem:[%s1057_s27 + $0x20] sm:$0xff] %v283_v4  ;;  %286 = vst [vmem:[%s1057_s27 + $0x28] sm:$0xff] %v285_v5  ;;  %v287_v6 = vld [vmem:[%s1052_s26 + $0x60] sm:$0xff]  ;;  %v289_v7 = vld [vmem:[%s1052_s26 + $0x70] sm:$0xff] }
  0x13   : > { %v291_v8 = vld [vmem:[%s1052_s26 + $0x80] sm:$0xff]  ;;  %288 = vst [vmem:[%s1057_s27 + $0x30] sm:$0xff] %v287_v6  ;;  %290 = vst [vmem:[%s1057_s27 + $0x38] sm:$0xff] %v289_v7  ;;  %v293_v9 = vld [vmem:[%s1052_s26 + $0x90] sm:$0xff] }
  0x14   : > { %292 = vst [vmem:[%s1057_s27 + $0x40] sm:$0xff] %v291_v8  ;;  %v295_v10 = vld [vmem:[%s1052_s26 + $0xa0] sm:$0xff]  ;;  %v297_v11 = vld [vmem:[%s1052_s26 + $0xb0] sm:$0xff]  ;;  %294 = vst [vmem:[%s1057_s27 + $0x48] sm:$0xff] %v293_v9 }
  0x15   : > { %296 = vst [vmem:[%s1057_s27 + $0x50] sm:$0xff] %v295_v10  ;;  %298 = vst [vmem:[%s1057_s27 + $0x58] sm:$0xff] %v297_v11  ;;  %v299_v12 = vld [vmem:[%s1052_s26 + $0xc0] sm:$0xff]  ;;  %v301_v13 = vld [vmem:[%s1052_s26 + $0xd0] sm:$0xff] }
  0x16   : > { %v303_v14 = vld [vmem:[%s1052_s26 + $0xe0] sm:$0xff]  ;;  %300 = vst [vmem:[%s1057_s27 + $0x60] sm:$0xff] %v299_v12  ;;  %302 = vst [vmem:[%s1057_s27 + $0x68] sm:$0xff] %v301_v13  ;;  %v305_v15 = vld [vmem:[%s1052_s26 + $0xf0] sm:$0xff] }
  0x17   : > { %304 = vst [vmem:[%s1057_s27 + $0x70] sm:$0xff] %v303_v14  ;;  %v307_v16 = vld [vmem:[%s1052_s26 + $0x100] sm:$0xff]  ;;  %v309_v17 = vld [vmem:[%s1052_s26 + $0x110] sm:$0xff]  ;;  %306 = vst [vmem:[%s1057_s27 + $0x78] sm:$0xff] %v305_v15 }
  0x18   : > { %308 = vst [vmem:[%s1057_s27 + $0x80] sm:$0xff] %v307_v16  ;;  %310 = vst [vmem:[%s1057_s27 + $0x88] sm:$0xff] %v309_v17  ;;  %v311_v18 = vld [vmem:[%s1052_s26 + $0x120] sm:$0xff]  ;;  %v313_v19 = vld [vmem:[%s1052_s26 + $0x130] sm:$0xff] }
  0x19   : > { %v315_v20 = vld [vmem:[%s1052_s26 + $0x140] sm:$0xff]  ;;  %312 = vst [vmem:[%s1057_s27 + $0x90] sm:$0xff] %v311_v18  ;;  %314 = vst [vmem:[%s1057_s27 + $0x98] sm:$0xff] %v313_v19  ;;  %v317_v21 = vld [vmem:[%s1052_s26 + $0x150] sm:$0xff] }
  0x1a   : > { %316 = vst [vmem:[%s1057_s27 + $0xa0] sm:$0xff] %v315_v20  ;;  %v319_v22 = vld [vmem:[%s1052_s26 + $0x160] sm:$0xff]  ;;  %v321_v23 = vld [vmem:[%s1052_s26 + $0x170] sm:$0xff]  ;;  %318 = vst [vmem:[%s1057_s27 + $0xa8] sm:$0xff] %v317_v21 }
  0x1b   : > { %320 = vst [vmem:[%s1057_s27 + $0xb0] sm:$0xff] %v319_v22  ;;  %322 = vst [vmem:[%s1057_s27 + $0xb8] sm:$0xff] %v321_v23  ;;  %v323_v24 = vld [vmem:[%s1052_s26 + $0x180] sm:$0xff]  ;;  %v325_v25 = vld [vmem:[%s1052_s26 + $0x190] sm:$0xff] }
  0x1c   : > { %v327_v26 = vld [vmem:[%s1052_s26 + $0x1a0] sm:$0xff]  ;;  %324 = vst [vmem:[%s1057_s27 + $0xc0] sm:$0xff] %v323_v24  ;;  %326 = vst [vmem:[%s1057_s27 + $0xc8] sm:$0xff] %v325_v25  ;;  %v329_v27 = vld [vmem:[%s1052_s26 + $0x1b0] sm:$0xff] }
  0x1d   : > { %328 = vst [vmem:[%s1057_s27 + $0xd0] sm:$0xff] %v327_v26  ;;  %v331_v28 = vld [vmem:[%s1052_s26 + $0x1c0] sm:$0xff]  ;;  %v333_v29 = vld [vmem:[%s1052_s26 + $0x1d0] sm:$0xff]  ;;  %330 = vst [vmem:[%s1057_s27 + $0xd8] sm:$0xff] %v329_v27 }
  0x1e   : > { %332 = vst [vmem:[%s1057_s27 + $0xe0] sm:$0xff] %v331_v28  ;;  %334 = vst [vmem:[%s1057_s27 + $0xe8] sm:$0xff] %v333_v29  ;;  %v335_v30 = vld [vmem:[%s1052_s26 + $0x1e0] sm:$0xff]  ;;  %v337_v31 = vld [vmem:[%s1052_s26 + $0x1f0] sm:$0xff] }
  0x1f   : > { %336 = vst [vmem:[%s1057_s27 + $0xf0] sm:$0xff] %v335_v30  ;;  %338 = vst [vmem:[%s1057_s27 + $0xf8] sm:$0xff] %v337_v31 }
  0x20 PF: > { %p813_p6 = scmp.ge.s32.totalorder %s986_s16, 1  ;;  %p343_p7 = scmp.lt.s32.totalorder %s986_s16, 3 }
  0x22   : > { %p344_p8 = pnand %p813_p6, %p343_p7 }
  0x23   : > { %s350_s28 = sand.u32 (!%p344_p8), 1, %s970_s12   ;;  %s815_s8 = sshll.u32 (!%p344_p8), %s978_s14, 1 }
  0x24   : > { %347 = sbr.rel (%p344_p8) target bundleno = 309 (0x135), region = 66  ;;  %s814_s6 = sshll.u32 (!%p344_p8), %s350_s28, 8 }
  0x25   : > { %s1133_s7 = scalar_lea.vmem (!%p344_p8), [#allocation3], %s814_s6  ;;  %p401_p9 = scmp.lt.s32.totalorder (!%p344_p8), %s815_s8, 3 }
  0x29   : > { %v1126_v32 = vld [vmem:[%s1188_s0] sm:$0xff]  ;;  %v988_v35 = vmov 0   ;;  %v898_v36 = vld [vmem:[%s1133_s7 + $0x74] ss:$8 sps:$4 sm:$0xff]   ;;  %v900_v37 = vld [vmem:[%s1133_s7 + $0x70] ss:$8 sps:$4 sm:$0xff]  }
  0x2a   : > { %v666_v33 = vld [vmem:[%s1190_s2] sm:$0xff]  ;;  %v818_v34 = vcombine.high %v1126_v32, %v1126_v32  ;;  %897 = vset.pattern.permute.xlu0 %v988_v35  ;;  %616 = vmatprep.subr.bf16.mxu0 %v898_v36  ;;  %v904_v40 = vld [vmem:[%s1133_s7 + $0x54] ss:$8 sps:$4 sm:$0xff]   ;;  %v906_v41 = vld [vmem:[%s1133_s7 + $0x50] ss:$8 sps:$4 sm:$0xff]   ;;  %v817_v4 = vcombine.low %v1126_v32, %v1126_v32  ;;  %s1199_s8 = smov (!%p401_p9, %s815_s8), 3 }
  0x2b   : > { %669 = vperm.xlu0 %897, %v666_v33   ;;  %v901_v38 = vld [vmem:[%s1133_s7 + $0x64] ss:$8 sps:$4 sm:$0xff]   ;;  %617 = vmatpush1.bf16.msra.mxu0 %v900_v37  ;;  %v903_v39 = vld [vmem:[%s1133_s7 + $0x60] ss:$8 sps:$4 sm:$0xff]   ;;  %v910_v44 = vld [vmem:[%s1133_s7 + $0x34] ss:$8 sps:$4 sm:$0xff]  }
  0x2c   : > { %648 = vmatprep.mubr.bf16.mxu0 %v818_v34  ;;  %618 = vmatprep.subr.bf16.mxu0 %v901_v38  ;;  %v907_v42 = vld [vmem:[%s1133_s7 + $0x44] ss:$8 sps:$4 sm:$0xff]   ;;  %v909_v43 = vld [vmem:[%s1133_s7 + $0x40] ss:$8 sps:$4 sm:$0xff]   ;;  %v912_v45 = vld [vmem:[%s1133_s7 + $0x30] ss:$8 sps:$4 sm:$0xff]  }
  0x2d   : > { %v913_v46 = vld [vmem:[%s1133_s7 + $0x24] ss:$8 sps:$4 sm:$0xff]   ;;  %v915_v47 = vld [vmem:[%s1133_s7 + $0x20] ss:$8 sps:$4 sm:$0xff]   ;;  %v916_v48 = vld [vmem:[%s1133_s7 + $0x14] ss:$8 sps:$4 sm:$0xff]  }
  0x2e   : > { %v918_v49 = vld [vmem:[%s1133_s7 + $0x10] ss:$8 sps:$4 sm:$0xff]   ;;  %v919_v50 = vld [vmem:[%s1133_s7 + $0x4] ss:$8 sps:$4 sm:$0xff]   ;;  %v921_v51 = vld [vmem:[%s1133_s7] ss:$8 sps:$4 sm:$0xff]  }
  0x2f   : > { %619 = vmatpush1.bf16.msra.mxu0 %v903_v39  ;;  %v922_v52 = vld [vmem:[%s1133_s7 + $0xf4] ss:$8 sps:$4 sm:$0xff]   ;;  %v924_v53 = vld [vmem:[%s1133_s7 + $0xf0] ss:$8 sps:$4 sm:$0xff]   ;;  %v925_v54 = vld [vmem:[%s1133_s7 + $0xe4] ss:$8 sps:$4 sm:$0xff]  }
  0x30   : > { %620 = vmatprep.subr.bf16.mxu0 %v904_v40  ;;  %v927_v55 = vld [vmem:[%s1133_s7 + $0xe0] ss:$8 sps:$4 sm:$0xff]   ;;  %v928_v56 = vld [vmem:[%s1133_s7 + $0xd4] ss:$8 sps:$4 sm:$0xff]   ;;  %v930_v57 = vld [vmem:[%s1133_s7 + $0xd0] ss:$8 sps:$4 sm:$0xff]  }
  0x31   : > { %v931_v58 = vld [vmem:[%s1133_s7 + $0xc4] ss:$8 sps:$4 sm:$0xff]   ;;  %v933_v59 = vld [vmem:[%s1133_s7 + $0xc0] ss:$8 sps:$4 sm:$0xff]   ;;  %v934_v60 = vld [vmem:[%s1133_s7 + $0xb4] ss:$8 sps:$4 sm:$0xff]  }
  0x32   : > { %v936_v61 = vld [vmem:[%s1133_s7 + $0xb0] ss:$8 sps:$4 sm:$0xff]   ;;  %v937_v62 = vld [vmem:[%s1133_s7 + $0xa4] ss:$8 sps:$4 sm:$0xff]   ;;  %v939_v63 = vld [vmem:[%s1133_s7 + $0xa0] ss:$8 sps:$4 sm:$0xff]  }
  0x33   : > { %621 = vmatpush1.bf16.msra.mxu0 %v906_v41  ;;  %v940_v0 = vld [vmem:[%s1133_s7 + $0x94] ss:$8 sps:$4 sm:$0xff]   ;;  %v942_v1 = vld [vmem:[%s1133_s7 + $0x90] ss:$8 sps:$4 sm:$0xff]   ;;  %v943_v2 = vld [vmem:[%s1133_s7 + $0x84] ss:$8 sps:$4 sm:$0xff]  }
  0x34   : > { %622 = vmatprep.subr.bf16.mxu0 %v907_v42  ;;  %v945_v3 = vld [vmem:[%s1133_s7 + $0x80] ss:$8 sps:$4 sm:$0xff]   ;;  %s816_s9 = sshll.u32 %s1199_s8, 2 }
  0x35   : > { %s406_s12 = scalar_lea.vmem %s1191_s3, %s816_s9 }
  0x37   : > { %623 = vmatpush1.bf16.msra.mxu0 %v909_v43 }
  0x38   : > { %624 = vmatprep.subr.bf16.mxu0 %v910_v44 }
  0x3b   : > { %625 = vmatpush1.bf16.msra.mxu0 %v912_v45 }
  0x3c   : > { %626 = vmatprep.subr.bf16.mxu0 %v913_v46 }
  0x3f   : > { %627 = vmatpush1.bf16.msra.mxu0 %v915_v47 }
  0x40   : > { %628 = vmatprep.subr.bf16.mxu0 %v916_v48 }
  0x43   : > { %629 = vmatpush1.bf16.msra.mxu0 %v918_v49 }
  0x44   : > { %630 = vmatprep.subr.bf16.mxu0 %v919_v50 }
  0x47   : > { %631 = vmatpush1.bf16.msra.mxu0 %v921_v51 }
  0x48   : > { %632 = vmatprep.subr.bf16.mxu0 %v922_v52 }
  0x4b   : > { %633 = vmatpush2.bf16.msra.mxu0 %v924_v53 }
  0x4c   : > { %634 = vmatprep.subr.bf16.mxu0 %v925_v54 }
  0x4f   : > { %635 = vmatpush2.bf16.msra.mxu0 %v927_v55 }
  0x50   : > { %636 = vmatprep.subr.bf16.mxu0 %v928_v56 }
  0x53   : > { %637 = vmatpush2.bf16.msra.mxu0 %v930_v57 }
  0x54   : > { %638 = vmatprep.subr.bf16.mxu0 %v931_v58 }
  0x57   : > { %639 = vmatpush2.bf16.msra.mxu0 %v933_v59 }
  0x58   : > { %640 = vmatprep.subr.bf16.mxu0 %v934_v60 }
  0x5b   : > { %641 = vmatpush2.bf16.msra.mxu0 %v936_v61 }
  0x5c   : > { %642 = vmatprep.subr.bf16.mxu0 %v937_v62 }
  0x5f   : > { %643 = vmatpush2.bf16.msra.mxu0 %v939_v63 }
  0x60   : > { %644 = vmatprep.subr.bf16.mxu0 %v940_v0 }
  0x63   : > { %645 = vmatpush2.bf16.msra.mxu0 %v942_v1 }
  0x64   : > { %646 = vmatprep.subr.bf16.mxu0 %v943_v2 }
  0x67   : > { %647 = vmatpush2.bf16.msra.mxu0 %v945_v3 }
  0x6a   : > { %649 = vmatmul.mubr.bf16.vlgmr.msra.gmra.mxu0 %v817_v4 }
  0xa6   : > { %v670_v5 = vpop.permute.xlu0 %669 }
 0x12a   : > { %v650_v6 = vpop.f32.mrf.mxu0 }
 0x12b   : > { %v672_v7 = vadd.f32 %v670_v5, %v650_v6 }
 0x12c   : > { %v652_v8 = vpop.f32.mrf.mxu0 }
 0x12d   : > { %v676_v9 = vmul.f32 0.01, %v672_v7  ;;  %v673_v10 = vadd.f32 %v670_v5, %v652_v8  ;;  %vm674_vm0 = vcmp.ge.f32.partialorder %v672_v7, 0.0 }
 0x12e   : > { %v654_v11 = vpop.f32.mrf.mxu0 }
 0x12f   : > { %vm675_vm1 = vcmp.ge.f32.partialorder %v673_v10, 0.0  ;;  %v677_v12 = vmul.f32 0.01, %v673_v10  ;;  %v678_v14 = vsel %vm674_vm0, %v672_v7, %v676_v9 }
 0x130   : > { %v655_v13 = vpop.f32.mrf.mxu0 }
 0x131   : > { %v679_v15 = vsel %vm675_vm1, %v673_v10, %v677_v12 }
 0x132   : > { %v855_v16 = vpack.c.bf16 %v679_v15, %v678_v14 }
 0x134   : > { %688 = vst [vmem:[%s406_s12] sm:$0xff] %v855_v16 }
 0x135 PF: > { %s13_s16 = sadd.s32 1, %s986_s16   ;;  %s1192_s12 = smov %s974_s13 }
 0x136   : > { %p10_p10 = scmp.ge.s32.totalorder %s13_s16, 4   ;;  %s1193_s13 = smov %s1044_s20 }
 0x137   : > { %s1194_s14 = smov %s982_s15  ;;  %s1195_s15 = smov %s1197_s17 }
 0x138   :  { %12 = sbr.rel (!%p10_p10) target bundleno = 3 (0x3), region = 116 }

// kernel: hourglass_1_forward.17
= control target key start
LH: loop header
LB: loop body
LE: loop exit
PB: predicated region body
PF: predicated region fallthrough
CT: control target
= control target key end

     0   :  { %v316_v1 = vmov 0   ;;  %vm19_vm0 = vcmask 523264   ;;  %v317_v21 = vmov 0.0   ;;  %vm243_vm2 = vcmask 519168   ;;  %s404_s1 = inlined_call_operand.vmem [shape: bf16[1,256,64], index: 1, kind: input, shape index: {}]   ;;  %s405_s0 = inlined_call_operand.vmem [shape: bf16[1,16,256], index: 0, kind: input, shape index: {}]   ;;  %s406_s2 = inlined_call_operand.vmem [shape: f32[16,1], index: 2, kind: input, shape index: {}]   ;;  %s407_s3 = inlined_call_operand.vmem [shape: bf16[1,16,64], index: 3, kind: output, shape index: {}]  }
   0x1   :  { %v297_v0 = vld [vmem:[%s404_s1 + $0x78] sm:$0xff]   ;;  %296 = vset.pattern.permute.xlu0 %v316_v1  ;;  %v299_v3 = vld [vmem:[%s404_s1 + $0x70] sm:$0xff]   ;;  %v301_v5 = vld [vmem:[%s404_s1 + $0x68] sm:$0xff]   ;;  %20 = vst.msk [vmem:[#allocation2] sm:$0xff] %vm19_vm0, %v317_v21 }
   0x2   :  { %v298_v2 = vld [vmem:[%s404_s1 + $0x38] sm:$0xff]   ;;  %272 = vmatprep.subr.bf16.mxu0 %v297_v0  ;;  %v300_v4 = vld [vmem:[%s404_s1 + $0x30] sm:$0xff]   ;;  %v302_v6 = vld [vmem:[%s404_s1 + $0x28] sm:$0xff]   ;;  %21 = vst.msk [vmem:[#allocation2 + $0x8] sm:$0xff] %vm19_vm0, %v317_v21 }
   0x3   :  { %273 = vmatpush3.bf16.msra.mxu0 %v298_v2  ;;  %v303_v7 = vld [vmem:[%s404_s1 + $0x60] sm:$0xff]   ;;  %v305_v9 = vld [vmem:[%s404_s1 + $0x58] sm:$0xff]   ;;  %v307_v11 = vld [vmem:[%s404_s1 + $0x50] sm:$0xff]  }
   0x4   :  { %274 = vmatprep.subr.bf16.mxu0 %v299_v3  ;;  %v304_v8 = vld [vmem:[%s404_s1 + $0x20] sm:$0xff]   ;;  %v306_v10 = vld [vmem:[%s404_s1 + $0x18] sm:$0xff]   ;;  %v308_v14 = vld [vmem:[%s404_s1 + $0x10] sm:$0xff]  }
   0x5   :  { %v315_v12 = vld [vmem:[%s405_s0 + $0x4] ss:$8 sps:$4 sm:$0xff]   ;;  %v313_v20 = vld [vmem:[%s405_s0] ss:$8 sps:$4 sm:$0xff]  }
   0x6   :  { %v215_v13 = vld [vmem:[%s406_s2] sm:$0xff]  ;;  %196 = vmatprep.mubr.bf16.mxu0 %v315_v12  ;;  %v216_v15 = vld [vmem:[%s406_s2 + $0x8] sm:$0xff] }
   0x7   :  { %275 = vmatpush3.bf16.msra.mxu0 %v300_v4  ;;  %219 = vperm.xlu0 %296, %v215_v13   ;;  %v309_v16 = vld [vmem:[%s404_s1 + $0x48] sm:$0xff]   ;;  %v311_v18 = vld [vmem:[%s404_s1 + $0x40] sm:$0xff]  }
   0x8   :  { %276 = vmatprep.subr.bf16.mxu0 %v301_v5  ;;  %v310_v17 = vld [vmem:[%s404_s1 + $0x8] sm:$0xff]   ;;  %v312_v19 = vld [vmem:[%s404_s1] sm:$0xff]  }
   0x9   :  { %v22_v23 = vld [vmem:[#allocation2] sm:$0xff]  ;;  %v23_v28 = vld [vmem:[#allocation2 + $0x8] sm:$0xff] }
   0xb   :  { %277 = vmatpush3.bf16.msra.mxu0 %v302_v6  ;;  %224 = vperm.xlu0 %296, %v216_v15  }
   0xc   :  { %278 = vmatprep.subr.bf16.mxu0 %v303_v7 }
   0xf   :  { %279 = vmatpush3.bf16.msra.mxu0 %v304_v8 }
  0x10   :  { %280 = vmatprep.subr.bf16.mxu0 %v305_v9 }
  0x13   :  { %281 = vmatpush3.bf16.msra.mxu0 %v306_v10 }
  0x14   :  { %282 = vmatprep.subr.bf16.mxu0 %v307_v11 }
  0x17   :  { %283 = vmatpush3.bf16.msra.mxu0 %v308_v14 }
  0x18   :  { %284 = vmatprep.subr.bf16.mxu0 %v309_v16 }
  0x1b   :  { %285 = vmatpush3.bf16.msra.mxu0 %v310_v17 }
  0x1c   :  { %286 = vmatprep.subr.bf16.mxu0 %v311_v18 }
  0x1f   :  { %287 = vmatpush3.bf16.msra.mxu0 %v312_v19 }
  0x22   :  { %197 = vmatmul.mubr.bf16.vlgmr.msra.gmra.mxu0 %v313_v20 }
  0x82   :  { %v220_v32 = vpop.permute.xlu0 %219 }
  0x86   :  { %v225_v36 = vpop.permute.xlu0 %224 }
  0xe2   :  { %v288_v22 = vpop.f32.mrf.mxu0 }
  0xe4   :  { %v289_v24 = vpop.f32.mrf.mxu0 }
  0xe5   :  { %v290_v25 = vadd.f32 %v289_v24, %v288_v22 }
  0xe6   :  { %v291_v26 = vpop.f32.mrf.mxu0 }
  0xe7   :  { %v205_v27 = vadd.f32 %v290_v25, %v22_v23 }
  0xe8   :  { %v292_v29 = vpop.f32.mrf.mxu0 }
  0xe9   :  { %208 = vst.msk [vmem:[#allocation2] sm:$0xff] %vm19_vm0, %v205_v27  ;;  %v293_v30 = vadd.f32 %v292_v29, %v291_v26 }
  0xeb   :  { %v206_v31 = vadd.f32 %v293_v30, %v23_v28 }
  0xed   :  { %209 = vst.msk [vmem:[#allocation2 + $0x8] sm:$0xff] %vm19_vm0, %v206_v31 }
  0xf0   :  { %v213_v33 = vld [vmem:[#allocation2] sm:$0xff] }
  0xf1   :  { %v227_v34 = vadd.f32 %v220_v32, %v213_v33 }
  0xf3   :  { %vm229_vm1 = vcmp.ge.f32.partialorder %v227_v34, 0.0  ;;  %v231_v35 = vmul.f32 0.01, %v227_v34 }
  0xf4   :  { %v214_v37 = vld [vmem:[#allocation2 + $0x8] sm:$0xff] }
  0xf5   :  { %v233_v38 = vsel %vm229_vm1, %v227_v34, %v231_v35  ;;  %v228_v39 = vadd.f32 %v225_v36, %v214_v37 }
  0xf6   :  { %v270_v40 = vpack.c.bf16 %v233_v38, %v233_v38 }
  0xf7   :  { %vm230_vm3 = vcmp.ge.f32.partialorder %v228_v39, 0.0  ;;  %v232_v41 = vmul.f32 0.01, %v228_v39 }
  0xf8   :  { %244 = vst.msk [vmem:[%s407_s3] sm:$0xf] %vm243_vm2, %v270_v40 }
  0xf9   :  { %v234_v42 = vsel %vm230_vm3, %v228_v39, %v232_v41 }
  0xfa   :  { %v271_v43 = vpack.c.bf16 %v234_v42, %v234_v42 }
  0xfc   :  { %245 = vst.msk [vmem:[%s407_s3 + $0x4] sm:$0xf] %vm243_vm2, %v271_v43 }

// kernel: hourglass_1_forward.18
= control target key start
LH: loop header
LB: loop body
LE: loop exit
PB: predicated region body
PF: predicated region fallthrough
CT: control target
= control target key end

     0   :  { %v556_v1 = vmov 0   ;;  %vm19_vm0 = vcmask 523264   ;;  %v557_v39 = vmov 0.0   ;;  %vm424_vm2 = vcmask 519168   ;;  %s702_s1 = inlined_call_operand.vmem [shape: bf16[1,512,64], index: 1, kind: input, shape index: {}]   ;;  %s703_s0 = inlined_call_operand.vmem [shape: bf16[1,16,512], index: 0, kind: input, shape index: {}]   ;;  %s704_s2 = inlined_call_operand.vmem [shape: f32[16,1], index: 2, kind: input, shape index: {}]   ;;  %s705_s3 = inlined_call_operand.vmem [shape: bf16[1,16,64], index: 3, kind: output, shape index: {}]  }
   0x1   :  { %v518_v0 = vld [vmem:[%s702_s1 + $0x78] sm:$0xff]   ;;  %517 = vset.pattern.permute.xlu0 %v556_v1  ;;  %v522_v5 = vld [vmem:[%s702_s1 + $0x70] sm:$0xff]   ;;  %v526_v9 = vld [vmem:[%s702_s1 + $0x68] sm:$0xff]   ;;  %20 = vst.msk [vmem:[#allocation2] sm:$0xff] %vm19_vm0, %v557_v39 }
   0x2   :  { %v519_v2 = vld [vmem:[%s702_s1 + $0xf8] sm:$0xff]   ;;  %471 = vmatprep.subr.bf16.mxu0 %v518_v0  ;;  %v523_v6 = vld [vmem:[%s702_s1 + $0xf0] sm:$0xff]   ;;  %v527_v10 = vld [vmem:[%s702_s1 + $0xe8] sm:$0xff]   ;;  %21 = vst.msk [vmem:[#allocation2 + $0x8] sm:$0xff] %vm19_vm0, %v557_v39 }
   0x3   :  { %v520_v3 = vld [vmem:[%s702_s1 + $0x38] sm:$0xff]   ;;  %493 = vmatprep.subr.bf16.mxu1 %v519_v2  ;;  %v524_v7 = vld [vmem:[%s702_s1 + $0x30] sm:$0xff]   ;;  %v528_v11 = vld [vmem:[%s702_s1 + $0x28] sm:$0xff]  }
   0x4   :  { %v521_v4 = vld [vmem:[%s702_s1 + $0xb8] sm:$0xff]   ;;  %472 = vmatpush3.bf16.msra.mxu0 %v520_v3  ;;  %v525_v8 = vld [vmem:[%s702_s1 + $0xb0] sm:$0xff]   ;;  %v529_v12 = vld [vmem:[%s702_s1 + $0xa8] sm:$0xff]  }
   0x5   :  { %494 = vmatpush3.bf16.msra.mxu1 %v521_v4  ;;  %473 = vmatprep.subr.bf16.mxu0 %v522_v5  ;;  %v530_v13 = vld [vmem:[%s702_s1 + $0x60] sm:$0xff]   ;;  %v534_v17 = vld [vmem:[%s702_s1 + $0x58] sm:$0xff]   ;;  %v538_v21 = vld [vmem:[%s702_s1 + $0x50] sm:$0xff]  }
   0x6   :  { %495 = vmatprep.subr.bf16.mxu1 %v523_v6  ;;  %v531_v14 = vld [vmem:[%s702_s1 + $0xe0] sm:$0xff]   ;;  %v535_v18 = vld [vmem:[%s702_s1 + $0xd8] sm:$0xff]   ;;  %v539_v22 = vld [vmem:[%s702_s1 + $0xd0] sm:$0xff]  }
   0x7   :  { %v532_v15 = vld [vmem:[%s702_s1 + $0x20] sm:$0xff]   ;;  %v536_v19 = vld [vmem:[%s702_s1 + $0x18] sm:$0xff]   ;;  %v540_v23 = vld [vmem:[%s702_s1 + $0x10] sm:$0xff]  }
   0x8   :  { %474 = vmatpush3.bf16.msra.mxu0 %v524_v7  ;;  %v533_v16 = vld [vmem:[%s702_s1 + $0xa0] sm:$0xff]   ;;  %v537_v20 = vld [vmem:[%s702_s1 + $0x98] sm:$0xff]   ;;  %v541_v24 = vld [vmem:[%s702_s1 + $0x90] sm:$0xff]  }
   0x9   :  { %496 = vmatpush3.bf16.msra.mxu1 %v525_v8  ;;  %475 = vmatprep.subr.bf16.mxu0 %v526_v9  ;;  %v542_v25 = vld [vmem:[%s702_s1 + $0x48] sm:$0xff]   ;;  %v546_v29 = vld [vmem:[%s702_s1 + $0x40] sm:$0xff]  }
   0xa   :  { %497 = vmatprep.subr.bf16.mxu1 %v527_v10  ;;  %v543_v26 = vld [vmem:[%s702_s1 + $0xc8] sm:$0xff]   ;;  %v547_v30 = vld [vmem:[%s702_s1 + $0xc0] sm:$0xff]  }
   0xb   :  { %v544_v27 = vld [vmem:[%s702_s1 + $0x8] sm:$0xff]   ;;  %v548_v31 = vld [vmem:[%s702_s1] sm:$0xff]  }
   0xc   :  { %476 = vmatpush3.bf16.msra.mxu0 %v528_v11  ;;  %v545_v28 = vld [vmem:[%s702_s1 + $0x88] sm:$0xff]   ;;  %v549_v32 = vld [vmem:[%s702_s1 + $0x80] sm:$0xff]  }
   0xd   :  { %498 = vmatpush3.bf16.msra.mxu1 %v529_v12  ;;  %477 = vmatprep.subr.bf16.mxu0 %v530_v13  ;;  %v550_v33 = vld [vmem:[%s703_s0] ss:$16 sps:$4 sm:$0xff]   ;;  %v552_v34 = vld [vmem:[%s703_s0 + $0x4] ss:$16 sps:$4 sm:$0xff]   ;;  %v553_v35 = vld [vmem:[%s703_s0 + $0x8] ss:$16 sps:$4 sm:$0xff]  }
   0xe   :  { %499 = vmatprep.subr.bf16.mxu1 %v531_v14  ;;  %v555_v36 = vld [vmem:[%s703_s0 + $0xc] ss:$16 sps:$4 sm:$0xff]   ;;  %v396_v37 = vld [vmem:[%s704_s2] sm:$0xff]  ;;  %336 = vmatprep.mubr.bf16.mxu0 %v552_v34 }
   0xf   :  { %400 = vperm.xlu0 %517, %v396_v37   ;;  %377 = vmatprep.mubr.bf16.mxu1 %v555_v36  ;;  %v397_v38 = vld [vmem:[%s704_s2 + $0x8] sm:$0xff]  ;;  %v22_v47 = vld [vmem:[#allocation2] sm:$0xff] }
  0x10   :  { %478 = vmatpush3.bf16.msra.mxu0 %v532_v15  ;;  %v23_v55 = vld [vmem:[#allocation2 + $0x8] sm:$0xff] }
  0x11   :  { %500 = vmatpush3.bf16.msra.mxu1 %v533_v16  ;;  %479 = vmatprep.subr.bf16.mxu0 %v534_v17 }
  0x12   :  { %501 = vmatprep.subr.bf16.mxu1 %v535_v18 }
  0x13   :  { %405 = vperm.xlu0 %517, %v397_v38  }
  0x14   :  { %480 = vmatpush3.bf16.msra.mxu0 %v536_v19 }
  0x15   :  { %502 = vmatpush3.bf16.msra.mxu1 %v537_v20  ;;  %481 = vmatprep.subr.bf16.mxu0 %v538_v21 }
  0x16   :  { %503 = vmatprep.subr.bf16.mxu1 %v539_v22 }
  0x18   :  { %482 = vmatpush3.bf16.msra.mxu0 %v540_v23 }
  0x19   :  { %504 = vmatpush3.bf16.msra.mxu1 %v541_v24  ;;  %483 = vmatprep.subr.bf16.mxu0 %v542_v25 }
  0x1a   :  { %505 = vmatprep.subr.bf16.mxu1 %v543_v26 }
  0x1c   :  { %484 = vmatpush3.bf16.msra.mxu0 %v544_v27 }
  0x1d   :  { %506 = vmatpush3.bf16.msra.mxu1 %v545_v28  ;;  %485 = vmatprep.subr.bf16.mxu0 %v546_v29 }
  0x1e   :  { %507 = vmatprep.subr.bf16.mxu1 %v547_v30 }
  0x20   :  { %486 = vmatpush3.bf16.msra.mxu0 %v548_v31 }
  0x21   :  { %508 = vmatpush3.bf16.msra.mxu1 %v549_v32 }
  0x23   :  { %337 = vmatmul.mubr.bf16.vlgmr.msra.gmra.mxu0 %v550_v33 }
  0x24   :  { %378 = vmatmul.mubr.bf16.vlgmr.msra.gmra.mxu1 %v553_v35 }
  0x8a   :  { %v401_v58 = vpop.permute.xlu0 %400 }
  0x8e   :  { %v406_v62 = vpop.permute.xlu0 %405 }
  0xe3   :  { %v487_v40 = vpop.f32.mrf.mxu0 }
  0xe4   :  { %v509_v41 = vpop.f32.mrf.mxu1 }
  0xe5   :  { %v488_v42 = vpop.f32.mrf.mxu0 }
  0xe6   :  { %v489_v43 = vadd.f32 %v488_v42, %v487_v40  ;;  %v510_v44 = vpop.f32.mrf.mxu1 }
  0xe7   :  { %v511_v45 = vadd.f32 %v510_v44, %v509_v41  ;;  %v490_v46 = vpop.f32.mrf.mxu0 }
  0xe8   :  { %v512_v48 = vpop.f32.mrf.mxu1 }
  0xe9   :  { %v380_v49 = vadd.f32 %v511_v45, %v489_v43  ;;  %v491_v50 = vpop.f32.mrf.mxu0 }
  0xea   :  { %v492_v51 = vadd.f32 %v491_v50, %v490_v46  ;;  %v513_v52 = vpop.f32.mrf.mxu1 }
  0xeb   :  { %v386_v53 = vadd.f32 %v380_v49, %v22_v47  ;;  %v514_v54 = vadd.f32 %v513_v52, %v512_v48 }
  0xed   :  { %389 = vst.msk [vmem:[#allocation2] sm:$0xff] %vm19_vm0, %v386_v53  ;;  %v383_v56 = vadd.f32 %v514_v54, %v492_v51 }
  0xef   :  { %v387_v57 = vadd.f32 %v383_v56, %v23_v55 }
  0xf1   :  { %390 = vst.msk [vmem:[#allocation2 + $0x8] sm:$0xff] %vm19_vm0, %v387_v57 }
  0xf4   :  { %v394_v59 = vld [vmem:[#allocation2] sm:$0xff] }
  0xf5   :  { %v408_v60 = vadd.f32 %v401_v58, %v394_v59 }
  0xf7   :  { %vm410_vm1 = vcmp.ge.f32.partialorder %v408_v60, 0.0  ;;  %v412_v61 = vmul.f32 0.01, %v408_v60 }
  0xf8   :  { %v395_v63 = vld [vmem:[#allocation2 + $0x8] sm:$0xff] }
  0xf9   :  { %v414_v0 = vsel %vm410_vm1, %v408_v60, %v412_v61  ;;  %v409_v1 = vadd.f32 %v406_v62, %v395_v63 }
  0xfa   :  { %v469_v2 = vpack.c.bf16 %v414_v0, %v414_v0 }
  0xfb   :  { %vm411_vm3 = vcmp.ge.f32.partialorder %v409_v1, 0.0  ;;  %v413_v3 = vmul.f32 0.01, %v409_v1 }
  0xfc   :  { %425 = vst.msk [vmem:[%s705_s3] sm:$0xf] %vm424_vm2, %v469_v2 }
  0xfd   :  { %v415_v4 = vsel %vm411_vm3, %v409_v1, %v413_v3 }
  0xfe   :  { %v470_v5 = vpack.c.bf16 %v415_v4, %v415_v4 }
 0x100   :  { %426 = vst.msk [vmem:[%s705_s3 + $0x4] sm:$0xf] %vm424_vm2, %v470_v5 }

// kernel: hourglass_1_forward.19
= control target key start
LH: loop header
LB: loop body
LE: loop exit
PB: predicated region body
PF: predicated region fallthrough
CT: control target
= control target key end

     0   :  { %v630_v1 = vmov 0   ;;  %vm19_vm0 = vcmask 64512   ;;  %v631_v46 = vmov 0.0   ;;  %vm474_vm2 = vcmask 60416   ;;  %s793_s1 = inlined_call_operand.vmem [shape: bf16[1,512,8], index: 1, kind: input, shape index: {}]   ;;  %s794_s0 = inlined_call_operand.vmem [shape: bf16[1,24,512], index: 0, kind: input, shape index: {}]   ;;  %s795_s2 = inlined_call_operand.vmem [shape: f32[24,1], index: 2, kind: input, shape index: {}]   ;;  %s796_s3 = inlined_call_operand.vmem [shape: bf16[1,24,8], index: 3, kind: output, shape index: {}]  }
   0x1   :  { %v588_v0 = vld [vmem:[%s793_s1 + $0x78] sm:$0xff]   ;;  %586 = vset.pattern.permute.xlu0 %v630_v1  ;;  %587 = vset.pattern.permute.xlu1 %v630_v1  ;;  %v592_v5 = vld [vmem:[%s793_s1 + $0x70] sm:$0xff]   ;;  %v596_v9 = vld [vmem:[%s793_s1 + $0x68] sm:$0xff]   ;;  %20 = vst.msk [vmem:[#allocation2] sm:$0xff] %vm19_vm0, %v631_v46 }
   0x2   :  { %v589_v2 = vld [vmem:[%s793_s1 + $0xf8] sm:$0xff]   ;;  %528 = vmatprep.subr.bf16.mxu0 %v588_v0  ;;  %v593_v6 = vld [vmem:[%s793_s1 + $0xf0] sm:$0xff]   ;;  %v597_v10 = vld [vmem:[%s793_s1 + $0xe8] sm:$0xff]   ;;  %21 = vst.msk [vmem:[#allocation2 + $0x8] sm:$0xff] %vm19_vm0, %v631_v46 }
   0x3   :  { %v590_v3 = vld [vmem:[%s793_s1 + $0x38] sm:$0xff]   ;;  %556 = vmatprep.subr.bf16.mxu1 %v589_v2  ;;  %v594_v7 = vld [vmem:[%s793_s1 + $0x30] sm:$0xff]   ;;  %v598_v11 = vld [vmem:[%s793_s1 + $0x28] sm:$0xff]   ;;  %22 = vst.msk [vmem:[#allocation2 + $0x10] sm:$0xff] %vm19_vm0, %v631_v46 }
   0x4   :  { %v591_v4 = vld [vmem:[%s793_s1 + $0xb8] sm:$0xff]   ;;  %529 = vmatpush3.bf16.msra.mxu0 %v590_v3  ;;  %v595_v8 = vld [vmem:[%s793_s1 + $0xb0] sm:$0xff]   ;;  %v599_v12 = vld [vmem:[%s793_s1 + $0xa8] sm:$0xff]  }
   0x5   :  { %557 = vmatpush3.bf16.msra.mxu1 %v591_v4  ;;  %530 = vmatprep.subr.bf16.mxu0 %v592_v5  ;;  %v600_v13 = vld [vmem:[%s793_s1 + $0x60] sm:$0xff]   ;;  %v604_v17 = vld [vmem:[%s793_s1 + $0x58] sm:$0xff]   ;;  %v608_v21 = vld [vmem:[%s793_s1 + $0x50] sm:$0xff]  }
   0x6   :  { %558 = vmatprep.subr.bf16.mxu1 %v593_v6  ;;  %v601_v14 = vld [vmem:[%s793_s1 + $0xe0] sm:$0xff]   ;;  %v605_v18 = vld [vmem:[%s793_s1 + $0xd8] sm:$0xff]   ;;  %v609_v22 = vld [vmem:[%s793_s1 + $0xd0] sm:$0xff]  }
   0x7   :  { %v602_v15 = vld [vmem:[%s793_s1 + $0x20] sm:$0xff]   ;;  %v606_v19 = vld [vmem:[%s793_s1 + $0x18] sm:$0xff]   ;;  %v610_v23 = vld [vmem:[%s793_s1 + $0x10] sm:$0xff]  }
   0x8   :  { %531 = vmatpush3.bf16.msra.mxu0 %v594_v7  ;;  %v603_v16 = vld [vmem:[%s793_s1 + $0xa0] sm:$0xff]   ;;  %v607_v20 = vld [vmem:[%s793_s1 + $0x98] sm:$0xff]   ;;  %v611_v24 = vld [vmem:[%s793_s1 + $0x90] sm:$0xff]  }
   0x9   :  { %559 = vmatpush3.bf16.msra.mxu1 %v595_v8  ;;  %532 = vmatprep.subr.bf16.mxu0 %v596_v9  ;;  %v612_v25 = vld [vmem:[%s793_s1 + $0x48] sm:$0xff]   ;;  %v616_v29 = vld [vmem:[%s793_s1 + $0x40] sm:$0xff]   ;;  %v433_v42 = vld [vmem:[%s795_s2 + $0x10] sm:$0xff] }
   0xa   :  { %560 = vmatprep.subr.bf16.mxu1 %v597_v10  ;;  %v613_v26 = vld [vmem:[%s793_s1 + $0xc8] sm:$0xff]   ;;  %v617_v30 = vld [vmem:[%s793_s1 + $0xc0] sm:$0xff]   ;;  %446 = vperm.xlu1 %587, %v433_v42   ;;  %v25_v8 = vld [vmem:[#allocation2 + $0x10] sm:$0xff] }
   0xb   :  { %v614_v27 = vld [vmem:[%s793_s1 + $0x8] sm:$0xff]   ;;  %v618_v31 = vld [vmem:[%s793_s1] sm:$0xff]  }
   0xc   :  { %533 = vmatpush3.bf16.msra.mxu0 %v598_v11  ;;  %v615_v28 = vld [vmem:[%s793_s1 + $0x88] sm:$0xff]   ;;  %v619_v32 = vld [vmem:[%s793_s1 + $0x80] sm:$0xff]  }
   0xd   :  { %561 = vmatpush3.bf16.msra.mxu1 %v599_v12  ;;  %534 = vmatprep.subr.bf16.mxu0 %v600_v13  ;;  %v620_v33 = vld [vmem:[%s794_s0] ss:$16 sps:$4 sm:$0xff]   ;;  %v622_v34 = vld [vmem:[%s794_s0 + $0x4] ss:$16 sps:$4 sm:$0xff]   ;;  %v623_v35 = vld [vmem:[%s794_s0 + $0x8] ss:$16 sps:$4 sm:$0xff]  }
   0xe   :  { %562 = vmatprep.subr.bf16.mxu1 %v601_v14  ;;  %v625_v36 = vld [vmem:[%s794_s0 + $0xc] ss:$16 sps:$4 sm:$0xff]   ;;  %v30_v37 = vld [vmem:[%s794_s0 + $0x20] sm:$0xff]  ;;  %354 = vmatprep.mubr.bf16.mxu0 %v622_v34 }
   0xf   :  { %v487_v38 = vcombine.high %v30_v37, %v30_v37  ;;  %v31_v39 = vld [vmem:[%s794_s0 + $0x28] sm:$0xff]  ;;  %v431_v40 = vld [vmem:[%s795_s2] sm:$0xff]  ;;  %402 = vmatprep.mubr.bf16.mxu1 %v625_v36  ;;  %v486_v44 = vcombine.low %v30_v37, %v30_v37 }
  0x10   :  { %535 = vmatpush3.bf16.msra.mxu0 %v602_v15  ;;  %v489_v41 = vcombine.high %v31_v39, %v31_v39  ;;  %436 = vperm.xlu0 %586, %v431_v40   ;;  %v432_v43 = vld [vmem:[%s795_s2 + $0x8] sm:$0xff]  ;;  %v488_v45 = vcombine.low %v31_v39, %v31_v39  ;;  %v23_v54 = vld [vmem:[#allocation2] sm:$0xff] }
  0x11   :  { %563 = vmatpush3.bf16.msra.mxu1 %v603_v16  ;;  %536 = vmatprep.subr.bf16.mxu0 %v604_v17  ;;  %v24_v63 = vld [vmem:[#allocation2 + $0x8] sm:$0xff] }
  0x12   :  { %564 = vmatprep.subr.bf16.mxu1 %v605_v18 }
  0x14   :  { %537 = vmatpush3.bf16.msra.mxu0 %v606_v19  ;;  %441 = vperm.xlu0 %586, %v432_v43  }
  0x15   :  { %565 = vmatpush3.bf16.msra.mxu1 %v607_v20  ;;  %538 = vmatprep.subr.bf16.mxu0 %v608_v21 }
  0x16   :  { %566 = vmatprep.subr.bf16.mxu1 %v609_v22 }
  0x18   :  { %539 = vmatpush3.bf16.msra.mxu0 %v610_v23 }
  0x19   :  { %567 = vmatpush3.bf16.msra.mxu1 %v611_v24  ;;  %540 = vmatprep.subr.bf16.mxu0 %v612_v25 }
  0x1a   :  { %568 = vmatprep.subr.bf16.mxu1 %v613_v26 }
  0x1c   :  { %541 = vmatpush3.bf16.msra.mxu0 %v614_v27 }
  0x1d   :  { %569 = vmatpush3.bf16.msra.mxu1 %v615_v28  ;;  %542 = vmatprep.subr.bf16.mxu0 %v616_v29 }
  0x1e   :  { %570 = vmatprep.subr.bf16.mxu1 %v617_v30 }
  0x20   :  { %543 = vmatpush3.bf16.msra.mxu0 %v618_v31 }
  0x21   :  { %571 = vmatpush3.bf16.msra.mxu1 %v619_v32 }
  0x23   :  { %355 = vmatmul.mubr.bf16.vlgmr.msra.gmra.mxu0 %v620_v33 }
  0x24   :  { %403 = vmatmul.mubr.bf16.vlgmr.msra.gmra.mxu1 %v623_v35  ;;  %362 = vmatprep.mubr.bf16.mxu0 %v487_v38 }
  0x25   :  { %410 = vmatprep.mubr.bf16.mxu1 %v489_v41 }
  0x2b   :  { %363 = vmatmul.mubr.bf16.gmra.mxu0 %v486_v44 }
  0x2c   :  { %411 = vmatmul.mubr.bf16.gmra.mxu1 %v488_v45 }
  0x85   :  { %v447_v23 = vpop.permute.xlu1 %446 }
  0x8b   :  { %v437_v10 = vpop.permute.xlu0 %436 }
  0x8f   :  { %v442_v17 = vpop.permute.xlu0 %441 }
  0xe3   :  { %v544_v47 = vpop.f32.mrf.mxu0 }
  0xe4   :  { %v572_v48 = vpop.f32.mrf.mxu1 }
  0xe5   :  { %v545_v49 = vpop.f32.mrf.mxu0 }
  0xe6   :  { %v546_v50 = vadd.f32 %v545_v49, %v544_v47  ;;  %v573_v51 = vpop.f32.mrf.mxu1 }
  0xe7   :  { %v574_v52 = vadd.f32 %v573_v51, %v572_v48  ;;  %v547_v53 = vpop.f32.mrf.mxu0 }
  0xe8   :  { %v575_v55 = vpop.f32.mrf.mxu1 }
  0xe9   :  { %v405_v56 = vadd.f32 %v574_v52, %v546_v50  ;;  %v548_v57 = vpop.f32.mrf.mxu0 }
  0xea   :  { %v549_v58 = vadd.f32 %v548_v57, %v547_v53  ;;  %v576_v59 = vpop.f32.mrf.mxu1 }
  0xeb   :  { %v418_v60 = vadd.f32 %v405_v56, %v23_v54  ;;  %v577_v61 = vadd.f32 %v576_v59, %v575_v55  ;;  %v550_v62 = vpop.f32.mrf.mxu0 }
  0xec   :  { %v578_v0 = vpop.f32.mrf.mxu1 }
  0xed   :  { %422 = vst.msk [vmem:[#allocation2] sm:$0xff] %vm19_vm0, %v418_v60  ;;  %v408_v1 = vadd.f32 %v577_v61, %v549_v58  ;;  %v551_v2 = vpop.f32.mrf.mxu0 }
  0xee   :  { %v552_v3 = vadd.f32 %v551_v2, %v550_v62  ;;  %v579_v4 = vpop.f32.mrf.mxu1 }
  0xef   :  { %v419_v5 = vadd.f32 %v408_v1, %v24_v63  ;;  %v580_v6 = vadd.f32 %v579_v4, %v578_v0  ;;  %v553_v7 = vpop.f32.mrf.mxu0 }
  0xf0   :  { %v581_v9 = vpop.f32.mrf.mxu1 }
  0xf1   :  { %423 = vst.msk [vmem:[#allocation2 + $0x8] sm:$0xff] %vm19_vm0, %v419_v5  ;;  %v413_v11 = vadd.f32 %v580_v6, %v552_v3  ;;  %v554_v12 = vpop.f32.mrf.mxu0 }
  0xf2   :  { %v582_v13 = vpop.f32.mrf.mxu1 }
  0xf3   :  { %v420_v14 = vadd.f32 %v413_v11, %v25_v8 }
  0xf4   :  { %v428_v15 = vld [vmem:[#allocation2] sm:$0xff] }
  0xf5   :  { %424 = vst.msk [vmem:[#allocation2 + $0x10] sm:$0xff] %vm19_vm0, %v420_v14  ;;  %v449_v16 = vadd.f32 %v437_v10, %v428_v15 }
  0xf7   :  { %vm452_vm1 = vcmp.ge.f32.partialorder %v449_v16, 0.0  ;;  %v455_v18 = vmul.f32 0.01, %v449_v16 }
  0xf8   :  { %v429_v19 = vld [vmem:[#allocation2 + $0x8] sm:$0xff] }
  0xf9   :  { %v458_v20 = vsel %vm452_vm1, %v449_v16, %v455_v18  ;;  %v450_v21 = vadd.f32 %v442_v17, %v429_v19 }
  0xfa   :  { %v525_v22 = vpack.c.bf16 %v458_v20, %v458_v20 }
  0xfb   :  { %vm453_vm3 = vcmp.ge.f32.partialorder %v450_v21, 0.0  ;;  %v456_v24 = vmul.f32 0.01, %v450_v21 }
  0xfc   :  { %475 = vst.msk [vmem:[%s796_s3] sm:$0xf] %vm474_vm2, %v525_v22  ;;  %v430_v25 = vld [vmem:[#allocation2 + $0x10] sm:$0xff] }
  0xfd   :  { %v459_v26 = vsel %vm453_vm3, %v450_v21, %v456_v24  ;;  %v451_v27 = vadd.f32 %v447_v23, %v430_v25 }
  0xfe   :  { %v526_v28 = vpack.c.bf16 %v459_v26, %v459_v26 }
  0xff   :  { %vm454_vm4 = vcmp.ge.f32.partialorder %v451_v27, 0.0  ;;  %v457_v29 = vmul.f32 0.01, %v451_v27 }
 0x100   :  { %476 = vst.msk [vmem:[%s796_s3 + $0x4] sm:$0xf] %vm474_vm2, %v526_v28 }
 0x101   :  { %v460_v30 = vsel %vm454_vm4, %v451_v27, %v457_v29 }
 0x102   :  { %v527_v31 = vpack.c.bf16 %v460_v30, %v460_v30 }
 0x104   :  { %477 = vst.msk [vmem:[%s796_s3 + $0x8] sm:$0xf] %vm474_vm2, %v527_v31 }

// kernel: hourglass_1_forward.20
= control target key start
LH: loop header
LB: loop body
LE: loop exit
PB: predicated region body
PF: predicated region fallthrough
CT: control target
= control target key end

     0   :  { %v891_v1 = vmov 0   ;;  %vm19_vm0 = vcmask 64512   ;;  %s1111_s1 = inlined_call_operand.vmem [shape: bf16[1,768,8], index: 1, kind: input, shape index: {}]   ;;  %s1112_s0 = inlined_call_operand.vmem [shape: bf16[1,24,768], index: 0, kind: input, shape index: {}]   ;;  %s1113_s2 = inlined_call_operand.vmem [shape: f32[24,1], index: 2, kind: input, shape index: {}]   ;;  %s1114_s3 = inlined_call_operand.vmem [shape: f32[1,24,8], index: 3, kind: output, shape index: {}]  }
   0x1   :  { %v828_v0 = vld [vmem:[%s1111_s1 + $0x78] sm:$0xff]   ;;  %826 = vset.pattern.permute.xlu0 %v891_v1  ;;  %827 = vset.pattern.permute.xlu1 %v891_v1  ;;  %v832_v5 = vld [vmem:[%s1111_s1 + $0x70] sm:$0xff]   ;;  %v836_v9 = vld [vmem:[%s1111_s1 + $0x68] sm:$0xff]  }
   0x2   :  { %v829_v2 = vld [vmem:[%s1111_s1 + $0xf8] sm:$0xff]   ;;  %724 = vmatprep.subr.bf16.mxu0 %v828_v0  ;;  %v833_v6 = vld [vmem:[%s1111_s1 + $0xf0] sm:$0xff]   ;;  %v837_v10 = vld [vmem:[%s1111_s1 + $0xe8] sm:$0xff]  }
   0x3   :  { %v830_v3 = vld [vmem:[%s1111_s1 + $0x38] sm:$0xff]   ;;  %752 = vmatprep.subr.bf16.mxu1 %v829_v2  ;;  %v834_v7 = vld [vmem:[%s1111_s1 + $0x30] sm:$0xff]   ;;  %v838_v11 = vld [vmem:[%s1111_s1 + $0x28] sm:$0xff]  }
   0x4   :  { %v831_v4 = vld [vmem:[%s1111_s1 + $0xb8] sm:$0xff]   ;;  %725 = vmatpush3.bf16.msra.mxu0 %v830_v3  ;;  %v835_v8 = vld [vmem:[%s1111_s1 + $0xb0] sm:$0xff]   ;;  %v839_v12 = vld [vmem:[%s1111_s1 + $0xa8] sm:$0xff]   ;;  %v892_v3 = vmov 0.0  }
   0x5   :  { %753 = vmatpush3.bf16.msra.mxu1 %v831_v4  ;;  %726 = vmatprep.subr.bf16.mxu0 %v832_v5  ;;  %v840_v13 = vld [vmem:[%s1111_s1 + $0x60] sm:$0xff]   ;;  %v844_v17 = vld [vmem:[%s1111_s1 + $0x58] sm:$0xff]   ;;  %v848_v21 = vld [vmem:[%s1111_s1 + $0x50] sm:$0xff]   ;;  %20 = vst.msk [vmem:[#allocation2] sm:$0xff] %vm19_vm0, %v892_v3 }
   0x6   :  { %754 = vmatprep.subr.bf16.mxu1 %v833_v6  ;;  %v841_v14 = vld [vmem:[%s1111_s1 + $0xe0] sm:$0xff]   ;;  %v845_v18 = vld [vmem:[%s1111_s1 + $0xd8] sm:$0xff]   ;;  %v849_v22 = vld [vmem:[%s1111_s1 + $0xd0] sm:$0xff]   ;;  %21 = vst.msk [vmem:[#allocation2 + $0x8] sm:$0xff] %vm19_vm0, %v892_v3 }
   0x7   :  { %v842_v15 = vld [vmem:[%s1111_s1 + $0x20] sm:$0xff]   ;;  %v846_v19 = vld [vmem:[%s1111_s1 + $0x18] sm:$0xff]   ;;  %v850_v23 = vld [vmem:[%s1111_s1 + $0x10] sm:$0xff]   ;;  %22 = vst.msk [vmem:[#allocation2 + $0x10] sm:$0xff] %vm19_vm0, %v892_v3 }
   0x8   :  { %727 = vmatpush3.bf16.msra.mxu0 %v834_v7  ;;  %v843_v16 = vld [vmem:[%s1111_s1 + $0xa0] sm:$0xff]   ;;  %v847_v20 = vld [vmem:[%s1111_s1 + $0x98] sm:$0xff]   ;;  %v851_v24 = vld [vmem:[%s1111_s1 + $0x90] sm:$0xff]  }
   0x9   :  { %755 = vmatpush3.bf16.msra.mxu1 %v835_v8  ;;  %728 = vmatprep.subr.bf16.mxu0 %v836_v9  ;;  %v852_v25 = vld [vmem:[%s1111_s1 + $0x48] sm:$0xff]   ;;  %v856_v29 = vld [vmem:[%s1111_s1 + $0x40] sm:$0xff]   ;;  %v866_v37 = vld [vmem:[%s1111_s1 + $0x178] sm:$0xff]  }
   0xa   :  { %756 = vmatprep.subr.bf16.mxu1 %v837_v10  ;;  %v853_v26 = vld [vmem:[%s1111_s1 + $0xc8] sm:$0xff]   ;;  %v857_v30 = vld [vmem:[%s1111_s1 + $0xc0] sm:$0xff]   ;;  %v867_v38 = vld [vmem:[%s1111_s1 + $0x138] sm:$0xff]  }
   0xb   :  { %v854_v27 = vld [vmem:[%s1111_s1 + $0x8] sm:$0xff]   ;;  %v858_v31 = vld [vmem:[%s1111_s1] sm:$0xff]   ;;  %v868_v39 = vld [vmem:[%s1111_s1 + $0x170] sm:$0xff]  }
   0xc   :  { %729 = vmatpush3.bf16.msra.mxu0 %v838_v11  ;;  %v855_v28 = vld [vmem:[%s1111_s1 + $0x88] sm:$0xff]   ;;  %v859_v32 = vld [vmem:[%s1111_s1 + $0x80] sm:$0xff]   ;;  %v869_v40 = vld [vmem:[%s1111_s1 + $0x130] sm:$0xff]  }
   0xd   :  { %757 = vmatpush3.bf16.msra.mxu1 %v839_v12  ;;  %730 = vmatprep.subr.bf16.mxu0 %v840_v13  ;;  %v860_v33 = vld [vmem:[%s1112_s0] ss:$24 sps:$4 sm:$0xff]   ;;  %v862_v34 = vld [vmem:[%s1112_s0 + $0x4] ss:$24 sps:$4 sm:$0xff]   ;;  %v870_v41 = vld [vmem:[%s1111_s1 + $0x168] sm:$0xff]  }
   0xe   :  { %758 = vmatprep.subr.bf16.mxu1 %v841_v14  ;;  %v863_v35 = vld [vmem:[%s1112_s0 + $0x8] ss:$24 sps:$4 sm:$0xff]   ;;  %v865_v36 = vld [vmem:[%s1112_s0 + $0xc] ss:$24 sps:$4 sm:$0xff]   ;;  %502 = vmatprep.mubr.bf16.mxu0 %v862_v34  ;;  %v32_v44 = vld [vmem:[%s1112_s0 + $0x30] sm:$0xff] }
   0xf   :  { %550 = vmatprep.mubr.bf16.mxu1 %v865_v36  ;;  %v871_v42 = vld [vmem:[%s1111_s1 + $0x128] sm:$0xff]   ;;  %v872_v43 = vld [vmem:[%s1111_s1 + $0x160] sm:$0xff]   ;;  %v671_v45 = vcombine.high %v32_v44, %v32_v44  ;;  %v670_v46 = vcombine.low %v32_v44, %v32_v44  ;;  %v33_v48 = vld [vmem:[%s1112_s0 + $0x38] sm:$0xff] }
  0x10   :  { %731 = vmatpush3.bf16.msra.mxu0 %v842_v15  ;;  %v873_v47 = vld [vmem:[%s1111_s1 + $0x120] sm:$0xff]   ;;  %v874_v49 = vld [vmem:[%s1111_s1 + $0x158] sm:$0xff]   ;;  %v673_v50 = vcombine.high %v33_v48, %v33_v48  ;;  %v672_v51 = vcombine.low %v33_v48, %v33_v48  ;;  %v878_v53 = vld [vmem:[%s1111_s1 + $0x150] sm:$0xff]  }
  0x11   :  { %759 = vmatpush3.bf16.msra.mxu1 %v843_v16  ;;  %732 = vmatprep.subr.bf16.mxu0 %v844_v17  ;;  %v876_v52 = vld [vmem:[%s1111_s1 + $0x118] sm:$0xff]   ;;  %v888_v54 = vld [vmem:[%s1112_s0 + $0x14] ss:$24 sps:$4 sm:$0xff]   ;;  %v34_v55 = vld [vmem:[%s1112_s0 + $0x40] sm:$0xff] }
  0x12   :  { %760 = vmatprep.subr.bf16.mxu1 %v845_v18  ;;  %v675_v56 = vcombine.high %v34_v55, %v34_v55  ;;  %v880_v57 = vld [vmem:[%s1111_s1 + $0x110] sm:$0xff]   ;;  %v627_v58 = vld [vmem:[%s1113_s2] sm:$0xff]  ;;  %v882_v60 = vld [vmem:[%s1111_s1 + $0x148] sm:$0xff]   ;;  %v674_v2 = vcombine.low %v34_v55, %v34_v55 }
  0x13   :  { %v629_v59 = vld [vmem:[%s1113_s2 + $0x10] sm:$0xff]  ;;  %632 = vperm.xlu0 %826, %v627_v58   ;;  %v883_v61 = vld [vmem:[%s1111_s1 + $0x108] sm:$0xff]   ;;  %v884_v63 = vld [vmem:[%s1111_s1 + $0x140] sm:$0xff]  }
  0x14   :  { %733 = vmatpush3.bf16.msra.mxu0 %v846_v19  ;;  %642 = vperm.xlu1 %827, %v629_v59   ;;  %v628_v62 = vld [vmem:[%s1113_s2 + $0x8] sm:$0xff]  ;;  %v885_v0 = vld [vmem:[%s1111_s1 + $0x100] sm:$0xff]  }
  0x15   :  { %761 = vmatpush3.bf16.msra.mxu1 %v847_v20  ;;  %734 = vmatprep.subr.bf16.mxu0 %v848_v21  ;;  %v886_v1 = vld [vmem:[%s1112_s0 + $0x10] ss:$24 sps:$4 sm:$0xff]  }
  0x16   :  { %762 = vmatprep.subr.bf16.mxu1 %v849_v22 }
  0x17   :  { %637 = vperm.xlu0 %826, %v628_v62  }
  0x18   :  { %735 = vmatpush3.bf16.msra.mxu0 %v850_v23 }
  0x19   :  { %763 = vmatpush3.bf16.msra.mxu1 %v851_v24  ;;  %736 = vmatprep.subr.bf16.mxu0 %v852_v25 }
  0x1a   :  { %764 = vmatprep.subr.bf16.mxu1 %v853_v26 }
  0x1c   :  { %737 = vmatpush3.bf16.msra.mxu0 %v854_v27 }
  0x1d   :  { %765 = vmatpush3.bf16.msra.mxu1 %v855_v28  ;;  %738 = vmatprep.subr.bf16.mxu0 %v856_v29 }
  0x1e   :  { %766 = vmatprep.subr.bf16.mxu1 %v857_v30 }
  0x20   :  { %739 = vmatpush3.bf16.msra.mxu0 %v858_v31 }
  0x21   :  { %767 = vmatpush3.bf16.msra.mxu1 %v859_v32  ;;  %780 = vmatprep.subr.bf16.mxu0 %v866_v37 }
  0x22   :  { %808 = vmatprep.subr.bf16.mxu1 %v866_v37  ;;  %v25_v37 = vld [vmem:[#allocation2 + $0x10] sm:$0xff] }
  0x23   :  { %503 = vmatmul.mubr.bf16.vlgmr.msra.gmra.mxu0 %v860_v33  ;;  %v23_v33 = vld [vmem:[#allocation2] sm:$0xff] }
  0x24   :  { %551 = vmatmul.mubr.bf16.vlgmr.msra.gmra.mxu1 %v863_v35  ;;  %781 = vmatpush3.bf16.msra.mxu0 %v867_v38 }
  0x25   :  { %816 = vmatpush3.bf16.msra.mxu1 %v867_v38  ;;  %782 = vmatprep.subr.bf16.mxu0 %v868_v39 }
  0x26   :  { %809 = vmatprep.subr.bf16.mxu1 %v868_v39  ;;  %510 = vmatprep.mubr.bf16.mxu0 %v671_v45 }
  0x27   :  { %558 = vmatprep.mubr.bf16.mxu1 %v673_v50 }
  0x28   :  { %783 = vmatpush3.bf16.msra.mxu0 %v869_v40 }
  0x29   :  { %817 = vmatpush3.bf16.msra.mxu1 %v869_v40  ;;  %784 = vmatprep.subr.bf16.mxu0 %v870_v41 }
  0x2a   :  { %810 = vmatprep.subr.bf16.mxu1 %v870_v41 }
  0x2b   :  { %511 = vmatmul.mubr.bf16.gmra.mxu0 %v670_v46  ;;  %v24_v46 = vld [vmem:[#allocation2 + $0x8] sm:$0xff] }
  0x2c   :  { %785 = vmatpush3.bf16.msra.mxu0 %v871_v42  ;;  %559 = vmatmul.mubr.bf16.gmra.mxu1 %v672_v51 }
  0x2d   :  { %818 = vmatpush3.bf16.msra.mxu1 %v871_v42  ;;  %786 = vmatprep.subr.bf16.mxu0 %v872_v43 }
  0x2e   :  { %811 = vmatprep.subr.bf16.mxu1 %v872_v43  ;;  %598 = vmatprep.mubr.bf16.mxu0 %v888_v54 }
  0x2f   :  { %606 = vmatprep.mubr.bf16.mxu1 %v675_v56 }
  0x30   :  { %787 = vmatpush3.bf16.msra.mxu0 %v873_v47 }
  0x31   :  { %819 = vmatpush3.bf16.msra.mxu1 %v873_v47  ;;  %788 = vmatprep.subr.bf16.mxu0 %v874_v49 }
  0x32   :  { %812 = vmatprep.subr.bf16.mxu1 %v874_v49 }
  0x34   :  { %789 = vmatpush3.bf16.msra.mxu0 %v876_v52 }
  0x35   :  { %820 = vmatpush3.bf16.msra.mxu1 %v876_v52  ;;  %790 = vmatprep.subr.bf16.mxu0 %v878_v53 }
  0x36   :  { %813 = vmatprep.subr.bf16.mxu1 %v878_v53 }
  0x38   :  { %791 = vmatpush3.bf16.msra.mxu0 %v880_v57 }
  0x39   :  { %821 = vmatpush3.bf16.msra.mxu1 %v880_v57  ;;  %792 = vmatprep.subr.bf16.mxu0 %v882_v60 }
  0x3a   :  { %814 = vmatprep.subr.bf16.mxu1 %v882_v60 }
  0x3c   :  { %793 = vmatpush3.bf16.msra.mxu0 %v883_v61 }
  0x3d   :  { %822 = vmatpush3.bf16.msra.mxu1 %v883_v61  ;;  %794 = vmatprep.subr.bf16.mxu0 %v884_v63 }
  0x3e   :  { %815 = vmatprep.subr.bf16.mxu1 %v884_v63 }
  0x40   :  { %795 = vmatpush3.bf16.msra.mxu0 %v885_v0 }
  0x41   :  { %823 = vmatpush3.bf16.msra.mxu1 %v885_v0 }
  0x43   :  { %599 = vmatmul.mubr.bf16.vlgmr.msra.gmra.mxu0 %v886_v1 }
  0x44   :  { %607 = vmatmul.mubr.bf16.vlgmr.msra.gmra.mxu1 %v674_v2 }
  0x8e   :  { %v633_v49 = vpop.permute.xlu0 %632 }
  0x8f   :  { %v643_v50 = vpop.permute.xlu1 %642 }
  0x92   :  { %v638_v57 = vpop.permute.xlu0 %637 }
  0xe3   :  { %v740_v4 = vpop.f32.mrf.mxu0 }
  0xe4   :  { %v768_v5 = vpop.f32.mrf.mxu1 }
  0xe5   :  { %v741_v6 = vpop.f32.mrf.mxu0 }
  0xe6   :  { %v769_v7 = vpop.f32.mrf.mxu1  ;;  %v742_v20 = vadd.f32 %v741_v6, %v740_v4 }
  0xe7   :  { %v743_v8 = vpop.f32.mrf.mxu0  ;;  %v770_v21 = vadd.f32 %v769_v7, %v768_v5 }
  0xe8   :  { %v771_v9 = vpop.f32.mrf.mxu1 }
  0xe9   :  { %v744_v10 = vpop.f32.mrf.mxu0  ;;  %v553_v27 = vadd.f32 %v770_v21, %v742_v20 }
  0xea   :  { %v772_v11 = vpop.f32.mrf.mxu1  ;;  %v745_v28 = vadd.f32 %v744_v10, %v743_v8 }
  0xeb   :  { %v746_v12 = vpop.f32.mrf.mxu0  ;;  %v773_v29 = vadd.f32 %v772_v11, %v771_v9 }
  0xec   :  { %v774_v14 = vpop.f32.mrf.mxu1 }
  0xed   :  { %v747_v13 = vpop.f32.mrf.mxu0  ;;  %v556_v41 = vadd.f32 %v773_v29, %v745_v28 }
  0xee   :  { %v775_v16 = vpop.f32.mrf.mxu1  ;;  %v748_v22 = vadd.f32 %v747_v13, %v746_v12 }
  0xef   :  { %v749_v15 = vpop.f32.mrf.mxu0  ;;  %v776_v23 = vadd.f32 %v775_v16, %v774_v14 }
  0xf0   :  { %v777_v18 = vpop.f32.mrf.mxu1 }
  0xf1   :  { %v750_v17 = vpop.f32.mrf.mxu0  ;;  %v561_v32 = vadd.f32 %v776_v23, %v748_v22 }
  0xf2   :  { %v778_v19 = vpop.f32.mrf.mxu1 }
 0x103   :  { %v796_v24 = vpop.f32.mrf.mxu0 }
 0x104   :  { %v802_v25 = vpop.f32.mrf.mxu1 }
 0x105   :  { %v797_v26 = vpop.f32.mrf.mxu0 }
 0x106   :  { %v798_v30 = vadd.f32 %v797_v26, %v796_v24  ;;  %v803_v31 = vpop.f32.mrf.mxu1 }
 0x107   :  { %v804_v34 = vadd.f32 %v803_v31, %v802_v25  ;;  %v799_v35 = vpop.f32.mrf.mxu0 }
 0x108   :  { %v601_v36 = vadd.f32 %v798_v30, %v553_v27  ;;  %v805_v38 = vpop.f32.mrf.mxu1 }
 0x109   :  { %v609_v39 = vadd.f32 %v804_v34, %v561_v32  ;;  %v800_v40 = vpop.f32.mrf.mxu0 }
 0x10a   :  { %v614_v42 = vadd.f32 %v601_v36, %v23_v33  ;;  %v801_v43 = vadd.f32 %v800_v40, %v799_v35  ;;  %v806_v44 = vpop.f32.mrf.mxu1 }
 0x10b   :  { %v616_v45 = vadd.f32 %v609_v39, %v25_v37 }
 0x10c   :  { %618 = vst.msk [vmem:[#allocation2] sm:$0xff] %vm19_vm0, %v614_v42  ;;  %v604_v47 = vadd.f32 %v801_v43, %v556_v41 }
 0x10d   :  { %620 = vst.msk [vmem:[#allocation2 + $0x10] sm:$0xff] %vm19_vm0, %v616_v45 }
 0x10e   :  { %v615_v48 = vadd.f32 %v604_v47, %v24_v46 }
 0x110   :  { %619 = vst.msk [vmem:[#allocation2 + $0x8] sm:$0xff] %vm19_vm0, %v615_v48 }
 0x113   :  { %v624_v51 = vld [vmem:[#allocation2] sm:$0xff] }
 0x114   :  { %v645_v52 = vadd.f32 %v633_v49, %v624_v51  ;;  %v626_v53 = vld [vmem:[#allocation2 + $0x10] sm:$0xff] }
 0x115   :  { %v647_v54 = vadd.f32 %v643_v50, %v626_v53 }
 0x116   :  { %vm648_vm1 = vcmp.ge.f32.partialorder %v645_v52, 0.0  ;;  %v651_v55 = vmul.f32 0.01, %v645_v52 }
 0x117   :  { %vm650_vm2 = vcmp.ge.f32.partialorder %v647_v54, 0.0  ;;  %v653_v56 = vmul.f32 0.01, %v647_v54  ;;  %v625_v58 = vld [vmem:[#allocation2 + $0x8] sm:$0xff] }
 0x118   :  { %v654_v59 = vsel %vm648_vm1, %v645_v52, %v651_v55  ;;  %v646_v60 = vadd.f32 %v638_v57, %v625_v58 }
 0x119   :  { %657 = vst.msk [vmem:[%s1114_s3] sm:$0xff] %vm19_vm0, %v654_v59  ;;  %v656_v61 = vsel %vm650_vm2, %v647_v54, %v653_v56 }
 0x11a   :  { %659 = vst.msk [vmem:[%s1114_s3 + $0x10] sm:$0xff] %vm19_vm0, %v656_v61  ;;  %vm649_vm3 = vcmp.ge.f32.partialorder %v646_v60, 0.0  ;;  %v652_v62 = vmul.f32 0.01, %v646_v60 }
 0x11c   :  { %v655_v63 = vsel %vm649_vm3, %v646_v60, %v652_v62 }
 0x11d   :  { %658 = vst.msk [vmem:[%s1114_s3 + $0x8] sm:$0xff] %vm19_vm0, %v655_v63 }

// kernel: hourglass_1_forward.21
= control target key start
LH: loop header
LB: loop body
LE: loop exit
PB: predicated region body
PF: predicated region fallthrough
CT: control target
= control target key end

     0   :  { %s752_s12 = smov 0   ;;  %s754_s13 = smov 0   ;;  %s817_s0 = inlined_call_operand.vmem [shape: bf16[8,16,256], index: 0, kind: input, shape index: {}]   ;;  %s818_s1 = inlined_call_operand.vmem [shape: bf16[8,256,8], index: 1, kind: input, shape index: {}]   ;;  %s819_s2 = inlined_call_operand.vmem [shape: f32[16,1], index: 2, kind: input, shape index: {}]   ;;  %s820_s3 = inlined_call_operand.vmem [shape: bf16[8,16,8], index: 3, kind: output, shape index: {}]  }
   0x1   :  { %s756_s14 = smov 0  }
   0x2 LB: > { %s32_s15 = sadd.s32 1, %s724_s13  ;;  %p604_p0 = scmp.ge.s32.totalorder %s728_s14, 1  ;;  %s728_s14 = sphi %s756_s14, %s13_s14   ;;  %s724_s13 = sphi %s754_s13, %s822_s13   ;;  %s720_s12 = sphi %s752_s12, %s821_s12  }
   0x3   : > { %p34_p1 = scmp.ge.s32.totalorder %s32_s15, 8  ;;  %p187_p2 = scmp.lt.s32.totalorder %s728_s14, 9 }
   0x5   : > { %s824_s15 = smov (%p34_p1, %s32_s15), 0  ;;  %p188_p3 = pnand %p604_p0, %p187_p2 }
   0x6   : > { %p231_p4 = scmp.lt.s32.totalorder (!%p188_p3), %s720_s12, 7 }
   0x7   : > { %191 = sbr.rel (%p188_p3) target bundleno = 267 (0x10b), region = 32 }
   0xc   : > { %v462_v0 = vld [vmem:[%s819_s2] sm:$0xff]  ;;  %v730_v1 = vmov 0   ;;  %s826_s12 = smov (!%p231_p4, %s720_s12), 7  ;;  %v463_v2 = vld [vmem:[%s819_s2 + $0x8] sm:$0xff]  ;;  %vm266_vm0 = vcmask 64512   ;;  %v731_v21 = vmov 0.0  }
   0xd   : > { %686 = vset.pattern.permute.xlu0 %v730_v1  ;;  %s634_s20 = sshll.u32 %s826_s12, 7  ;;  %s633_s24 = sshll.u32 %s826_s12, 4  ;;  %267 = vst.msk [vmem:[#allocation2] sm:$0xff] %vm266_vm0, %v731_v21  ;;  %268 = vst.msk [vmem:[#allocation2 + $0x8] sm:$0xff] %vm266_vm0, %v731_v21  ;;  %vm490_vm2 = vcmask 60416  }
   0xe   : > { %466 = vperm.xlu0 %686, %v462_v0   ;;  %s782_s23 = scalar_lea.vmem %s818_s1, %s634_s20  ;;  %s238_s27 = scalar_lea.vmem %s817_s0, %s633_s24 }
   0xf   : > { %v687_v3 = vld [vmem:[%s782_s23 + $0x78] sm:$0xff]   ;;  %v689_v5 = vld [vmem:[%s782_s23 + $0x70] sm:$0xff]   ;;  %v691_v7 = vld [vmem:[%s782_s23 + $0x68] sm:$0xff]   ;;  %s635_s28 = sshll.u32 %s826_s12, 3 }
  0x10   : > { %v688_v4 = vld [vmem:[%s782_s23 + $0x38] sm:$0xff]   ;;  %638 = vmatprep.subr.bf16.mxu0 %v687_v3  ;;  %v690_v6 = vld [vmem:[%s782_s23 + $0x30] sm:$0xff]   ;;  %v692_v8 = vld [vmem:[%s782_s23 + $0x28] sm:$0xff]   ;;  %s260_s4 = scalar_lea.vmem %s820_s3, %s635_s28 }
  0x11   : > { %639 = vmatpush3.bf16.msra.mxu0 %v688_v4  ;;  %v693_v9 = vld [vmem:[%s782_s23 + $0x60] sm:$0xff]   ;;  %v695_v11 = vld [vmem:[%s782_s23 + $0x58] sm:$0xff]   ;;  %v697_v13 = vld [vmem:[%s782_s23 + $0x50] sm:$0xff]  }
  0x12   : > { %471 = vperm.xlu0 %686, %v463_v2   ;;  %640 = vmatprep.subr.bf16.mxu0 %v689_v5  ;;  %v694_v10 = vld [vmem:[%s782_s23 + $0x20] sm:$0xff]   ;;  %v696_v12 = vld [vmem:[%s782_s23 + $0x18] sm:$0xff]   ;;  %v698_v15 = vld [vmem:[%s782_s23 + $0x10] sm:$0xff]  }
  0x13   : > { %v705_v14 = vld [vmem:[%s238_s27 + $0x4] ss:$8 sps:$4 sm:$0xff]   ;;  %v703_v20 = vld [vmem:[%s238_s27] ss:$8 sps:$4 sm:$0xff]  }
  0x14   : > { %443 = vmatprep.mubr.bf16.mxu0 %v705_v14  ;;  %v699_v16 = vld [vmem:[%s782_s23 + $0x48] sm:$0xff]   ;;  %v701_v18 = vld [vmem:[%s782_s23 + $0x40] sm:$0xff]  }
  0x15   : > { %641 = vmatpush3.bf16.msra.mxu0 %v690_v6  ;;  %v700_v17 = vld [vmem:[%s782_s23 + $0x8] sm:$0xff]   ;;  %v702_v19 = vld [vmem:[%s782_s23] sm:$0xff]  }
  0x16   : > { %642 = vmatprep.subr.bf16.mxu0 %v691_v7  ;;  %v269_v23 = vld [vmem:[#allocation2] sm:$0xff]  ;;  %v270_v28 = vld [vmem:[#allocation2 + $0x8] sm:$0xff] }
  0x19   : > { %643 = vmatpush3.bf16.msra.mxu0 %v692_v8 }
  0x1a   : > { %644 = vmatprep.subr.bf16.mxu0 %v693_v9 }
  0x1d   : > { %645 = vmatpush3.bf16.msra.mxu0 %v694_v10 }
  0x1e   : > { %646 = vmatprep.subr.bf16.mxu0 %v695_v11 }
  0x21   : > { %647 = vmatpush3.bf16.msra.mxu0 %v696_v12 }
  0x22   : > { %648 = vmatprep.subr.bf16.mxu0 %v697_v13 }
  0x25   : > { %649 = vmatpush3.bf16.msra.mxu0 %v698_v15 }
  0x26   : > { %650 = vmatprep.subr.bf16.mxu0 %v699_v16 }
  0x29   : > { %651 = vmatpush3.bf16.msra.mxu0 %v700_v17 }
  0x2a   : > { %652 = vmatprep.subr.bf16.mxu0 %v701_v18 }
  0x2d   : > { %653 = vmatpush3.bf16.msra.mxu0 %v702_v19 }
  0x30   : > { %444 = vmatmul.mubr.bf16.vlgmr.msra.gmra.mxu0 %v703_v20 }
  0x89   : > { %v467_v32 = vpop.permute.xlu0 %466 }
  0x8d   : > { %v472_v36 = vpop.permute.xlu0 %471 }
  0xf0   : > { %v654_v22 = vpop.f32.mrf.mxu0 }
  0xf2   : > { %v655_v24 = vpop.f32.mrf.mxu0 }
  0xf3   : > { %v656_v25 = vadd.f32 %v655_v24, %v654_v22 }
  0xf4   : > { %v657_v26 = vpop.f32.mrf.mxu0 }
  0xf5   : > { %v452_v27 = vadd.f32 %v656_v25, %v269_v23 }
  0xf6   : > { %v658_v29 = vpop.f32.mrf.mxu0 }
  0xf7   : > { %455 = vst.msk [vmem:[#allocation2] sm:$0xff] %vm266_vm0, %v452_v27  ;;  %v659_v30 = vadd.f32 %v658_v29, %v657_v26 }
  0xf9   : > { %v453_v31 = vadd.f32 %v659_v30, %v270_v28 }
  0xfb   : > { %456 = vst.msk [vmem:[#allocation2 + $0x8] sm:$0xff] %vm266_vm0, %v453_v31 }
  0xfe   : > { %v460_v33 = vld [vmem:[#allocation2] sm:$0xff] }
  0xff   : > { %v474_v34 = vadd.f32 %v467_v32, %v460_v33 }
 0x101   : > { %vm476_vm1 = vcmp.ge.f32.partialorder %v474_v34, 0.0  ;;  %v478_v35 = vmul.f32 0.01, %v474_v34 }
 0x102   : > { %v461_v37 = vld [vmem:[#allocation2 + $0x8] sm:$0xff] }
 0x103   : > { %v480_v38 = vsel %vm476_vm1, %v474_v34, %v478_v35  ;;  %v475_v39 = vadd.f32 %v472_v36, %v461_v37 }
 0x104   : > { %v636_v40 = vpack.c.bf16 %v480_v38, %v480_v38 }
 0x105   : > { %vm477_vm3 = vcmp.ge.f32.partialorder %v475_v39, 0.0  ;;  %v479_v41 = vmul.f32 0.01, %v475_v39 }
 0x106   : > { %491 = vst.msk [vmem:[%s260_s4] sm:$0xf] %vm490_vm2, %v636_v40 }
 0x107   : > { %v481_v42 = vsel %vm477_vm3, %v475_v39, %v479_v41 }
 0x108   : > { %v637_v43 = vpack.c.bf16 %v481_v42, %v481_v42 }
 0x10a   : > { %492 = vst.msk [vmem:[%s260_s4 + $0x4] sm:$0xf] %vm490_vm2, %v637_v43 }
 0x10b PF: > { %s13_s14 = sadd.s32 1, %s728_s14   ;;  %s821_s12 = smov %s724_s13 }
 0x10c   : > { %p10_p5 = scmp.ge.s32.totalorder %s13_s14, 10   ;;  %s822_s13 = smov %s824_s15 }
 0x10e   :  { %12 = sbr.rel (!%p10_p5) target bundleno = 2 (0x2), region = 73 }

// kernel: hourglass_1_forward.22
= control target key start
LH: loop header
LB: loop body
LE: loop exit
PB: predicated region body
PF: predicated region fallthrough
CT: control target
= control target key end

     0   :  { %v209_v0 = vmov 0.0   ;;  %vm210_vm0 = vmmov 0   ;;  %vm40_vm1 = vcmask 130048   ;;  %v211_v4 = vmov 0   ;;  %s266_s3 = inlined_call_operand.vmem [shape: bf16[16,64], index: 3, kind: input, shape index: {}]   ;;  %s267_s2 = inlined_call_operand.vmem [shape: bf16[16,64], index: 2, kind: input, shape index: {}]   ;;  %s268_s1 = inlined_call_operand.vmem [shape: bf16[16,16], index: 1, kind: input, shape index: {}]   ;;  %s269_s0 = inlined_call_operand.vmem [shape: bf16[16,16], index: 0, kind: input, shape index: {}]   ;;  %s270_s4 = inlined_call_operand.vmem [shape: f32[16,1], index: 4, kind: input, shape index: {}]   ;;  %s271_s5 = inlined_call_operand.vmem [shape: bf16[16,64], index: 5, kind: output, shape index: {}]  }
   0x1   :  { %189 = vmatprep.subr.bf16.mxu0 %v209_v0  ;;  %195 = vmatprep.subr.bf16.mxu1 %v209_v0  ;;  %v205_v1 = vld [vmem:[%s266_s3] sm:$0xff]   ;;  %v141_v7 = vld [vmem:[%s270_s4 + $0x8] sm:$0xff]  ;;  %vm168_vm3 = vcmask 519168  }
   0x2   :  { %v206_v2 = vld [vmem:[%s267_s2] sm:$0xff]   ;;  %191 = vmatprep.mubr.msk.bf16.mxu0 %vm210_vm0, %v209_v0  ;;  %197 = vmatprep.mubr.msk.bf16.mxu1 %vm210_vm0, %v209_v0 }
   0x3   :  { %190 = vmatpush3.bf16.msra.mxu0 %v205_v1  ;;  %v207_v3 = vld [vmem:[%s268_s1] sm:$0xff]   ;;  %204 = vset.pattern.permute.xlu0 %v211_v4 }
   0x4   :  { %196 = vmatpush3.bf16.msra.mxu1 %v206_v2  ;;  %v208_v5 = vld [vmem:[%s269_s0] sm:$0xff]  }
   0x5   :  { %v140_v6 = vld [vmem:[%s270_s4] sm:$0xff] }
   0x6   :  { %192 = vmatmul.mubr.msk.bf16.vlgmr.msra.gmra.mxu0 %vm40_vm1, %v207_v3  ;;  %144 = vperm.xlu0 %204, %v140_v6  }
   0x7   :  { %198 = vmatmul.mubr.msk.bf16.vlgmr.msra.gmra.mxu1 %vm40_vm1, %v208_v5 }
   0xa   :  { %149 = vperm.xlu0 %204, %v141_v7  }
  0x81   :  { %v145_v9 = vpop.permute.xlu0 %144 }
  0x85   :  { %v150_v20 = vpop.permute.xlu0 %149 }
  0xc6   :  { %v78_v8 = vpop.f32.mrf.mxu0 }
  0xc7   :  { %v133_v10 = vpop.f32.mrf.mxu1 }
  0xc8   :  { %v134_v11 = vadd.f32 %v133_v10, %v78_v8  ;;  %v193_v12 = vpop.f32.mrf.mxu0 }
  0xc9   :  { %v199_v13 = vpop.f32.mrf.mxu1 }
  0xca   :  { %v152_v14 = vadd.f32 %v145_v9, %v134_v11  ;;  %v81_v15 = vpop.f32.mrf.mxu0 }
  0xcb   :  { %v136_v16 = vpop.f32.mrf.mxu1 }
  0xcc   :  { %vm154_vm2 = vcmp.ge.f32.partialorder %v152_v14, 0.0  ;;  %v156_v17 = vmul.f32 0.01, %v152_v14  ;;  %v137_v18 = vadd.f32 %v136_v16, %v81_v15  ;;  %v194_v19 = vpop.f32.mrf.mxu0 }
  0xcd   :  { %v200_v21 = vpop.f32.mrf.mxu1 }
  0xce   :  { %v158_v22 = vsel %vm154_vm2, %v152_v14, %v156_v17  ;;  %v153_v23 = vadd.f32 %v150_v20, %v137_v18 }
  0xcf   :  { %v183_v24 = vpack.c.bf16 %v158_v22, %v158_v22 }
  0xd0   :  { %vm155_vm4 = vcmp.ge.f32.partialorder %v153_v23, 0.0  ;;  %v157_v25 = vmul.f32 0.01, %v153_v23 }
  0xd1   :  { %169 = vst.msk [vmem:[%s271_s5] sm:$0xf] %vm168_vm3, %v183_v24 }
  0xd2   :  { %v159_v26 = vsel %vm155_vm4, %v153_v23, %v157_v25 }
  0xd3   :  { %v184_v27 = vpack.c.bf16 %v159_v26, %v159_v26 }
  0xd5   :  { %170 = vst.msk [vmem:[%s271_s5 + $0x4] sm:$0xf] %vm168_vm3, %v184_v27 }

// kernel: hourglass_1_forward.24
= control target key start
LH: loop header
LB: loop body
LE: loop exit
PB: predicated region body
PF: predicated region fallthrough
CT: control target
= control target key end

     0   :  { %v543_v1 = vmov 0   ;;  %vm19_vm0 = vcmask 523264   ;;  %v544_v39 = vmov 0.0   ;;  %s691_s1 = inlined_call_operand.vmem [shape: bf16[1,512,64], index: 1, kind: input, shape index: {}]   ;;  %s692_s0 = inlined_call_operand.vmem [shape: bf16[1,16,512], index: 0, kind: input, shape index: {}]   ;;  %s693_s2 = inlined_call_operand.vmem [shape: f32[16,1], index: 2, kind: input, shape index: {}]   ;;  %s694_s3 = inlined_call_operand.vmem [shape: f32[1,16,64], index: 3, kind: output, shape index: {}]  }
   0x1   :  { %v505_v0 = vld [vmem:[%s691_s1 + $0x78] sm:$0xff]   ;;  %504 = vset.pattern.permute.xlu0 %v543_v1  ;;  %v509_v5 = vld [vmem:[%s691_s1 + $0x70] sm:$0xff]   ;;  %v513_v9 = vld [vmem:[%s691_s1 + $0x68] sm:$0xff]   ;;  %20 = vst.msk [vmem:[#allocation2] sm:$0xff] %vm19_vm0, %v544_v39 }
   0x2   :  { %v506_v2 = vld [vmem:[%s691_s1 + $0xf8] sm:$0xff]   ;;  %458 = vmatprep.subr.bf16.mxu0 %v505_v0  ;;  %v510_v6 = vld [vmem:[%s691_s1 + $0xf0] sm:$0xff]   ;;  %v514_v10 = vld [vmem:[%s691_s1 + $0xe8] sm:$0xff]   ;;  %21 = vst.msk [vmem:[#allocation2 + $0x8] sm:$0xff] %vm19_vm0, %v544_v39 }
   0x3   :  { %v507_v3 = vld [vmem:[%s691_s1 + $0x38] sm:$0xff]   ;;  %480 = vmatprep.subr.bf16.mxu1 %v506_v2  ;;  %v511_v7 = vld [vmem:[%s691_s1 + $0x30] sm:$0xff]   ;;  %v515_v11 = vld [vmem:[%s691_s1 + $0x28] sm:$0xff]  }
   0x4   :  { %v508_v4 = vld [vmem:[%s691_s1 + $0xb8] sm:$0xff]   ;;  %459 = vmatpush3.bf16.msra.mxu0 %v507_v3  ;;  %v512_v8 = vld [vmem:[%s691_s1 + $0xb0] sm:$0xff]   ;;  %v516_v12 = vld [vmem:[%s691_s1 + $0xa8] sm:$0xff]  }
   0x5   :  { %481 = vmatpush3.bf16.msra.mxu1 %v508_v4  ;;  %460 = vmatprep.subr.bf16.mxu0 %v509_v5  ;;  %v517_v13 = vld [vmem:[%s691_s1 + $0x60] sm:$0xff]   ;;  %v521_v17 = vld [vmem:[%s691_s1 + $0x58] sm:$0xff]   ;;  %v525_v21 = vld [vmem:[%s691_s1 + $0x50] sm:$0xff]  }
   0x6   :  { %482 = vmatprep.subr.bf16.mxu1 %v510_v6  ;;  %v518_v14 = vld [vmem:[%s691_s1 + $0xe0] sm:$0xff]   ;;  %v522_v18 = vld [vmem:[%s691_s1 + $0xd8] sm:$0xff]   ;;  %v526_v22 = vld [vmem:[%s691_s1 + $0xd0] sm:$0xff]  }
   0x7   :  { %v519_v15 = vld [vmem:[%s691_s1 + $0x20] sm:$0xff]   ;;  %v523_v19 = vld [vmem:[%s691_s1 + $0x18] sm:$0xff]   ;;  %v527_v23 = vld [vmem:[%s691_s1 + $0x10] sm:$0xff]  }
   0x8   :  { %461 = vmatpush3.bf16.msra.mxu0 %v511_v7  ;;  %v520_v16 = vld [vmem:[%s691_s1 + $0xa0] sm:$0xff]   ;;  %v524_v20 = vld [vmem:[%s691_s1 + $0x98] sm:$0xff]   ;;  %v528_v24 = vld [vmem:[%s691_s1 + $0x90] sm:$0xff]  }
   0x9   :  { %483 = vmatpush3.bf16.msra.mxu1 %v512_v8  ;;  %462 = vmatprep.subr.bf16.mxu0 %v513_v9  ;;  %v529_v25 = vld [vmem:[%s691_s1 + $0x48] sm:$0xff]   ;;  %v533_v29 = vld [vmem:[%s691_s1 + $0x40] sm:$0xff]  }
   0xa   :  { %484 = vmatprep.subr.bf16.mxu1 %v514_v10  ;;  %v530_v26 = vld [vmem:[%s691_s1 + $0xc8] sm:$0xff]   ;;  %v534_v30 = vld [vmem:[%s691_s1 + $0xc0] sm:$0xff]  }
   0xb   :  { %v531_v27 = vld [vmem:[%s691_s1 + $0x8] sm:$0xff]   ;;  %v535_v31 = vld [vmem:[%s691_s1] sm:$0xff]  }
   0xc   :  { %463 = vmatpush3.bf16.msra.mxu0 %v515_v11  ;;  %v532_v28 = vld [vmem:[%s691_s1 + $0x88] sm:$0xff]   ;;  %v536_v32 = vld [vmem:[%s691_s1 + $0x80] sm:$0xff]  }
   0xd   :  { %485 = vmatpush3.bf16.msra.mxu1 %v516_v12  ;;  %464 = vmatprep.subr.bf16.mxu0 %v517_v13  ;;  %v537_v33 = vld [vmem:[%s692_s0] ss:$16 sps:$4 sm:$0xff]   ;;  %v539_v34 = vld [vmem:[%s692_s0 + $0x4] ss:$16 sps:$4 sm:$0xff]   ;;  %v540_v35 = vld [vmem:[%s692_s0 + $0x8] ss:$16 sps:$4 sm:$0xff]  }
   0xe   :  { %486 = vmatprep.subr.bf16.mxu1 %v518_v14  ;;  %v542_v36 = vld [vmem:[%s692_s0 + $0xc] ss:$16 sps:$4 sm:$0xff]   ;;  %v396_v37 = vld [vmem:[%s693_s2] sm:$0xff]  ;;  %336 = vmatprep.mubr.bf16.mxu0 %v539_v34 }
   0xf   :  { %400 = vperm.xlu0 %504, %v396_v37   ;;  %377 = vmatprep.mubr.bf16.mxu1 %v542_v36  ;;  %v397_v38 = vld [vmem:[%s693_s2 + $0x8] sm:$0xff]  ;;  %v22_v47 = vld [vmem:[#allocation2] sm:$0xff] }
  0x10   :  { %465 = vmatpush3.bf16.msra.mxu0 %v519_v15  ;;  %v23_v55 = vld [vmem:[#allocation2 + $0x8] sm:$0xff] }
  0x11   :  { %487 = vmatpush3.bf16.msra.mxu1 %v520_v16  ;;  %466 = vmatprep.subr.bf16.mxu0 %v521_v17 }
  0x12   :  { %488 = vmatprep.subr.bf16.mxu1 %v522_v18 }
  0x13   :  { %405 = vperm.xlu0 %504, %v397_v38  }
  0x14   :  { %467 = vmatpush3.bf16.msra.mxu0 %v523_v19 }
  0x15   :  { %489 = vmatpush3.bf16.msra.mxu1 %v524_v20  ;;  %468 = vmatprep.subr.bf16.mxu0 %v525_v21 }
  0x16   :  { %490 = vmatprep.subr.bf16.mxu1 %v526_v22 }
  0x18   :  { %469 = vmatpush3.bf16.msra.mxu0 %v527_v23 }
  0x19   :  { %491 = vmatpush3.bf16.msra.mxu1 %v528_v24  ;;  %470 = vmatprep.subr.bf16.mxu0 %v529_v25 }
  0x1a   :  { %492 = vmatprep.subr.bf16.mxu1 %v530_v26 }
  0x1c   :  { %471 = vmatpush3.bf16.msra.mxu0 %v531_v27 }
  0x1d   :  { %493 = vmatpush3.bf16.msra.mxu1 %v532_v28  ;;  %472 = vmatprep.subr.bf16.mxu0 %v533_v29 }
  0x1e   :  { %494 = vmatprep.subr.bf16.mxu1 %v534_v30 }
  0x20   :  { %473 = vmatpush3.bf16.msra.mxu0 %v535_v31 }
  0x21   :  { %495 = vmatpush3.bf16.msra.mxu1 %v536_v32 }
  0x23   :  { %337 = vmatmul.mubr.bf16.vlgmr.msra.gmra.mxu0 %v537_v33 }
  0x24   :  { %378 = vmatmul.mubr.bf16.vlgmr.msra.gmra.mxu1 %v540_v35 }
  0x8a   :  { %v401_v58 = vpop.permute.xlu0 %400 }
  0x8e   :  { %v406_v62 = vpop.permute.xlu0 %405 }
  0xe3   :  { %v474_v40 = vpop.f32.mrf.mxu0 }
  0xe4   :  { %v496_v41 = vpop.f32.mrf.mxu1 }
  0xe5   :  { %v475_v42 = vpop.f32.mrf.mxu0 }
  0xe6   :  { %v476_v43 = vadd.f32 %v475_v42, %v474_v40  ;;  %v497_v44 = vpop.f32.mrf.mxu1 }
  0xe7   :  { %v498_v45 = vadd.f32 %v497_v44, %v496_v41  ;;  %v477_v46 = vpop.f32.mrf.mxu0 }
  0xe8   :  { %v499_v48 = vpop.f32.mrf.mxu1 }
  0xe9   :  { %v380_v49 = vadd.f32 %v498_v45, %v476_v43  ;;  %v478_v50 = vpop.f32.mrf.mxu0 }
  0xea   :  { %v479_v51 = vadd.f32 %v478_v50, %v477_v46  ;;  %v500_v52 = vpop.f32.mrf.mxu1 }
  0xeb   :  { %v386_v53 = vadd.f32 %v380_v49, %v22_v47  ;;  %v501_v54 = vadd.f32 %v500_v52, %v499_v48 }
  0xed   :  { %389 = vst.msk [vmem:[#allocation2] sm:$0xff] %vm19_vm0, %v386_v53  ;;  %v383_v56 = vadd.f32 %v501_v54, %v479_v51 }
  0xef   :  { %v387_v57 = vadd.f32 %v383_v56, %v23_v55 }
  0xf1   :  { %390 = vst.msk [vmem:[#allocation2 + $0x8] sm:$0xff] %vm19_vm0, %v387_v57 }
  0xf4   :  { %v394_v59 = vld [vmem:[#allocation2] sm:$0xff] }
  0xf5   :  { %v408_v60 = vadd.f32 %v401_v58, %v394_v59 }
  0xf7   :  { %vm410_vm1 = vcmp.ge.f32.partialorder %v408_v60, 0.0  ;;  %v412_v61 = vmul.f32 0.01, %v408_v60 }
  0xf8   :  { %v395_v63 = vld [vmem:[#allocation2 + $0x8] sm:$0xff] }
  0xf9   :  { %v414_v0 = vsel %vm410_vm1, %v408_v60, %v412_v61  ;;  %v409_v1 = vadd.f32 %v406_v62, %v395_v63 }
  0xfa   :  { %416 = vst.msk [vmem:[%s694_s3] sm:$0xff] %vm19_vm0, %v414_v0 }
  0xfb   :  { %vm411_vm2 = vcmp.ge.f32.partialorder %v409_v1, 0.0  ;;  %v413_v2 = vmul.f32 0.01, %v409_v1 }
  0xfd   :  { %v415_v3 = vsel %vm411_vm2, %v409_v1, %v413_v2 }
  0xfe   :  { %417 = vst.msk [vmem:[%s694_s3 + $0x8] sm:$0xff] %vm19_vm0, %v415_v3 }

// kernel: hourglass_1_forward.25
= control target key start
LH: loop header
LB: loop body
LE: loop exit
PB: predicated region body
PF: predicated region fallthrough
CT: control target
= control target key end

     0   :  { %s614_s12 = smov 0   ;;  %s616_s13 = smov 0   ;;  %s659_s0 = inlined_call_operand.vmem [shape: bf16[8,8,128], index: 0, kind: input, shape index: {}]   ;;  %s660_s1 = inlined_call_operand.vmem [shape: bf16[8,128,64], index: 1, kind: input, shape index: {}]   ;;  %s661_s2 = inlined_call_operand.vmem [shape: f32[8,1], index: 2, kind: input, shape index: {}]   ;;  %s662_s3 = inlined_call_operand.vmem [shape: bf16[8,8,64], index: 3, kind: output, shape index: {}]  }
   0x1   :  { %s618_s14 = smov 0  }
   0x2 LB: > { %s32_s15 = sadd.s32 1, %s585_s13  ;;  %p486_p0 = scmp.ge.s32.totalorder %s589_s14, 1  ;;  %s589_s14 = sphi %s618_s14, %s13_s14   ;;  %s585_s13 = sphi %s616_s13, %s664_s13   ;;  %s581_s12 = sphi %s614_s12, %s663_s12  }
   0x3   : > { %p34_p1 = scmp.ge.s32.totalorder %s32_s15, 8  ;;  %p184_p2 = scmp.lt.s32.totalorder %s589_s14, 9 }
   0x5   : > { %s666_s15 = smov (%p34_p1, %s32_s15), 0  ;;  %p185_p3 = pnand %p486_p0, %p184_p2 }
   0x6   : > { %p224_p4 = scmp.lt.s32.totalorder (!%p185_p3), %s581_s12, 7 }
   0x7   : > { %188 = sbr.rel (%p185_p3) target bundleno = 258 (0x102), region = 32 }
   0xc   : > { %v371_v0 = vld [vmem:[%s661_s2] sm:$0xff]  ;;  %vm256_vm0 = vcmask 523264   ;;  %v591_v1 = vmov 0.0   ;;  %vm592_vm1 = vmmov 0   ;;  %s668_s12 = smov (!%p224_p4, %s581_s12), 7  ;;  %v593_v2 = vmov 0  }
   0xd   : > { %511 = vmatprep.subr.bf16.mxu0 %v591_v1  ;;  %527 = vmatprep.mubr.msk.bf16.mxu0 %vm592_vm1, %v591_v1  ;;  %257 = vst.msk [vmem:[#allocation2] sm:$0xff] %vm256_vm0, %v591_v1  ;;  %s501_s18 = sshll.u32 %s668_s12, 6  ;;  %s487_s22 = sshll.u32 %s668_s12, 2  ;;  %vm382_vm3 = vcmask 519168  }
   0xe   : > { %558 = vset.pattern.permute.xlu0 %v593_v2  ;;  %s242_s21 = scalar_lea.vmem %s660_s1, %s501_s18  ;;  %s230_s25 = scalar_lea.vmem %s659_s0, %s487_s22 }
   0xf   : > { %374 = vperm.xlu0 %558, %v371_v0   ;;  %v559_v3 = vld [vmem:[%s242_s21 + $0x38] sm:$0xff]   ;;  %v560_v4 = vld [vmem:[%s242_s21 + $0x30] sm:$0xff]   ;;  %v561_v5 = vld [vmem:[%s242_s21 + $0x28] sm:$0xff]   ;;  %s250_s28 = scalar_lea.vmem %s662_s3, %s487_s22 }
  0x10   : > { %512 = vmatpush3.bf16.msra.mxu0 %v559_v3  ;;  %v562_v6 = vld [vmem:[%s242_s21 + $0x20] sm:$0xff]   ;;  %v563_v7 = vld [vmem:[%s242_s21 + $0x18] sm:$0xff]   ;;  %v564_v8 = vld [vmem:[%s242_s21 + $0x10] sm:$0xff]  }
  0x11   : > { %513 = vmatprep.subr.bf16.mxu0 %v591_v1  ;;  %v565_v9 = vld [vmem:[%s242_s21 + $0x8] sm:$0xff]   ;;  %v566_v10 = vld [vmem:[%s242_s21] sm:$0xff]  }
  0x12   : > { %v259_v11 = vld [vmem:[%s230_s25] sm:$0xf] }
  0x14   : > { %514 = vmatpush3.bf16.msra.mxu0 %v560_v4  ;;  %v258_v12 = vld [vmem:[#allocation2] sm:$0xff] }
  0x15   : > { %515 = vmatprep.subr.bf16.mxu0 %v591_v1 }
  0x18   : > { %516 = vmatpush3.bf16.msra.mxu0 %v561_v5 }
  0x19   : > { %517 = vmatprep.subr.bf16.mxu0 %v591_v1 }
  0x1c   : > { %518 = vmatpush3.bf16.msra.mxu0 %v562_v6 }
  0x1d   : > { %519 = vmatprep.subr.bf16.mxu0 %v591_v1 }
  0x20   : > { %520 = vmatpush3.bf16.msra.mxu0 %v563_v7 }
  0x21   : > { %521 = vmatprep.subr.bf16.mxu0 %v591_v1 }
  0x24   : > { %522 = vmatpush3.bf16.msra.mxu0 %v564_v8 }
  0x25   : > { %523 = vmatprep.subr.bf16.mxu0 %v591_v1 }
  0x28   : > { %524 = vmatpush3.bf16.msra.mxu0 %v565_v9 }
  0x29   : > { %525 = vmatprep.subr.bf16.mxu0 %v591_v1 }
  0x2c   : > { %526 = vmatpush3.bf16.msra.mxu0 %v566_v10 }
  0x2f   : > { %528 = vmatmul.mubr.bf16.vlgmr.msra.gmra.mxu0 %v259_v11 }
  0x8a   : > { %v375_v18 = vpop.permute.xlu0 %374 }
  0xef   : > { %v358_v13 = vpop.f32.mrf.mxu0 }
  0xf0   : > { %v364_v14 = vadd.f32 %v358_v13, %v258_v12 }
  0xf1   : > { %v529_v15 = vpop.f32.mrf.mxu0 }
  0xf2   : > { %366 = vst.msk [vmem:[#allocation2] sm:$0xff] %vm256_vm0, %v364_v14 }
  0xf3   : > { %v361_v16 = vpop.f32.mrf.mxu0 }
  0xf5   : > { %v530_v17 = vpop.f32.mrf.mxu0 }
  0xf9   : > { %v370_v19 = vld [vmem:[#allocation2] sm:$0xff] }
  0xfa   : > { %v377_v20 = vadd.f32 %v375_v18, %v370_v19 }
  0xfc   : > { %vm378_vm2 = vcmp.ge.f32.partialorder %v377_v20, 0.0  ;;  %v379_v21 = vmul.f32 0.01, %v377_v20 }
  0xfe   : > { %v380_v22 = vsel %vm378_vm2, %v377_v20, %v379_v21 }
  0xff   : > { %v381_v23 = vpack.c.bf16 %v380_v22, %v380_v22 }
 0x101   : > { %383 = vst.msk [vmem:[%s250_s28] sm:$0xf] %vm382_vm3, %v381_v23 }
 0x102 PF: > { %s13_s14 = sadd.s32 1, %s589_s14   ;;  %s663_s12 = smov %s585_s13 }
 0x103   : > { %p10_p5 = scmp.ge.s32.totalorder %s13_s14, 10   ;;  %s664_s13 = smov %s666_s15 }
 0x105   :  { %12 = sbr.rel (!%p10_p5) target bundleno = 2 (0x2), region = 73 }

// kernel: hourglass_1_forward.26
= control target key start
LH: loop header
LB: loop body
LE: loop exit
PB: predicated region body
PF: predicated region fallthrough
CT: control target
= control target key end

     0   :  { %s534_s18 = smov 0   ;;  %s568_s0 = inlined_call_operand.vmem [shape: bf16[8,8], index: 0, kind: input, shape index: {}]   ;;  %s569_s1 = inlined_call_operand.vmem [shape: bf16[8,8], index: 1, kind: input, shape index: {}]   ;;  %s570_s2 = inlined_call_operand.vmem [shape: bf16[8,512], index: 2, kind: input, shape index: {}]   ;;  %s571_s3 = inlined_call_operand.vmem [shape: bf16[8,512], index: 3, kind: input, shape index: {}]   ;;  %s572_s4 = inlined_call_operand.vmem [shape: f32[8,1], index: 4, kind: input, shape index: {}]   ;;  %s573_s5 = inlined_call_operand.vmem [shape: bf16[8,512], index: 5, kind: output, shape index: {}]  }
   0x1 LB: > { %s458_s19 = sadd.s32 4294967295, %s501_s18   ;;  %p462_p0 = scmp.ge.s32.totalorder %s501_s18, 1  ;;  %s501_s18 = sphi %s534_s18, %s15_s18  }
   0x2   : > { %p199_p1 = scmp.lt.s32.totalorder %s501_s18, 3 }
   0x4   : > { %p200_p2 = pnand %p462_p0, %p199_p1 }
   0x5   : > { %s463_s20 = sshll.u32 (!%p200_p2), %s458_s19, 1 }
   0x6   : > { %203 = sbr.rel (%p200_p2) target bundleno = 227 (0xe3), region = 40  ;;  %p233_p3 = scmp.lt.s32.totalorder (!%p200_p2), %s463_s20, 3 }
   0xb   : > { %v503_v0 = vmov 0   ;;  %v367_v1 = vld [vmem:[%s572_s4] sm:$0xff]  ;;  %s575_s20 = smov (!%p233_p3, %s463_s20), 3  ;;  %vm264_vm0 = vcmask 1043456   ;;  %vm260_vm1 = vcmask 64512  }
   0xc   : > { %303 = vmatprep.mubr.bf16.mxu0 %v503_v0  ;;  %358 = vmatprep.mubr.bf16.mxu1 %v503_v0  ;;  %s545_s23 = sshll.u32 %s575_s20, 2  ;;  %v253_v10 = vld [vmem:[%s569_s1] sm:$0xf] }
   0xd   : > { %490 = vset.pattern.permute.xlu0 %v503_v0  ;;  %s242_s26 = scalar_lea.vmem %s571_s3, %s545_s23  ;;  %s236_s29 = scalar_lea.vmem %s570_s2, %s545_s23  ;;  %v251_v11 = vld [vmem:[%s568_s0] sm:$0xf] }
   0xe   : > { %370 = vperm.xlu0 %490, %v367_v1   ;;  %v254_v2 = vld [vmem:[%s242_s26] sm:$0xff]  ;;  %s248_s11 = scalar_lea.vmem %s573_s5, %s545_s23 }
   0xf   : > { %v470_v3 = vcombine.high %v254_v2, %v254_v2  ;;  %v252_v4 = vld [vmem:[%s236_s29] sm:$0xff]  ;;  %v469_v5 = vcombine.low %v254_v2, %v254_v2 }
  0x10   : > { %v474_v6 = vcombine.high %v252_v4, %v252_v4  ;;  %v473_v7 = vcombine.low %v252_v4, %v252_v4 }
  0x11   : > { %471 = vmatprep.subr.msk.bf16.mxu0 %vm264_vm0, %v470_v3  ;;  %v266_v8 = vsel %vm264_vm0, %v469_v5, 0 }
  0x12   : > { %475 = vmatprep.subr.msk.bf16.mxu1 %vm264_vm0, %v474_v6  ;;  %286 = vmatpush1.bf16.msra.mxu0 %v266_v8  ;;  %v321_v9 = vsel %vm264_vm0, %v473_v7, 0 }
  0x13   : > { %341 = vmatpush1.bf16.msra.mxu1 %v321_v9 }
  0x15   : > { %472 = vmatmul.mubr.msk.bf16.vlgmr.msra.gmra.mxu0 %vm260_vm1, %v253_v10 }
  0x16   : > { %476 = vmatmul.mubr.msk.bf16.vlgmr.msra.gmra.mxu1 %vm260_vm1, %v251_v11 }
  0x89   : > { %v371_v14 = vpop.permute.xlu0 %370 }
  0xd5   : > { %v305_v12 = vpop.f32.mrf.mxu0 }
  0xd6   : > { %v360_v13 = vpop.f32.mrf.mxu1 }
  0xd7   : > { %v361_v15 = vadd.f32 %v360_v13, %v305_v12  ;;  %v307_v16 = vpop.f32.mrf.mxu0 }
  0xd8   : > { %v362_v17 = vpop.f32.mrf.mxu1 }
  0xd9   : > { %v373_v18 = vadd.f32 %v371_v14, %v361_v15  ;;  %v363_v19 = vadd.f32 %v362_v17, %v307_v16  ;;  %v309_v20 = vpop.f32.mrf.mxu0 }
  0xda   : > { %v364_v21 = vpop.f32.mrf.mxu1 }
  0xdb   : > { %v377_v22 = vmul.f32 0.01, %v373_v18  ;;  %v374_v23 = vadd.f32 %v371_v14, %v363_v19  ;;  %v310_v24 = vpop.f32.mrf.mxu0  ;;  %vm375_vm2 = vcmp.ge.f32.partialorder %v373_v18, 0.0 }
  0xdc   : > { %v365_v25 = vpop.f32.mrf.mxu1 }
  0xdd   : > { %vm376_vm3 = vcmp.ge.f32.partialorder %v374_v23, 0.0  ;;  %v378_v26 = vmul.f32 0.01, %v374_v23  ;;  %v379_v27 = vsel %vm375_vm2, %v373_v18, %v377_v22 }
  0xdf   : > { %v380_v28 = vsel %vm376_vm3, %v374_v23, %v378_v26 }
  0xe0   : > { %v480_v29 = vpack.c.bf16 %v380_v28, %v379_v27 }
  0xe2   : > { %389 = vst [vmem:[%s248_s11] sm:$0xff] %v480_v29 }
  0xe3 PF: > { %s15_s18 = sadd.s32 1, %s501_s18  }
  0xe4   : > { %p12_p4 = scmp.ge.s32.totalorder %s15_s18, 4  }
  0xe6   :  { %14 = sbr.rel (!%p12_p4) target bundleno = 1 (0x1), region = 73 }

// kernel: squeeze.23
= control target key start
LH: loop header
LB: loop body
LE: loop exit
PB: predicated region body
PF: predicated region fallthrough
CT: control target
= control target key end

     0   :  { %s1175_s10 = smov 120   ;;  %s1176_s15 = smov 112   ;;  %vm3_vm0 = vcmask 64512   ;;  %s2380_s0 = inlined_call_operand.vmem [shape: f32[1,8,512], index: 0, kind: input, shape index: {}]   ;;  %s2381_s1 = inlined_call_operand.vmem [shape: f32[8,2,4,8,8], index: 1, kind: output, shape index: {}]  }
   0x1   :  { %v1203_v0 = vld.sshfl [vmem:[%s2380_s0 + $0x10] sm:$0xff pattern:$0xb3a29180]   ;;  %v1208_v1 = vld.sshfl [vmem:[%s2380_s0] sm:$0xff pattern:$0xb3a29180]  }
   0x2   :  { %103 = vrot.lane.b32.xlu1 %v1203_v0, %s1175_s10  ;;  %77 = vrot.lane.b32.xlu0 %v1208_v1, %s1175_s10  ;;  %v1215_v2 = vld.sshfl [vmem:[%s2380_s0 + $0x14] sm:$0xff pattern:$0xb3a29180]   ;;  %v1220_v3 = vld.sshfl [vmem:[%s2380_s0 + $0x4] sm:$0xff pattern:$0xb3a29180]  }
   0x3   :  { %s1177_s16 = smov 104   ;;  %s1178_s17 = smov 96   ;;  %v2_v4 = vld [vmem:[%s2380_s0] sm:$0xff]   ;;  %v848_v5 = vld [vmem:[%s2380_s0 + $0x8] sm:$0xff]   ;;  %v857_v6 = vld [vmem:[%s2380_s0 + $0x10] sm:$0xff]  }
   0x4   :  { %s1179_s18 = smov 88   ;;  %s1180_s19 = smov 80   ;;  %4 = vst.msk [vmem:[%s2381_s1] sm:$0x1] %vm3_vm0, %v2_v4   ;;  %841 = vst.msk [vmem:[%s2381_s1 + $0x3f] sm:$0x2] %vm3_vm0, %v2_v4  }
   0x5   :  { %s1181_s20 = smov 72   ;;  %s1182_s21 = smov 64   ;;  %842 = vst.msk [vmem:[%s2381_s1 + $0x7e] sm:$0x4] %vm3_vm0, %v2_v4   ;;  %843 = vst.msk [vmem:[%s2381_s1 + $0xbd] sm:$0x8] %vm3_vm0, %v2_v4  }
   0x6   :  { %116 = vrot.lane.b32.xlu1 %v1215_v2, %s1175_s10  ;;  %90 = vrot.lane.b32.xlu0 %v1220_v3, %s1175_s10  ;;  %s1183_s22 = smov 56   ;;  %s1184_s23 = smov 48   ;;  %844 = vst.msk [vmem:[%s2381_s1 + $0xfc] sm:$0x10] %vm3_vm0, %v2_v4   ;;  %845 = vst.msk [vmem:[%s2381_s1 + $0x13b] sm:$0x20] %vm3_vm0, %v2_v4  }
   0x7   :  { %s1185_s24 = smov 40   ;;  %s1186_s25 = smov 32   ;;  %846 = vst.msk [vmem:[%s2381_s1 + $0x17a] sm:$0x40] %vm3_vm0, %v2_v4   ;;  %847 = vst.msk [vmem:[%s2381_s1 + $0x1b9] sm:$0x80] %vm3_vm0, %v2_v4  }
   0x8   :  { %s1187_s26 = smov 24   ;;  %849 = vst.msk [vmem:[%s2381_s1 + $0x10] sm:$0x1] %vm3_vm0, %v848_v5   ;;  %850 = vst.msk [vmem:[%s2381_s1 + $0x4f] sm:$0x2] %vm3_vm0, %v848_v5   ;;  %v866_v7 = vld [vmem:[%s2380_s0 + $0x18] sm:$0xff]  }
   0x9   :  { %851 = vst.msk [vmem:[%s2381_s1 + $0x8e] sm:$0x4] %vm3_vm0, %v848_v5   ;;  %852 = vst.msk [vmem:[%s2381_s1 + $0xcd] sm:$0x8] %vm3_vm0, %v848_v5   ;;  %s1188_s0 = smov 16   ;;  %s1189_s12 = smov 8  }
   0xa   :  { %141 = vrot.lane.b32.xlu1 %v1220_v3, %s1176_s15  ;;  %128 = vrot.lane.b32.xlu0 %v1208_v1, %s1176_s15  ;;  %853 = vst.msk [vmem:[%s2381_s1 + $0x10c] sm:$0x10] %vm3_vm0, %v848_v5   ;;  %854 = vst.msk [vmem:[%s2381_s1 + $0x14b] sm:$0x20] %vm3_vm0, %v848_v5  }
   0xb   :  { %855 = vst.msk [vmem:[%s2381_s1 + $0x18a] sm:$0x40] %vm3_vm0, %v848_v5   ;;  %856 = vst.msk [vmem:[%s2381_s1 + $0x1c9] sm:$0x80] %vm3_vm0, %v848_v5  }
   0xc   :  { %858 = vst.msk [vmem:[%s2381_s1 + $0x20] sm:$0x1] %vm3_vm0, %v857_v6   ;;  %859 = vst.msk [vmem:[%s2381_s1 + $0x5f] sm:$0x2] %vm3_vm0, %v857_v6  }
   0xd   :  { %860 = vst.msk [vmem:[%s2381_s1 + $0x9e] sm:$0x4] %vm3_vm0, %v857_v6   ;;  %861 = vst.msk [vmem:[%s2381_s1 + $0xdd] sm:$0x8] %vm3_vm0, %v857_v6  }
   0xe   :  { %167 = vrot.lane.b32.xlu1 %v1215_v2, %s1176_s15  ;;  %154 = vrot.lane.b32.xlu0 %v1203_v0, %s1176_s15  ;;  %862 = vst.msk [vmem:[%s2381_s1 + $0x11c] sm:$0x10] %vm3_vm0, %v857_v6   ;;  %863 = vst.msk [vmem:[%s2381_s1 + $0x15b] sm:$0x20] %vm3_vm0, %v857_v6  }
   0xf   :  { %864 = vst.msk [vmem:[%s2381_s1 + $0x19a] sm:$0x40] %vm3_vm0, %v857_v6   ;;  %865 = vst.msk [vmem:[%s2381_s1 + $0x1d9] sm:$0x80] %vm3_vm0, %v857_v6  }
  0x10   :  { %867 = vst.msk [vmem:[%s2381_s1 + $0x30] sm:$0x1] %vm3_vm0, %v866_v7   ;;  %868 = vst.msk [vmem:[%s2381_s1 + $0x6f] sm:$0x2] %vm3_vm0, %v866_v7  }
  0x11   :  { %869 = vst.msk [vmem:[%s2381_s1 + $0xae] sm:$0x4] %vm3_vm0, %v866_v7   ;;  %870 = vst.msk [vmem:[%s2381_s1 + $0xed] sm:$0x8] %vm3_vm0, %v866_v7  }
  0x12   :  { %192 = vrot.lane.b32.xlu1 %v1220_v3, %s1177_s16  ;;  %179 = vrot.lane.b32.xlu0 %v1208_v1, %s1177_s16  ;;  %871 = vst.msk [vmem:[%s2381_s1 + $0x12c] sm:$0x10] %vm3_vm0, %v866_v7   ;;  %872 = vst.msk [vmem:[%s2381_s1 + $0x16b] sm:$0x20] %vm3_vm0, %v866_v7  }
  0x13   :  { %873 = vst.msk [vmem:[%s2381_s1 + $0x1aa] sm:$0x40] %vm3_vm0, %v866_v7   ;;  %874 = vst.msk [vmem:[%s2381_s1 + $0x1e9] sm:$0x80] %vm3_vm0, %v866_v7  }
  0x16   :  { %218 = vrot.lane.b32.xlu1 %v1215_v2, %s1177_s16  ;;  %205 = vrot.lane.b32.xlu0 %v1203_v0, %s1177_s16 }
  0x1a   :  { %243 = vrot.lane.b32.xlu1 %v1220_v3, %s1178_s17  ;;  %230 = vrot.lane.b32.xlu0 %v1208_v1, %s1178_s17 }
  0x1e   :  { %269 = vrot.lane.b32.xlu1 %v1215_v2, %s1178_s17  ;;  %256 = vrot.lane.b32.xlu0 %v1203_v0, %s1178_s17 }
  0x22   :  { %294 = vrot.lane.b32.xlu1 %v1220_v3, %s1179_s18  ;;  %281 = vrot.lane.b32.xlu0 %v1208_v1, %s1179_s18 }
  0x26   :  { %320 = vrot.lane.b32.xlu1 %v1215_v2, %s1179_s18  ;;  %307 = vrot.lane.b32.xlu0 %v1203_v0, %s1179_s18 }
  0x2a   :  { %345 = vrot.lane.b32.xlu1 %v1220_v3, %s1180_s19  ;;  %332 = vrot.lane.b32.xlu0 %v1208_v1, %s1180_s19 }
  0x2e   :  { %371 = vrot.lane.b32.xlu1 %v1215_v2, %s1180_s19  ;;  %358 = vrot.lane.b32.xlu0 %v1203_v0, %s1180_s19 }
  0x32   :  { %396 = vrot.lane.b32.xlu1 %v1220_v3, %s1181_s20  ;;  %383 = vrot.lane.b32.xlu0 %v1208_v1, %s1181_s20 }
  0x36   :  { %422 = vrot.lane.b32.xlu1 %v1215_v2, %s1181_s20  ;;  %409 = vrot.lane.b32.xlu0 %v1203_v0, %s1181_s20 }
  0x3a   :  { %447 = vrot.lane.b32.xlu1 %v1220_v3, %s1182_s21  ;;  %434 = vrot.lane.b32.xlu0 %v1208_v1, %s1182_s21 }
  0x3e   :  { %473 = vrot.lane.b32.xlu1 %v1215_v2, %s1182_s21  ;;  %460 = vrot.lane.b32.xlu0 %v1203_v0, %s1182_s21 }
  0x42   :  { %498 = vrot.lane.b32.xlu1 %v1220_v3, %s1183_s22  ;;  %485 = vrot.lane.b32.xlu0 %v1208_v1, %s1183_s22 }
  0x46   :  { %524 = vrot.lane.b32.xlu1 %v1215_v2, %s1183_s22  ;;  %511 = vrot.lane.b32.xlu0 %v1203_v0, %s1183_s22 }
  0x4a   :  { %549 = vrot.lane.b32.xlu1 %v1220_v3, %s1184_s23  ;;  %536 = vrot.lane.b32.xlu0 %v1208_v1, %s1184_s23 }
  0x4e   :  { %575 = vrot.lane.b32.xlu1 %v1215_v2, %s1184_s23  ;;  %562 = vrot.lane.b32.xlu0 %v1203_v0, %s1184_s23 }
  0x52   :  { %600 = vrot.lane.b32.xlu1 %v1220_v3, %s1185_s24  ;;  %587 = vrot.lane.b32.xlu0 %v1208_v1, %s1185_s24 }
  0x56   :  { %626 = vrot.lane.b32.xlu1 %v1215_v2, %s1185_s24  ;;  %613 = vrot.lane.b32.xlu0 %v1203_v0, %s1185_s24 }
  0x5a   :  { %651 = vrot.lane.b32.xlu1 %v1220_v3, %s1186_s25  ;;  %638 = vrot.lane.b32.xlu0 %v1208_v1, %s1186_s25 }
  0x5e   :  { %677 = vrot.lane.b32.xlu1 %v1215_v2, %s1186_s25  ;;  %664 = vrot.lane.b32.xlu0 %v1203_v0, %s1186_s25 }
  0x62   :  { %702 = vrot.lane.b32.xlu1 %v1220_v3, %s1187_s26  ;;  %689 = vrot.lane.b32.xlu0 %v1208_v1, %s1187_s26 }
  0x66   :  { %728 = vrot.lane.b32.xlu1 %v1215_v2, %s1187_s26  ;;  %715 = vrot.lane.b32.xlu0 %v1203_v0, %s1187_s26 }
  0x6a   :  { %753 = vrot.lane.b32.xlu1 %v1220_v3, %s1188_s0  ;;  %740 = vrot.lane.b32.xlu0 %v1208_v1, %s1188_s0 }
  0x6e   :  { %779 = vrot.lane.b32.xlu1 %v1215_v2, %s1188_s0  ;;  %766 = vrot.lane.b32.xlu0 %v1203_v0, %s1188_s0 }
  0x72   :  { %804 = vrot.lane.b32.xlu1 %v1220_v3, %s1189_s12  ;;  %791 = vrot.lane.b32.xlu0 %v1208_v1, %s1189_s12 }
  0x74   :  { %v104_v8 = vpop.permute.xlu1 %103   ;;  %v78_v9 = vpop.permute.xlu0 %77  }
  0x75   :  { %885 = vst.msk [vmem:[%s2381_s1 + $0x21] ss:$16 sm:$0x3] %vm3_vm0, %v104_v8   ;;  %886 = vst.msk [vmem:[%s2381_s1 + $0x41] ss:$16 sm:$0xc] %vm3_vm0, %v104_v8  }
  0x76   :  { %887 = vst.msk [vmem:[%s2381_s1 + $0x61] ss:$16 sm:$0x30] %vm3_vm0, %v104_v8   ;;  %888 = vst.msk [vmem:[%s2381_s1 + $0x81] ss:$16 sm:$0xc0] %vm3_vm0, %v104_v8   ;;  %830 = vrot.lane.b32.xlu1 %v1215_v2, %s1189_s12  ;;  %817 = vrot.lane.b32.xlu0 %v1203_v0, %s1189_s12 }
  0x77   :  { %875 = vst.msk [vmem:[%s2381_s1 + $0x1] ss:$16 sm:$0x3] %vm3_vm0, %v78_v9   ;;  %876 = vst.msk [vmem:[%s2381_s1 + $0x21] ss:$16 sm:$0xc] %vm3_vm0, %v78_v9  }
  0x78   :  { %877 = vst.msk [vmem:[%s2381_s1 + $0x41] ss:$16 sm:$0x30] %vm3_vm0, %v78_v9   ;;  %878 = vst.msk [vmem:[%s2381_s1 + $0x61] ss:$16 sm:$0xc0] %vm3_vm0, %v78_v9   ;;  %v117_v10 = vpop.permute.xlu1 %116   ;;  %v91_v11 = vpop.permute.xlu0 %90  }
  0x79   :  { %890 = vst.msk [vmem:[%s2381_s1 + $0x121] ss:$16 sm:$0x3] %vm3_vm0, %v117_v10   ;;  %891 = vst.msk [vmem:[%s2381_s1 + $0x141] ss:$16 sm:$0xc] %vm3_vm0, %v117_v10  }
  0x7a   :  { %892 = vst.msk [vmem:[%s2381_s1 + $0x161] ss:$16 sm:$0x30] %vm3_vm0, %v117_v10   ;;  %893 = vst.msk [vmem:[%s2381_s1 + $0x181] ss:$16 sm:$0xc0] %vm3_vm0, %v117_v10  }
  0x7b   :  { %880 = vst.msk [vmem:[%s2381_s1 + $0x101] ss:$16 sm:$0x3] %vm3_vm0, %v91_v11   ;;  %881 = vst.msk [vmem:[%s2381_s1 + $0x121] ss:$16 sm:$0xc] %vm3_vm0, %v91_v11  }
  0x7c   :  { %882 = vst.msk [vmem:[%s2381_s1 + $0x141] ss:$16 sm:$0x30] %vm3_vm0, %v91_v11   ;;  %883 = vst.msk [vmem:[%s2381_s1 + $0x161] ss:$16 sm:$0xc0] %vm3_vm0, %v91_v11   ;;  %v142_v12 = vpop.permute.xlu1 %141   ;;  %v129_v13 = vpop.permute.xlu0 %128  }
  0x7d   :  { %899 = vst.msk [vmem:[%s2381_s1 + $0x102] ss:$16 sm:$0x3] %vm3_vm0, %v142_v12   ;;  %900 = vst.msk [vmem:[%s2381_s1 + $0x122] ss:$16 sm:$0xc] %vm3_vm0, %v142_v12  }
  0x7e   :  { %901 = vst.msk [vmem:[%s2381_s1 + $0x142] ss:$16 sm:$0x30] %vm3_vm0, %v142_v12   ;;  %902 = vst.msk [vmem:[%s2381_s1 + $0x162] ss:$16 sm:$0xc0] %vm3_vm0, %v142_v12  }
  0x7f   :  { %894 = vst.msk [vmem:[%s2381_s1 + $0x2] ss:$16 sm:$0x3] %vm3_vm0, %v129_v13   ;;  %895 = vst.msk [vmem:[%s2381_s1 + $0x22] ss:$16 sm:$0xc] %vm3_vm0, %v129_v13  }
  0x80   :  { %896 = vst.msk [vmem:[%s2381_s1 + $0x42] ss:$16 sm:$0x30] %vm3_vm0, %v129_v13   ;;  %897 = vst.msk [vmem:[%s2381_s1 + $0x62] ss:$16 sm:$0xc0] %vm3_vm0, %v129_v13   ;;  %v168_v14 = vpop.permute.xlu1 %167   ;;  %v155_v15 = vpop.permute.xlu0 %154  }
  0x81   :  { %909 = vst.msk [vmem:[%s2381_s1 + $0x122] ss:$16 sm:$0x3] %vm3_vm0, %v168_v14   ;;  %910 = vst.msk [vmem:[%s2381_s1 + $0x142] ss:$16 sm:$0xc] %vm3_vm0, %v168_v14  }
  0x82   :  { %911 = vst.msk [vmem:[%s2381_s1 + $0x162] ss:$16 sm:$0x30] %vm3_vm0, %v168_v14   ;;  %912 = vst.msk [vmem:[%s2381_s1 + $0x182] ss:$16 sm:$0xc0] %vm3_vm0, %v168_v14  }
  0x83   :  { %904 = vst.msk [vmem:[%s2381_s1 + $0x22] ss:$16 sm:$0x3] %vm3_vm0, %v155_v15   ;;  %905 = vst.msk [vmem:[%s2381_s1 + $0x42] ss:$16 sm:$0xc] %vm3_vm0, %v155_v15  }
  0x84   :  { %906 = vst.msk [vmem:[%s2381_s1 + $0x62] ss:$16 sm:$0x30] %vm3_vm0, %v155_v15   ;;  %907 = vst.msk [vmem:[%s2381_s1 + $0x82] ss:$16 sm:$0xc0] %vm3_vm0, %v155_v15   ;;  %v193_v16 = vpop.permute.xlu1 %192   ;;  %v180_v17 = vpop.permute.xlu0 %179  }
  0x85   :  { %918 = vst.msk [vmem:[%s2381_s1 + $0x103] ss:$16 sm:$0x3] %vm3_vm0, %v193_v16   ;;  %919 = vst.msk [vmem:[%s2381_s1 + $0x123] ss:$16 sm:$0xc] %vm3_vm0, %v193_v16  }
  0x86   :  { %920 = vst.msk [vmem:[%s2381_s1 + $0x143] ss:$16 sm:$0x30] %vm3_vm0, %v193_v16   ;;  %921 = vst.msk [vmem:[%s2381_s1 + $0x163] ss:$16 sm:$0xc0] %vm3_vm0, %v193_v16  }
  0x87   :  { %913 = vst.msk [vmem:[%s2381_s1 + $0x3] ss:$16 sm:$0x3] %vm3_vm0, %v180_v17   ;;  %914 = vst.msk [vmem:[%s2381_s1 + $0x23] ss:$16 sm:$0xc] %vm3_vm0, %v180_v17  }
  0x88   :  { %915 = vst.msk [vmem:[%s2381_s1 + $0x43] ss:$16 sm:$0x30] %vm3_vm0, %v180_v17   ;;  %916 = vst.msk [vmem:[%s2381_s1 + $0x63] ss:$16 sm:$0xc0] %vm3_vm0, %v180_v17   ;;  %v219_v18 = vpop.permute.xlu1 %218   ;;  %v206_v19 = vpop.permute.xlu0 %205  }
  0x89   :  { %928 = vst.msk [vmem:[%s2381_s1 + $0x123] ss:$16 sm:$0x3] %vm3_vm0, %v219_v18   ;;  %929 = vst.msk [vmem:[%s2381_s1 + $0x143] ss:$16 sm:$0xc] %vm3_vm0, %v219_v18  }
  0x8a   :  { %930 = vst.msk [vmem:[%s2381_s1 + $0x163] ss:$16 sm:$0x30] %vm3_vm0, %v219_v18   ;;  %931 = vst.msk [vmem:[%s2381_s1 + $0x183] ss:$16 sm:$0xc0] %vm3_vm0, %v219_v18  }
  0x8b   :  { %923 = vst.msk [vmem:[%s2381_s1 + $0x23] ss:$16 sm:$0x3] %vm3_vm0, %v206_v19   ;;  %924 = vst.msk [vmem:[%s2381_s1 + $0x43] ss:$16 sm:$0xc] %vm3_vm0, %v206_v19  }
  0x8c   :  { %925 = vst.msk [vmem:[%s2381_s1 + $0x63] ss:$16 sm:$0x30] %vm3_vm0, %v206_v19   ;;  %926 = vst.msk [vmem:[%s2381_s1 + $0x83] ss:$16 sm:$0xc0] %vm3_vm0, %v206_v19   ;;  %v244_v20 = vpop.permute.xlu1 %243   ;;  %v231_v21 = vpop.permute.xlu0 %230  }
  0x8d   :  { %937 = vst.msk [vmem:[%s2381_s1 + $0x104] ss:$16 sm:$0x3] %vm3_vm0, %v244_v20   ;;  %938 = vst.msk [vmem:[%s2381_s1 + $0x124] ss:$16 sm:$0xc] %vm3_vm0, %v244_v20  }
  0x8e   :  { %939 = vst.msk [vmem:[%s2381_s1 + $0x144] ss:$16 sm:$0x30] %vm3_vm0, %v244_v20   ;;  %940 = vst.msk [vmem:[%s2381_s1 + $0x164] ss:$16 sm:$0xc0] %vm3_vm0, %v244_v20  }
  0x8f   :  { %932 = vst.msk [vmem:[%s2381_s1 + $0x4] ss:$16 sm:$0x3] %vm3_vm0, %v231_v21   ;;  %933 = vst.msk [vmem:[%s2381_s1 + $0x24] ss:$16 sm:$0xc] %vm3_vm0, %v231_v21  }
  0x90   :  { %934 = vst.msk [vmem:[%s2381_s1 + $0x44] ss:$16 sm:$0x30] %vm3_vm0, %v231_v21   ;;  %935 = vst.msk [vmem:[%s2381_s1 + $0x64] ss:$16 sm:$0xc0] %vm3_vm0, %v231_v21   ;;  %v270_v22 = vpop.permute.xlu1 %269   ;;  %v257_v23 = vpop.permute.xlu0 %256  }
  0x91   :  { %947 = vst.msk [vmem:[%s2381_s1 + $0x124] ss:$16 sm:$0x3] %vm3_vm0, %v270_v22   ;;  %948 = vst.msk [vmem:[%s2381_s1 + $0x144] ss:$16 sm:$0xc] %vm3_vm0, %v270_v22  }
  0x92   :  { %949 = vst.msk [vmem:[%s2381_s1 + $0x164] ss:$16 sm:$0x30] %vm3_vm0, %v270_v22   ;;  %950 = vst.msk [vmem:[%s2381_s1 + $0x184] ss:$16 sm:$0xc0] %vm3_vm0, %v270_v22  }
  0x93   :  { %942 = vst.msk [vmem:[%s2381_s1 + $0x24] ss:$16 sm:$0x3] %vm3_vm0, %v257_v23   ;;  %943 = vst.msk [vmem:[%s2381_s1 + $0x44] ss:$16 sm:$0xc] %vm3_vm0, %v257_v23  }
  0x94   :  { %944 = vst.msk [vmem:[%s2381_s1 + $0x64] ss:$16 sm:$0x30] %vm3_vm0, %v257_v23   ;;  %945 = vst.msk [vmem:[%s2381_s1 + $0x84] ss:$16 sm:$0xc0] %vm3_vm0, %v257_v23   ;;  %v295_v24 = vpop.permute.xlu1 %294   ;;  %v282_v25 = vpop.permute.xlu0 %281  }
  0x95   :  { %956 = vst.msk [vmem:[%s2381_s1 + $0x105] ss:$16 sm:$0x3] %vm3_vm0, %v295_v24   ;;  %957 = vst.msk [vmem:[%s2381_s1 + $0x125] ss:$16 sm:$0xc] %vm3_vm0, %v295_v24  }
  0x96   :  { %958 = vst.msk [vmem:[%s2381_s1 + $0x145] ss:$16 sm:$0x30] %vm3_vm0, %v295_v24   ;;  %959 = vst.msk [vmem:[%s2381_s1 + $0x165] ss:$16 sm:$0xc0] %vm3_vm0, %v295_v24  }
  0x97   :  { %951 = vst.msk [vmem:[%s2381_s1 + $0x5] ss:$16 sm:$0x3] %vm3_vm0, %v282_v25   ;;  %952 = vst.msk [vmem:[%s2381_s1 + $0x25] ss:$16 sm:$0xc] %vm3_vm0, %v282_v25  }
  0x98   :  { %953 = vst.msk [vmem:[%s2381_s1 + $0x45] ss:$16 sm:$0x30] %vm3_vm0, %v282_v25   ;;  %954 = vst.msk [vmem:[%s2381_s1 + $0x65] ss:$16 sm:$0xc0] %vm3_vm0, %v282_v25   ;;  %v321_v26 = vpop.permute.xlu1 %320   ;;  %v308_v27 = vpop.permute.xlu0 %307  }
  0x99   :  { %966 = vst.msk [vmem:[%s2381_s1 + $0x125] ss:$16 sm:$0x3] %vm3_vm0, %v321_v26   ;;  %967 = vst.msk [vmem:[%s2381_s1 + $0x145] ss:$16 sm:$0xc] %vm3_vm0, %v321_v26  }
  0x9a   :  { %968 = vst.msk [vmem:[%s2381_s1 + $0x165] ss:$16 sm:$0x30] %vm3_vm0, %v321_v26   ;;  %969 = vst.msk [vmem:[%s2381_s1 + $0x185] ss:$16 sm:$0xc0] %vm3_vm0, %v321_v26  }
  0x9b   :  { %961 = vst.msk [vmem:[%s2381_s1 + $0x25] ss:$16 sm:$0x3] %vm3_vm0, %v308_v27   ;;  %962 = vst.msk [vmem:[%s2381_s1 + $0x45] ss:$16 sm:$0xc] %vm3_vm0, %v308_v27  }
  0x9c   :  { %963 = vst.msk [vmem:[%s2381_s1 + $0x65] ss:$16 sm:$0x30] %vm3_vm0, %v308_v27   ;;  %964 = vst.msk [vmem:[%s2381_s1 + $0x85] ss:$16 sm:$0xc0] %vm3_vm0, %v308_v27   ;;  %v346_v28 = vpop.permute.xlu1 %345   ;;  %v333_v29 = vpop.permute.xlu0 %332  }
  0x9d   :  { %975 = vst.msk [vmem:[%s2381_s1 + $0x106] ss:$16 sm:$0x3] %vm3_vm0, %v346_v28   ;;  %976 = vst.msk [vmem:[%s2381_s1 + $0x126] ss:$16 sm:$0xc] %vm3_vm0, %v346_v28  }
  0x9e   :  { %977 = vst.msk [vmem:[%s2381_s1 + $0x146] ss:$16 sm:$0x30] %vm3_vm0, %v346_v28   ;;  %978 = vst.msk [vmem:[%s2381_s1 + $0x166] ss:$16 sm:$0xc0] %vm3_vm0, %v346_v28  }
  0x9f   :  { %970 = vst.msk [vmem:[%s2381_s1 + $0x6] ss:$16 sm:$0x3] %vm3_vm0, %v333_v29   ;;  %971 = vst.msk [vmem:[%s2381_s1 + $0x26] ss:$16 sm:$0xc] %vm3_vm0, %v333_v29  }
  0xa0   :  { %972 = vst.msk [vmem:[%s2381_s1 + $0x46] ss:$16 sm:$0x30] %vm3_vm0, %v333_v29   ;;  %973 = vst.msk [vmem:[%s2381_s1 + $0x66] ss:$16 sm:$0xc0] %vm3_vm0, %v333_v29   ;;  %v372_v30 = vpop.permute.xlu1 %371   ;;  %v359_v31 = vpop.permute.xlu0 %358  }
  0xa1   :  { %985 = vst.msk [vmem:[%s2381_s1 + $0x126] ss:$16 sm:$0x3] %vm3_vm0, %v372_v30   ;;  %986 = vst.msk [vmem:[%s2381_s1 + $0x146] ss:$16 sm:$0xc] %vm3_vm0, %v372_v30  }
  0xa2   :  { %987 = vst.msk [vmem:[%s2381_s1 + $0x166] ss:$16 sm:$0x30] %vm3_vm0, %v372_v30   ;;  %988 = vst.msk [vmem:[%s2381_s1 + $0x186] ss:$16 sm:$0xc0] %vm3_vm0, %v372_v30  }
  0xa3   :  { %980 = vst.msk [vmem:[%s2381_s1 + $0x26] ss:$16 sm:$0x3] %vm3_vm0, %v359_v31   ;;  %981 = vst.msk [vmem:[%s2381_s1 + $0x46] ss:$16 sm:$0xc] %vm3_vm0, %v359_v31  }
  0xa4   :  { %982 = vst.msk [vmem:[%s2381_s1 + $0x66] ss:$16 sm:$0x30] %vm3_vm0, %v359_v31   ;;  %983 = vst.msk [vmem:[%s2381_s1 + $0x86] ss:$16 sm:$0xc0] %vm3_vm0, %v359_v31   ;;  %v397_v32 = vpop.permute.xlu1 %396   ;;  %v384_v33 = vpop.permute.xlu0 %383  }
  0xa5   :  { %994 = vst.msk [vmem:[%s2381_s1 + $0x107] ss:$16 sm:$0x3] %vm3_vm0, %v397_v32   ;;  %995 = vst.msk [vmem:[%s2381_s1 + $0x127] ss:$16 sm:$0xc] %vm3_vm0, %v397_v32  }
  0xa6   :  { %996 = vst.msk [vmem:[%s2381_s1 + $0x147] ss:$16 sm:$0x30] %vm3_vm0, %v397_v32   ;;  %997 = vst.msk [vmem:[%s2381_s1 + $0x167] ss:$16 sm:$0xc0] %vm3_vm0, %v397_v32  }
  0xa7   :  { %989 = vst.msk [vmem:[%s2381_s1 + $0x7] ss:$16 sm:$0x3] %vm3_vm0, %v384_v33   ;;  %990 = vst.msk [vmem:[%s2381_s1 + $0x27] ss:$16 sm:$0xc] %vm3_vm0, %v384_v33  }
  0xa8   :  { %991 = vst.msk [vmem:[%s2381_s1 + $0x47] ss:$16 sm:$0x30] %vm3_vm0, %v384_v33   ;;  %992 = vst.msk [vmem:[%s2381_s1 + $0x67] ss:$16 sm:$0xc0] %vm3_vm0, %v384_v33   ;;  %v423_v34 = vpop.permute.xlu1 %422   ;;  %v410_v35 = vpop.permute.xlu0 %409  }
  0xa9   :  { %1004 = vst.msk [vmem:[%s2381_s1 + $0x127] ss:$16 sm:$0x3] %vm3_vm0, %v423_v34   ;;  %1005 = vst.msk [vmem:[%s2381_s1 + $0x147] ss:$16 sm:$0xc] %vm3_vm0, %v423_v34  }
  0xaa   :  { %1006 = vst.msk [vmem:[%s2381_s1 + $0x167] ss:$16 sm:$0x30] %vm3_vm0, %v423_v34   ;;  %1007 = vst.msk [vmem:[%s2381_s1 + $0x187] ss:$16 sm:$0xc0] %vm3_vm0, %v423_v34  }
  0xab   :  { %999 = vst.msk [vmem:[%s2381_s1 + $0x27] ss:$16 sm:$0x3] %vm3_vm0, %v410_v35   ;;  %1000 = vst.msk [vmem:[%s2381_s1 + $0x47] ss:$16 sm:$0xc] %vm3_vm0, %v410_v35  }
  0xac   :  { %1001 = vst.msk [vmem:[%s2381_s1 + $0x67] ss:$16 sm:$0x30] %vm3_vm0, %v410_v35   ;;  %1002 = vst.msk [vmem:[%s2381_s1 + $0x87] ss:$16 sm:$0xc0] %vm3_vm0, %v410_v35   ;;  %v448_v36 = vpop.permute.xlu1 %447   ;;  %v435_v37 = vpop.permute.xlu0 %434  }
  0xad   :  { %1013 = vst.msk [vmem:[%s2381_s1 + $0x108] ss:$16 sm:$0x3] %vm3_vm0, %v448_v36   ;;  %1014 = vst.msk [vmem:[%s2381_s1 + $0x128] ss:$16 sm:$0xc] %vm3_vm0, %v448_v36  }
  0xae   :  { %1015 = vst.msk [vmem:[%s2381_s1 + $0x148] ss:$16 sm:$0x30] %vm3_vm0, %v448_v36   ;;  %1016 = vst.msk [vmem:[%s2381_s1 + $0x168] ss:$16 sm:$0xc0] %vm3_vm0, %v448_v36  }
  0xaf   :  { %1008 = vst.msk [vmem:[%s2381_s1 + $0x8] ss:$16 sm:$0x3] %vm3_vm0, %v435_v37   ;;  %1009 = vst.msk [vmem:[%s2381_s1 + $0x28] ss:$16 sm:$0xc] %vm3_vm0, %v435_v37  }
  0xb0   :  { %1010 = vst.msk [vmem:[%s2381_s1 + $0x48] ss:$16 sm:$0x30] %vm3_vm0, %v435_v37   ;;  %1011 = vst.msk [vmem:[%s2381_s1 + $0x68] ss:$16 sm:$0xc0] %vm3_vm0, %v435_v37   ;;  %v474_v38 = vpop.permute.xlu1 %473   ;;  %v461_v39 = vpop.permute.xlu0 %460  }
  0xb1   :  { %1023 = vst.msk [vmem:[%s2381_s1 + $0x128] ss:$16 sm:$0x3] %vm3_vm0, %v474_v38   ;;  %1024 = vst.msk [vmem:[%s2381_s1 + $0x148] ss:$16 sm:$0xc] %vm3_vm0, %v474_v38  }
  0xb2   :  { %1025 = vst.msk [vmem:[%s2381_s1 + $0x168] ss:$16 sm:$0x30] %vm3_vm0, %v474_v38   ;;  %1026 = vst.msk [vmem:[%s2381_s1 + $0x188] ss:$16 sm:$0xc0] %vm3_vm0, %v474_v38  }
  0xb3   :  { %1018 = vst.msk [vmem:[%s2381_s1 + $0x28] ss:$16 sm:$0x3] %vm3_vm0, %v461_v39   ;;  %1019 = vst.msk [vmem:[%s2381_s1 + $0x48] ss:$16 sm:$0xc] %vm3_vm0, %v461_v39  }
  0xb4   :  { %1020 = vst.msk [vmem:[%s2381_s1 + $0x68] ss:$16 sm:$0x30] %vm3_vm0, %v461_v39   ;;  %1021 = vst.msk [vmem:[%s2381_s1 + $0x88] ss:$16 sm:$0xc0] %vm3_vm0, %v461_v39   ;;  %v499_v40 = vpop.permute.xlu1 %498   ;;  %v486_v41 = vpop.permute.xlu0 %485  }
  0xb5   :  { %1032 = vst.msk [vmem:[%s2381_s1 + $0x109] ss:$16 sm:$0x3] %vm3_vm0, %v499_v40   ;;  %1033 = vst.msk [vmem:[%s2381_s1 + $0x129] ss:$16 sm:$0xc] %vm3_vm0, %v499_v40  }
  0xb6   :  { %1034 = vst.msk [vmem:[%s2381_s1 + $0x149] ss:$16 sm:$0x30] %vm3_vm0, %v499_v40   ;;  %1035 = vst.msk [vmem:[%s2381_s1 + $0x169] ss:$16 sm:$0xc0] %vm3_vm0, %v499_v40  }
  0xb7   :  { %1027 = vst.msk [vmem:[%s2381_s1 + $0x9] ss:$16 sm:$0x3] %vm3_vm0, %v486_v41   ;;  %1028 = vst.msk [vmem:[%s2381_s1 + $0x29] ss:$16 sm:$0xc] %vm3_vm0, %v486_v41  }
  0xb8   :  { %1029 = vst.msk [vmem:[%s2381_s1 + $0x49] ss:$16 sm:$0x30] %vm3_vm0, %v486_v41   ;;  %1030 = vst.msk [vmem:[%s2381_s1 + $0x69] ss:$16 sm:$0xc0] %vm3_vm0, %v486_v41   ;;  %v525_v42 = vpop.permute.xlu1 %524   ;;  %v512_v43 = vpop.permute.xlu0 %511  }
  0xb9   :  { %1042 = vst.msk [vmem:[%s2381_s1 + $0x129] ss:$16 sm:$0x3] %vm3_vm0, %v525_v42   ;;  %1043 = vst.msk [vmem:[%s2381_s1 + $0x149] ss:$16 sm:$0xc] %vm3_vm0, %v525_v42  }
  0xba   :  { %1044 = vst.msk [vmem:[%s2381_s1 + $0x169] ss:$16 sm:$0x30] %vm3_vm0, %v525_v42   ;;  %1045 = vst.msk [vmem:[%s2381_s1 + $0x189] ss:$16 sm:$0xc0] %vm3_vm0, %v525_v42  }
  0xbb   :  { %1037 = vst.msk [vmem:[%s2381_s1 + $0x29] ss:$16 sm:$0x3] %vm3_vm0, %v512_v43   ;;  %1038 = vst.msk [vmem:[%s2381_s1 + $0x49] ss:$16 sm:$0xc] %vm3_vm0, %v512_v43  }
  0xbc   :  { %1039 = vst.msk [vmem:[%s2381_s1 + $0x69] ss:$16 sm:$0x30] %vm3_vm0, %v512_v43   ;;  %1040 = vst.msk [vmem:[%s2381_s1 + $0x89] ss:$16 sm:$0xc0] %vm3_vm0, %v512_v43   ;;  %v550_v44 = vpop.permute.xlu1 %549   ;;  %v537_v45 = vpop.permute.xlu0 %536  }
  0xbd   :  { %1051 = vst.msk [vmem:[%s2381_s1 + $0x10a] ss:$16 sm:$0x3] %vm3_vm0, %v550_v44   ;;  %1052 = vst.msk [vmem:[%s2381_s1 + $0x12a] ss:$16 sm:$0xc] %vm3_vm0, %v550_v44  }
  0xbe   :  { %1053 = vst.msk [vmem:[%s2381_s1 + $0x14a] ss:$16 sm:$0x30] %vm3_vm0, %v550_v44   ;;  %1054 = vst.msk [vmem:[%s2381_s1 + $0x16a] ss:$16 sm:$0xc0] %vm3_vm0, %v550_v44  }
  0xbf   :  { %1046 = vst.msk [vmem:[%s2381_s1 + $0xa] ss:$16 sm:$0x3] %vm3_vm0, %v537_v45   ;;  %1047 = vst.msk [vmem:[%s2381_s1 + $0x2a] ss:$16 sm:$0xc] %vm3_vm0, %v537_v45  }
  0xc0   :  { %1048 = vst.msk [vmem:[%s2381_s1 + $0x4a] ss:$16 sm:$0x30] %vm3_vm0, %v537_v45   ;;  %1049 = vst.msk [vmem:[%s2381_s1 + $0x6a] ss:$16 sm:$0xc0] %vm3_vm0, %v537_v45   ;;  %v576_v46 = vpop.permute.xlu1 %575   ;;  %v563_v47 = vpop.permute.xlu0 %562  }
  0xc1   :  { %1061 = vst.msk [vmem:[%s2381_s1 + $0x12a] ss:$16 sm:$0x3] %vm3_vm0, %v576_v46   ;;  %1062 = vst.msk [vmem:[%s2381_s1 + $0x14a] ss:$16 sm:$0xc] %vm3_vm0, %v576_v46  }
  0xc2   :  { %1063 = vst.msk [vmem:[%s2381_s1 + $0x16a] ss:$16 sm:$0x30] %vm3_vm0, %v576_v46   ;;  %1064 = vst.msk [vmem:[%s2381_s1 + $0x18a] ss:$16 sm:$0xc0] %vm3_vm0, %v576_v46  }
  0xc3   :  { %1056 = vst.msk [vmem:[%s2381_s1 + $0x2a] ss:$16 sm:$0x3] %vm3_vm0, %v563_v47   ;;  %1057 = vst.msk [vmem:[%s2381_s1 + $0x4a] ss:$16 sm:$0xc] %vm3_vm0, %v563_v47  }
  0xc4   :  { %1058 = vst.msk [vmem:[%s2381_s1 + $0x6a] ss:$16 sm:$0x30] %vm3_vm0, %v563_v47   ;;  %1059 = vst.msk [vmem:[%s2381_s1 + $0x8a] ss:$16 sm:$0xc0] %vm3_vm0, %v563_v47   ;;  %v601_v48 = vpop.permute.xlu1 %600   ;;  %v588_v49 = vpop.permute.xlu0 %587  }
  0xc5   :  { %1070 = vst.msk [vmem:[%s2381_s1 + $0x10b] ss:$16 sm:$0x3] %vm3_vm0, %v601_v48   ;;  %1071 = vst.msk [vmem:[%s2381_s1 + $0x12b] ss:$16 sm:$0xc] %vm3_vm0, %v601_v48  }
  0xc6   :  { %1072 = vst.msk [vmem:[%s2381_s1 + $0x14b] ss:$16 sm:$0x30] %vm3_vm0, %v601_v48   ;;  %1073 = vst.msk [vmem:[%s2381_s1 + $0x16b] ss:$16 sm:$0xc0] %vm3_vm0, %v601_v48  }
  0xc7   :  { %1065 = vst.msk [vmem:[%s2381_s1 + $0xb] ss:$16 sm:$0x3] %vm3_vm0, %v588_v49   ;;  %1066 = vst.msk [vmem:[%s2381_s1 + $0x2b] ss:$16 sm:$0xc] %vm3_vm0, %v588_v49  }
  0xc8   :  { %1067 = vst.msk [vmem:[%s2381_s1 + $0x4b] ss:$16 sm:$0x30] %vm3_vm0, %v588_v49   ;;  %1068 = vst.msk [vmem:[%s2381_s1 + $0x6b] ss:$16 sm:$0xc0] %vm3_vm0, %v588_v49   ;;  %v627_v50 = vpop.permute.xlu1 %626   ;;  %v614_v51 = vpop.permute.xlu0 %613  }
  0xc9   :  { %1080 = vst.msk [vmem:[%s2381_s1 + $0x12b] ss:$16 sm:$0x3] %vm3_vm0, %v627_v50   ;;  %1081 = vst.msk [vmem:[%s2381_s1 + $0x14b] ss:$16 sm:$0xc] %vm3_vm0, %v627_v50  }
  0xca   :  { %1082 = vst.msk [vmem:[%s2381_s1 + $0x16b] ss:$16 sm:$0x30] %vm3_vm0, %v627_v50   ;;  %1083 = vst.msk [vmem:[%s2381_s1 + $0x18b] ss:$16 sm:$0xc0] %vm3_vm0, %v627_v50  }
  0xcb   :  { %1075 = vst.msk [vmem:[%s2381_s1 + $0x2b] ss:$16 sm:$0x3] %vm3_vm0, %v614_v51   ;;  %1076 = vst.msk [vmem:[%s2381_s1 + $0x4b] ss:$16 sm:$0xc] %vm3_vm0, %v614_v51  }
  0xcc   :  { %1077 = vst.msk [vmem:[%s2381_s1 + $0x6b] ss:$16 sm:$0x30] %vm3_vm0, %v614_v51   ;;  %1078 = vst.msk [vmem:[%s2381_s1 + $0x8b] ss:$16 sm:$0xc0] %vm3_vm0, %v614_v51   ;;  %v652_v52 = vpop.permute.xlu1 %651   ;;  %v639_v53 = vpop.permute.xlu0 %638  }
  0xcd   :  { %1089 = vst.msk [vmem:[%s2381_s1 + $0x10c] ss:$16 sm:$0x3] %vm3_vm0, %v652_v52   ;;  %1090 = vst.msk [vmem:[%s2381_s1 + $0x12c] ss:$16 sm:$0xc] %vm3_vm0, %v652_v52  }
  0xce   :  { %1091 = vst.msk [vmem:[%s2381_s1 + $0x14c] ss:$16 sm:$0x30] %vm3_vm0, %v652_v52   ;;  %1092 = vst.msk [vmem:[%s2381_s1 + $0x16c] ss:$16 sm:$0xc0] %vm3_vm0, %v652_v52  }
  0xcf   :  { %1084 = vst.msk [vmem:[%s2381_s1 + $0xc] ss:$16 sm:$0x3] %vm3_vm0, %v639_v53   ;;  %1085 = vst.msk [vmem:[%s2381_s1 + $0x2c] ss:$16 sm:$0xc] %vm3_vm0, %v639_v53  }
  0xd0   :  { %1086 = vst.msk [vmem:[%s2381_s1 + $0x4c] ss:$16 sm:$0x30] %vm3_vm0, %v639_v53   ;;  %1087 = vst.msk [vmem:[%s2381_s1 + $0x6c] ss:$16 sm:$0xc0] %vm3_vm0, %v639_v53   ;;  %v678_v54 = vpop.permute.xlu1 %677   ;;  %v665_v55 = vpop.permute.xlu0 %664  }
  0xd1   :  { %1099 = vst.msk [vmem:[%s2381_s1 + $0x12c] ss:$16 sm:$0x3] %vm3_vm0, %v678_v54   ;;  %1100 = vst.msk [vmem:[%s2381_s1 + $0x14c] ss:$16 sm:$0xc] %vm3_vm0, %v678_v54  }
  0xd2   :  { %1101 = vst.msk [vmem:[%s2381_s1 + $0x16c] ss:$16 sm:$0x30] %vm3_vm0, %v678_v54   ;;  %1102 = vst.msk [vmem:[%s2381_s1 + $0x18c] ss:$16 sm:$0xc0] %vm3_vm0, %v678_v54  }
  0xd3   :  { %1094 = vst.msk [vmem:[%s2381_s1 + $0x2c] ss:$16 sm:$0x3] %vm3_vm0, %v665_v55   ;;  %1095 = vst.msk [vmem:[%s2381_s1 + $0x4c] ss:$16 sm:$0xc] %vm3_vm0, %v665_v55  }
  0xd4   :  { %1096 = vst.msk [vmem:[%s2381_s1 + $0x6c] ss:$16 sm:$0x30] %vm3_vm0, %v665_v55   ;;  %1097 = vst.msk [vmem:[%s2381_s1 + $0x8c] ss:$16 sm:$0xc0] %vm3_vm0, %v665_v55   ;;  %v703_v56 = vpop.permute.xlu1 %702   ;;  %v690_v57 = vpop.permute.xlu0 %689  }
  0xd5   :  { %1108 = vst.msk [vmem:[%s2381_s1 + $0x10d] ss:$16 sm:$0x3] %vm3_vm0, %v703_v56   ;;  %1109 = vst.msk [vmem:[%s2381_s1 + $0x12d] ss:$16 sm:$0xc] %vm3_vm0, %v703_v56  }
  0xd6   :  { %1110 = vst.msk [vmem:[%s2381_s1 + $0x14d] ss:$16 sm:$0x30] %vm3_vm0, %v703_v56   ;;  %1111 = vst.msk [vmem:[%s2381_s1 + $0x16d] ss:$16 sm:$0xc0] %vm3_vm0, %v703_v56  }
  0xd7   :  { %1103 = vst.msk [vmem:[%s2381_s1 + $0xd] ss:$16 sm:$0x3] %vm3_vm0, %v690_v57   ;;  %1104 = vst.msk [vmem:[%s2381_s1 + $0x2d] ss:$16 sm:$0xc] %vm3_vm0, %v690_v57  }
  0xd8   :  { %1105 = vst.msk [vmem:[%s2381_s1 + $0x4d] ss:$16 sm:$0x30] %vm3_vm0, %v690_v57   ;;  %1106 = vst.msk [vmem:[%s2381_s1 + $0x6d] ss:$16 sm:$0xc0] %vm3_vm0, %v690_v57   ;;  %v729_v58 = vpop.permute.xlu1 %728   ;;  %v716_v59 = vpop.permute.xlu0 %715  }
  0xd9   :  { %1118 = vst.msk [vmem:[%s2381_s1 + $0x12d] ss:$16 sm:$0x3] %vm3_vm0, %v729_v58   ;;  %1119 = vst.msk [vmem:[%s2381_s1 + $0x14d] ss:$16 sm:$0xc] %vm3_vm0, %v729_v58  }
  0xda   :  { %1120 = vst.msk [vmem:[%s2381_s1 + $0x16d] ss:$16 sm:$0x30] %vm3_vm0, %v729_v58   ;;  %1121 = vst.msk [vmem:[%s2381_s1 + $0x18d] ss:$16 sm:$0xc0] %vm3_vm0, %v729_v58  }
  0xdb   :  { %1113 = vst.msk [vmem:[%s2381_s1 + $0x2d] ss:$16 sm:$0x3] %vm3_vm0, %v716_v59   ;;  %1114 = vst.msk [vmem:[%s2381_s1 + $0x4d] ss:$16 sm:$0xc] %vm3_vm0, %v716_v59  }
  0xdc   :  { %1115 = vst.msk [vmem:[%s2381_s1 + $0x6d] ss:$16 sm:$0x30] %vm3_vm0, %v716_v59   ;;  %1116 = vst.msk [vmem:[%s2381_s1 + $0x8d] ss:$16 sm:$0xc0] %vm3_vm0, %v716_v59   ;;  %v754_v60 = vpop.permute.xlu1 %753   ;;  %v741_v61 = vpop.permute.xlu0 %740  }
  0xdd   :  { %1127 = vst.msk [vmem:[%s2381_s1 + $0x10e] ss:$16 sm:$0x3] %vm3_vm0, %v754_v60   ;;  %1128 = vst.msk [vmem:[%s2381_s1 + $0x12e] ss:$16 sm:$0xc] %vm3_vm0, %v754_v60  }
  0xde   :  { %1129 = vst.msk [vmem:[%s2381_s1 + $0x14e] ss:$16 sm:$0x30] %vm3_vm0, %v754_v60   ;;  %1130 = vst.msk [vmem:[%s2381_s1 + $0x16e] ss:$16 sm:$0xc0] %vm3_vm0, %v754_v60  }
  0xdf   :  { %1122 = vst.msk [vmem:[%s2381_s1 + $0xe] ss:$16 sm:$0x3] %vm3_vm0, %v741_v61   ;;  %1123 = vst.msk [vmem:[%s2381_s1 + $0x2e] ss:$16 sm:$0xc] %vm3_vm0, %v741_v61  }
  0xe0   :  { %1124 = vst.msk [vmem:[%s2381_s1 + $0x4e] ss:$16 sm:$0x30] %vm3_vm0, %v741_v61   ;;  %1125 = vst.msk [vmem:[%s2381_s1 + $0x6e] ss:$16 sm:$0xc0] %vm3_vm0, %v741_v61   ;;  %v780_v62 = vpop.permute.xlu1 %779   ;;  %v767_v63 = vpop.permute.xlu0 %766  }
  0xe1   :  { %1137 = vst.msk [vmem:[%s2381_s1 + $0x12e] ss:$16 sm:$0x3] %vm3_vm0, %v780_v62   ;;  %1138 = vst.msk [vmem:[%s2381_s1 + $0x14e] ss:$16 sm:$0xc] %vm3_vm0, %v780_v62  }
  0xe2   :  { %1139 = vst.msk [vmem:[%s2381_s1 + $0x16e] ss:$16 sm:$0x30] %vm3_vm0, %v780_v62   ;;  %1140 = vst.msk [vmem:[%s2381_s1 + $0x18e] ss:$16 sm:$0xc0] %vm3_vm0, %v780_v62  }
  0xe3   :  { %1132 = vst.msk [vmem:[%s2381_s1 + $0x2e] ss:$16 sm:$0x3] %vm3_vm0, %v767_v63   ;;  %1133 = vst.msk [vmem:[%s2381_s1 + $0x4e] ss:$16 sm:$0xc] %vm3_vm0, %v767_v63  }
  0xe4   :  { %1134 = vst.msk [vmem:[%s2381_s1 + $0x6e] ss:$16 sm:$0x30] %vm3_vm0, %v767_v63   ;;  %1135 = vst.msk [vmem:[%s2381_s1 + $0x8e] ss:$16 sm:$0xc0] %vm3_vm0, %v767_v63   ;;  %v805_v0 = vpop.permute.xlu1 %804   ;;  %v792_v1 = vpop.permute.xlu0 %791  }
  0xe5   :  { %1146 = vst.msk [vmem:[%s2381_s1 + $0x10f] ss:$16 sm:$0x3] %vm3_vm0, %v805_v0   ;;  %1147 = vst.msk [vmem:[%s2381_s1 + $0x12f] ss:$16 sm:$0xc] %vm3_vm0, %v805_v0  }
  0xe6   :  { %1148 = vst.msk [vmem:[%s2381_s1 + $0x14f] ss:$16 sm:$0x30] %vm3_vm0, %v805_v0   ;;  %1149 = vst.msk [vmem:[%s2381_s1 + $0x16f] ss:$16 sm:$0xc0] %vm3_vm0, %v805_v0  }
  0xe7   :  { %1141 = vst.msk [vmem:[%s2381_s1 + $0xf] ss:$16 sm:$0x3] %vm3_vm0, %v792_v1   ;;  %1142 = vst.msk [vmem:[%s2381_s1 + $0x2f] ss:$16 sm:$0xc] %vm3_vm0, %v792_v1  }
  0xe8   :  { %1143 = vst.msk [vmem:[%s2381_s1 + $0x4f] ss:$16 sm:$0x30] %vm3_vm0, %v792_v1   ;;  %1144 = vst.msk [vmem:[%s2381_s1 + $0x6f] ss:$16 sm:$0xc0] %vm3_vm0, %v792_v1   ;;  %v831_v2 = vpop.permute.xlu1 %830   ;;  %v818_v3 = vpop.permute.xlu0 %817  }
  0xe9   :  { %1156 = vst.msk [vmem:[%s2381_s1 + $0x12f] ss:$16 sm:$0x3] %vm3_vm0, %v831_v2   ;;  %1157 = vst.msk [vmem:[%s2381_s1 + $0x14f] ss:$16 sm:$0xc] %vm3_vm0, %v831_v2  }
  0xea   :  { %1158 = vst.msk [vmem:[%s2381_s1 + $0x16f] ss:$16 sm:$0x30] %vm3_vm0, %v831_v2   ;;  %1159 = vst.msk [vmem:[%s2381_s1 + $0x18f] ss:$16 sm:$0xc0] %vm3_vm0, %v831_v2  }
  0xeb   :  { %1151 = vst.msk [vmem:[%s2381_s1 + $0x2f] ss:$16 sm:$0x3] %vm3_vm0, %v818_v3   ;;  %1152 = vst.msk [vmem:[%s2381_s1 + $0x4f] ss:$16 sm:$0xc] %vm3_vm0, %v818_v3  }
  0xec   :  { %1153 = vst.msk [vmem:[%s2381_s1 + $0x6f] ss:$16 sm:$0x30] %vm3_vm0, %v818_v3   ;;  %1154 = vst.msk [vmem:[%s2381_s1 + $0x8f] ss:$16 sm:$0xc0] %vm3_vm0, %v818_v3  }

// kernel: hourglass_1_forward.28
= control target key start
LH: loop header
LB: loop body
LE: loop exit
PB: predicated region body
PF: predicated region fallthrough
CT: control target
= control target key end

     0   :  { %s1000_s12 = smov 0   ;;  %s1002_s13 = smov 0   ;;  %s1179_s0 = inlined_call_operand.vmem [shape: bf16[1,8,256], index: 0, kind: input, shape index: {}]   ;;  %s1180_s1 = inlined_call_operand.vmem [shape: bf16[1,256,512], index: 1, kind: input, shape index: {}]   ;;  %s1181_s2 = inlined_call_operand.vmem [shape: f32[8,1], index: 2, kind: input, shape index: {}]   ;;  %s1182_s3 = inlined_call_operand.vmem [shape: f32[1,8,512], index: 3, kind: output, shape index: {}]  }
   0x1   :  { %s1004_s14 = smov 0   ;;  %s1006_s15 = smov 0  }
   0x2   :  { %s1008_s16 = smov 0  }
   0x3 LB: > { %s28_s17 = sadd.s32 1, %s973_s15  ;;  %p78_p1 = scmp.ne.s32.totalorder %s965_s13, %s961_s12  ;;  %s977_s16 = sphi %s1008_s16, %s13_s16   ;;  %s973_s15 = sphi %s1006_s15, %s1186_s15   ;;  %s969_s14 = sphi %s1004_s14, %s1185_s14   ;;  %s965_s13 = sphi %s1002_s13, %s1184_s13   ;;  %s961_s12 = sphi %s1000_s12, %s1183_s12  }
   0x4   : > { %p30_p0 = scmp.ge.s32.totalorder %s28_s17, 2  ;;  %p79_p2 = scmp.eq.s32.totalorder %s977_s16, 0 }
   0x5   : > { %s71_s19 = sadd.s32 1, %s965_s13  ;;  %p802_p5 = scmp.ge.s32.totalorder %s977_s16, 2 }
   0x6   : > { %s1188_s17 = smov (%p30_p0, %s28_s17), 0  ;;  %p80_p3 = por %p79_p2, %p78_p1 }
   0x7   : > { %s67_s18 = ssub.s32 %s973_s15, %s1188_s17  ;;  %169 = sbr.rel (%p802_p5) target bundleno = 32 (0x20), region = 24 }
   0x8   : > { %p69_p4 = scmp.eq.s32.totalorder %s67_s18, 0 }
   0xa   : > { %s1035_s20 = scalar_select %p69_p4, %s965_s13, %s71_s19  }
   0xc   : > { %172 = sbr.rel (!%p80_p3) target bundleno = 32 (0x20), region = 28  ;;  %s174_s21 = sand.u32 (%p80_p3), 1, %s965_s13  }
   0xd   : > { %s846_s22 = sshll.u32 (%p80_p3), %s973_s15, 3  ;;  %s803_s23 = sshll.u32 (%p80_p3), %s174_s21, 8 }
   0xe   : > { %s1043_s26 = scalar_lea.vmem (%p80_p3), %s1180_s1, %s846_s22  ;;  %s1048_s27 = scalar_lea.vmem (%p80_p3), [#allocation3], %s803_s23 }
   0xf   : > { %v275_v0 = vld [vmem:[%s1043_s26] sm:$0xff] (%p80_p3)  ;;  %v277_v1 = vld [vmem:[%s1043_s26 + $0x10] sm:$0xff] (%p80_p3) }
  0x10   : > { %v279_v2 = vld [vmem:[%s1043_s26 + $0x20] sm:$0xff] (%p80_p3)  ;;  %276 = vst [vmem:[%s1048_s27] sm:$0xff] (%p80_p3), %v275_v0  ;;  %278 = vst [vmem:[%s1048_s27 + $0x8] sm:$0xff] (%p80_p3), %v277_v1  ;;  %v281_v3 = vld [vmem:[%s1043_s26 + $0x30] sm:$0xff] (%p80_p3) }
  0x11   : > { %280 = vst [vmem:[%s1048_s27 + $0x10] sm:$0xff] %v279_v2  ;;  %v283_v4 = vld [vmem:[%s1043_s26 + $0x40] sm:$0xff]  ;;  %v285_v5 = vld [vmem:[%s1043_s26 + $0x50] sm:$0xff]  ;;  %282 = vst [vmem:[%s1048_s27 + $0x18] sm:$0xff] %v281_v3 }
  0x12   : > { %284 = vst [vmem:[%s1048_s27 + $0x20] sm:$0xff] %v283_v4  ;;  %286 = vst [vmem:[%s1048_s27 + $0x28] sm:$0xff] %v285_v5  ;;  %v287_v6 = vld [vmem:[%s1043_s26 + $0x60] sm:$0xff]  ;;  %v289_v7 = vld [vmem:[%s1043_s26 + $0x70] sm:$0xff] }
  0x13   : > { %v291_v8 = vld [vmem:[%s1043_s26 + $0x80] sm:$0xff]  ;;  %288 = vst [vmem:[%s1048_s27 + $0x30] sm:$0xff] %v287_v6  ;;  %290 = vst [vmem:[%s1048_s27 + $0x38] sm:$0xff] %v289_v7  ;;  %v293_v9 = vld [vmem:[%s1043_s26 + $0x90] sm:$0xff] }
  0x14   : > { %292 = vst [vmem:[%s1048_s27 + $0x40] sm:$0xff] %v291_v8  ;;  %v295_v10 = vld [vmem:[%s1043_s26 + $0xa0] sm:$0xff]  ;;  %v297_v11 = vld [vmem:[%s1043_s26 + $0xb0] sm:$0xff]  ;;  %294 = vst [vmem:[%s1048_s27 + $0x48] sm:$0xff] %v293_v9 }
  0x15   : > { %296 = vst [vmem:[%s1048_s27 + $0x50] sm:$0xff] %v295_v10  ;;  %298 = vst [vmem:[%s1048_s27 + $0x58] sm:$0xff] %v297_v11  ;;  %v299_v12 = vld [vmem:[%s1043_s26 + $0xc0] sm:$0xff]  ;;  %v301_v13 = vld [vmem:[%s1043_s26 + $0xd0] sm:$0xff] }
  0x16   : > { %v303_v14 = vld [vmem:[%s1043_s26 + $0xe0] sm:$0xff]  ;;  %300 = vst [vmem:[%s1048_s27 + $0x60] sm:$0xff] %v299_v12  ;;  %302 = vst [vmem:[%s1048_s27 + $0x68] sm:$0xff] %v301_v13  ;;  %v305_v15 = vld [vmem:[%s1043_s26 + $0xf0] sm:$0xff] }
  0x17   : > { %304 = vst [vmem:[%s1048_s27 + $0x70] sm:$0xff] %v303_v14  ;;  %v307_v16 = vld [vmem:[%s1043_s26 + $0x100] sm:$0xff]  ;;  %v309_v17 = vld [vmem:[%s1043_s26 + $0x110] sm:$0xff]  ;;  %306 = vst [vmem:[%s1048_s27 + $0x78] sm:$0xff] %v305_v15 }
  0x18   : > { %308 = vst [vmem:[%s1048_s27 + $0x80] sm:$0xff] %v307_v16  ;;  %310 = vst [vmem:[%s1048_s27 + $0x88] sm:$0xff] %v309_v17  ;;  %v311_v18 = vld [vmem:[%s1043_s26 + $0x120] sm:$0xff]  ;;  %v313_v19 = vld [vmem:[%s1043_s26 + $0x130] sm:$0xff] }
  0x19   : > { %v315_v20 = vld [vmem:[%s1043_s26 + $0x140] sm:$0xff]  ;;  %312 = vst [vmem:[%s1048_s27 + $0x90] sm:$0xff] %v311_v18  ;;  %314 = vst [vmem:[%s1048_s27 + $0x98] sm:$0xff] %v313_v19  ;;  %v317_v21 = vld [vmem:[%s1043_s26 + $0x150] sm:$0xff] }
  0x1a   : > { %316 = vst [vmem:[%s1048_s27 + $0xa0] sm:$0xff] %v315_v20  ;;  %v319_v22 = vld [vmem:[%s1043_s26 + $0x160] sm:$0xff]  ;;  %v321_v23 = vld [vmem:[%s1043_s26 + $0x170] sm:$0xff]  ;;  %318 = vst [vmem:[%s1048_s27 + $0xa8] sm:$0xff] %v317_v21 }
  0x1b   : > { %320 = vst [vmem:[%s1048_s27 + $0xb0] sm:$0xff] %v319_v22  ;;  %322 = vst [vmem:[%s1048_s27 + $0xb8] sm:$0xff] %v321_v23  ;;  %v323_v24 = vld [vmem:[%s1043_s26 + $0x180] sm:$0xff]  ;;  %v325_v25 = vld [vmem:[%s1043_s26 + $0x190] sm:$0xff] }
  0x1c   : > { %v327_v26 = vld [vmem:[%s1043_s26 + $0x1a0] sm:$0xff]  ;;  %324 = vst [vmem:[%s1048_s27 + $0xc0] sm:$0xff] %v323_v24  ;;  %326 = vst [vmem:[%s1048_s27 + $0xc8] sm:$0xff] %v325_v25  ;;  %v329_v27 = vld [vmem:[%s1043_s26 + $0x1b0] sm:$0xff] }
  0x1d   : > { %328 = vst [vmem:[%s1048_s27 + $0xd0] sm:$0xff] %v327_v26  ;;  %v331_v28 = vld [vmem:[%s1043_s26 + $0x1c0] sm:$0xff]  ;;  %v333_v29 = vld [vmem:[%s1043_s26 + $0x1d0] sm:$0xff]  ;;  %330 = vst [vmem:[%s1048_s27 + $0xd8] sm:$0xff] %v329_v27 }
  0x1e   : > { %332 = vst [vmem:[%s1048_s27 + $0xe0] sm:$0xff] %v331_v28  ;;  %334 = vst [vmem:[%s1048_s27 + $0xe8] sm:$0xff] %v333_v29  ;;  %v335_v30 = vld [vmem:[%s1043_s26 + $0x1e0] sm:$0xff]  ;;  %v337_v31 = vld [vmem:[%s1043_s26 + $0x1f0] sm:$0xff] }
  0x1f   : > { %336 = vst [vmem:[%s1048_s27 + $0xf0] sm:$0xff] %v335_v30  ;;  %338 = vst [vmem:[%s1048_s27 + $0xf8] sm:$0xff] %v337_v31 }
  0x20 PF: > { %p806_p6 = scmp.ge.s32.totalorder %s977_s16, 1  ;;  %p343_p7 = scmp.lt.s32.totalorder %s977_s16, 3 }
  0x22   : > { %p344_p8 = pnand %p806_p6, %p343_p7 }
  0x23   : > { %s350_s28 = sand.u32 (!%p344_p8), 1, %s961_s12   ;;  %s808_s8 = sshll.u32 (!%p344_p8), %s969_s14, 1 }
  0x24   : > { %347 = sbr.rel (%p344_p8) target bundleno = 307 (0x133), region = 66  ;;  %s807_s6 = sshll.u32 (!%p344_p8), %s350_s28, 8 }
  0x25   : > { %s1124_s7 = scalar_lea.vmem (!%p344_p8), [#allocation3], %s807_s6  ;;  %p401_p9 = scmp.lt.s32.totalorder (!%p344_p8), %s808_s8, 3 }
  0x29   : > { %v1117_v32 = vld [vmem:[%s1179_s0] sm:$0xff]  ;;  %v979_v35 = vmov 0   ;;  %v889_v36 = vld [vmem:[%s1124_s7 + $0x74] ss:$8 sps:$4 sm:$0xff]   ;;  %v891_v37 = vld [vmem:[%s1124_s7 + $0x70] ss:$8 sps:$4 sm:$0xff]  }
  0x2a   : > { %v666_v33 = vld [vmem:[%s1181_s2] sm:$0xff]  ;;  %v811_v34 = vcombine.high %v1117_v32, %v1117_v32  ;;  %888 = vset.pattern.permute.xlu0 %v979_v35  ;;  %616 = vmatprep.subr.bf16.mxu0 %v889_v36  ;;  %v895_v40 = vld [vmem:[%s1124_s7 + $0x54] ss:$8 sps:$4 sm:$0xff]   ;;  %v897_v41 = vld [vmem:[%s1124_s7 + $0x50] ss:$8 sps:$4 sm:$0xff]   ;;  %v810_v4 = vcombine.low %v1117_v32, %v1117_v32  ;;  %s1190_s8 = smov (!%p401_p9, %s808_s8), 3 }
  0x2b   : > { %669 = vperm.xlu0 %888, %v666_v33   ;;  %v892_v38 = vld [vmem:[%s1124_s7 + $0x64] ss:$8 sps:$4 sm:$0xff]   ;;  %617 = vmatpush1.bf16.msra.mxu0 %v891_v37  ;;  %v894_v39 = vld [vmem:[%s1124_s7 + $0x60] ss:$8 sps:$4 sm:$0xff]   ;;  %v901_v44 = vld [vmem:[%s1124_s7 + $0x34] ss:$8 sps:$4 sm:$0xff]  }
  0x2c   : > { %648 = vmatprep.mubr.bf16.mxu0 %v811_v34  ;;  %618 = vmatprep.subr.bf16.mxu0 %v892_v38  ;;  %v898_v42 = vld [vmem:[%s1124_s7 + $0x44] ss:$8 sps:$4 sm:$0xff]   ;;  %v900_v43 = vld [vmem:[%s1124_s7 + $0x40] ss:$8 sps:$4 sm:$0xff]   ;;  %v903_v45 = vld [vmem:[%s1124_s7 + $0x30] ss:$8 sps:$4 sm:$0xff]  }
  0x2d   : > { %v904_v46 = vld [vmem:[%s1124_s7 + $0x24] ss:$8 sps:$4 sm:$0xff]   ;;  %v906_v47 = vld [vmem:[%s1124_s7 + $0x20] ss:$8 sps:$4 sm:$0xff]   ;;  %v907_v48 = vld [vmem:[%s1124_s7 + $0x14] ss:$8 sps:$4 sm:$0xff]  }
  0x2e   : > { %v909_v49 = vld [vmem:[%s1124_s7 + $0x10] ss:$8 sps:$4 sm:$0xff]   ;;  %v910_v50 = vld [vmem:[%s1124_s7 + $0x4] ss:$8 sps:$4 sm:$0xff]   ;;  %v912_v51 = vld [vmem:[%s1124_s7] ss:$8 sps:$4 sm:$0xff]  }
  0x2f   : > { %619 = vmatpush1.bf16.msra.mxu0 %v894_v39  ;;  %v913_v52 = vld [vmem:[%s1124_s7 + $0xf4] ss:$8 sps:$4 sm:$0xff]   ;;  %v915_v53 = vld [vmem:[%s1124_s7 + $0xf0] ss:$8 sps:$4 sm:$0xff]   ;;  %v916_v54 = vld [vmem:[%s1124_s7 + $0xe4] ss:$8 sps:$4 sm:$0xff]  }
  0x30   : > { %620 = vmatprep.subr.bf16.mxu0 %v895_v40  ;;  %v918_v55 = vld [vmem:[%s1124_s7 + $0xe0] ss:$8 sps:$4 sm:$0xff]   ;;  %v919_v56 = vld [vmem:[%s1124_s7 + $0xd4] ss:$8 sps:$4 sm:$0xff]   ;;  %v921_v57 = vld [vmem:[%s1124_s7 + $0xd0] ss:$8 sps:$4 sm:$0xff]  }
  0x31   : > { %v922_v58 = vld [vmem:[%s1124_s7 + $0xc4] ss:$8 sps:$4 sm:$0xff]   ;;  %v924_v59 = vld [vmem:[%s1124_s7 + $0xc0] ss:$8 sps:$4 sm:$0xff]   ;;  %v925_v60 = vld [vmem:[%s1124_s7 + $0xb4] ss:$8 sps:$4 sm:$0xff]  }
  0x32   : > { %v927_v61 = vld [vmem:[%s1124_s7 + $0xb0] ss:$8 sps:$4 sm:$0xff]   ;;  %v928_v62 = vld [vmem:[%s1124_s7 + $0xa4] ss:$8 sps:$4 sm:$0xff]   ;;  %v930_v63 = vld [vmem:[%s1124_s7 + $0xa0] ss:$8 sps:$4 sm:$0xff]  }
  0x33   : > { %621 = vmatpush1.bf16.msra.mxu0 %v897_v41  ;;  %v931_v0 = vld [vmem:[%s1124_s7 + $0x94] ss:$8 sps:$4 sm:$0xff]   ;;  %v933_v1 = vld [vmem:[%s1124_s7 + $0x90] ss:$8 sps:$4 sm:$0xff]   ;;  %v934_v2 = vld [vmem:[%s1124_s7 + $0x84] ss:$8 sps:$4 sm:$0xff]  }
  0x34   : > { %622 = vmatprep.subr.bf16.mxu0 %v898_v42  ;;  %v936_v3 = vld [vmem:[%s1124_s7 + $0x80] ss:$8 sps:$4 sm:$0xff]   ;;  %s809_s9 = sshll.u32 %s1190_s8, 3 }
  0x35   : > { %s406_s12 = scalar_lea.vmem %s1182_s3, %s809_s9 }
  0x37   : > { %623 = vmatpush1.bf16.msra.mxu0 %v900_v43 }
  0x38   : > { %624 = vmatprep.subr.bf16.mxu0 %v901_v44 }
  0x3b   : > { %625 = vmatpush1.bf16.msra.mxu0 %v903_v45 }
  0x3c   : > { %626 = vmatprep.subr.bf16.mxu0 %v904_v46 }
  0x3f   : > { %627 = vmatpush1.bf16.msra.mxu0 %v906_v47 }
  0x40   : > { %628 = vmatprep.subr.bf16.mxu0 %v907_v48 }
  0x43   : > { %629 = vmatpush1.bf16.msra.mxu0 %v909_v49 }
  0x44   : > { %630 = vmatprep.subr.bf16.mxu0 %v910_v50 }
  0x47   : > { %631 = vmatpush1.bf16.msra.mxu0 %v912_v51 }
  0x48   : > { %632 = vmatprep.subr.bf16.mxu0 %v913_v52 }
  0x4b   : > { %633 = vmatpush2.bf16.msra.mxu0 %v915_v53 }
  0x4c   : > { %634 = vmatprep.subr.bf16.mxu0 %v916_v54 }
  0x4f   : > { %635 = vmatpush2.bf16.msra.mxu0 %v918_v55 }
  0x50   : > { %636 = vmatprep.subr.bf16.mxu0 %v919_v56 }
  0x53   : > { %637 = vmatpush2.bf16.msra.mxu0 %v921_v57 }
  0x54   : > { %638 = vmatprep.subr.bf16.mxu0 %v922_v58 }
  0x57   : > { %639 = vmatpush2.bf16.msra.mxu0 %v924_v59 }
  0x58   : > { %640 = vmatprep.subr.bf16.mxu0 %v925_v60 }
  0x5b   : > { %641 = vmatpush2.bf16.msra.mxu0 %v927_v61 }
  0x5c   : > { %642 = vmatprep.subr.bf16.mxu0 %v928_v62 }
  0x5f   : > { %643 = vmatpush2.bf16.msra.mxu0 %v930_v63 }
  0x60   : > { %644 = vmatprep.subr.bf16.mxu0 %v931_v0 }
  0x63   : > { %645 = vmatpush2.bf16.msra.mxu0 %v933_v1 }
  0x64   : > { %646 = vmatprep.subr.bf16.mxu0 %v934_v2 }
  0x67   : > { %647 = vmatpush2.bf16.msra.mxu0 %v936_v3 }
  0x6a   : > { %649 = vmatmul.mubr.bf16.vlgmr.msra.gmra.mxu0 %v810_v4 }
  0xa6   : > { %v670_v5 = vpop.permute.xlu0 %669 }
 0x12a   : > { %v650_v6 = vpop.f32.mrf.mxu0 }
 0x12b   : > { %v672_v7 = vadd.f32 %v670_v5, %v650_v6 }
 0x12c   : > { %v652_v8 = vpop.f32.mrf.mxu0 }
 0x12d   : > { %vm674_vm0 = vcmp.ge.f32.partialorder %v672_v7, 0.0  ;;  %v676_v9 = vmul.f32 0.01, %v672_v7  ;;  %v673_v10 = vadd.f32 %v670_v5, %v652_v8 }
 0x12e   : > { %v654_v11 = vpop.f32.mrf.mxu0 }
 0x12f   : > { %v678_v12 = vsel %vm674_vm0, %v672_v7, %v676_v9  ;;  %vm675_vm1 = vcmp.ge.f32.partialorder %v673_v10, 0.0  ;;  %v677_v13 = vmul.f32 0.01, %v673_v10 }
 0x130   : > { %680 = vst [vmem:[%s406_s12] sm:$0xff] %v678_v12  ;;  %v655_v14 = vpop.f32.mrf.mxu0 }
 0x131   : > { %v679_v15 = vsel %vm675_vm1, %v673_v10, %v677_v13 }
 0x132   : > { %681 = vst [vmem:[%s406_s12 + $0x8] sm:$0xff] %v679_v15 }
 0x133 PF: > { %s13_s16 = sadd.s32 1, %s977_s16   ;;  %s1183_s12 = smov %s965_s13 }
 0x134   : > { %p10_p10 = scmp.ge.s32.totalorder %s13_s16, 4   ;;  %s1184_s13 = smov %s1035_s20 }
 0x135   : > { %s1185_s14 = smov %s973_s15  ;;  %s1186_s15 = smov %s1188_s17 }
 0x136   :  { %12 = sbr.rel (!%p10_p10) target bundleno = 3 (0x3), region = 116 }

// kernel: hourglass_1_forward.29
= control target key start
LH: loop header
LB: loop body
LE: loop exit
PB: predicated region body
PF: predicated region fallthrough
CT: control target
= control target key end

     0   :  { %s806_s12 = smov 0   ;;  %s808_s13 = smov 0   ;;  %s938_s0 = inlined_call_operand.vmem [shape: bf16[8,8,128], index: 0, kind: input, shape index: {}]   ;;  %s939_s1 = inlined_call_operand.vmem [shape: bf16[8,128,512], index: 1, kind: input, shape index: {}]   ;;  %s940_s2 = inlined_call_operand.vmem [shape: f32[8,1], index: 2, kind: input, shape index: {}]   ;;  %s941_s3 = inlined_call_operand.vmem [shape: f32[8,8,512], index: 3, kind: output, shape index: {}]  }
   0x1   :  { %s810_s14 = smov 0   ;;  %s812_s15 = smov 0  }
   0x2   :  { %s814_s16 = smov 0   ;;  %s816_s17 = smov 0  }
   0x3   :  { %s818_s18 = smov 0  }
   0x4 LB: > { %s28_s19 = sadd.s32 1, %s775_s16  ;;  %s32_s20 = sadd.s32 1, %s779_s17  ;;  %s783_s18 = sphi %s818_s18, %s13_s18   ;;  %s779_s17 = sphi %s816_s17, %s947_s17   ;;  %s775_s16 = sphi %s814_s16, %s946_s16   ;;  %s771_s15 = sphi %s812_s15, %s945_s15   ;;  %s767_s14 = sphi %s810_s14, %s944_s14   ;;  %s763_s13 = sphi %s808_s13, %s943_s13   ;;  %s759_s12 = sphi %s806_s12, %s942_s12  }
   0x5   : > { %p30_p0 = scmp.ge.s32.totalorder %s28_s19, 2  ;;  %p78_p1 = scmp.ne.s32.totalorder %s763_s13, %s759_s12 }
   0x6   : > { %p79_p2 = scmp.eq.s32.totalorder %s783_s18, 0  ;;  %s71_s24 = sadd.s32 1, %s763_s13 }
   0x7   : > { %s949_s19 = smov (%p30_p0, %s28_s19), 0  ;;  %s951_s20 = smov (!%p30_p0, %s32_s20), %s779_s17 }
   0x8   : > { %p80_p3 = por %p79_p2, %p78_p1  ;;  %p34_p4 = scmp.ge.s32.totalorder %s951_s20, 8 }
   0x9   : > { %s67_s21 = ssub.s32 %s775_s16, %s949_s19  ;;  %p618_p6 = scmp.ge.s32.totalorder %s783_s18, 16 }
   0xa   : > { %s953_s20 = smov (%p34_p4, %s951_s20), 0 }
   0xb   : > { %s64_s22 = ssub.s32 %s779_s17, %s953_s20  ;;  %156 = sbr.rel (%p618_p6) target bundleno = 31 (0x1f), region = 20 }
   0xc   : > { %s68_s23 = sor.u32 %s67_s21, %s64_s22 }
   0xd   : > { %p69_p5 = scmp.eq.s32.totalorder %s68_s23, 0 }
   0xf   : > { %s857_s25 = scalar_select %p69_p5, %s763_s13, %s71_s24  }
  0x10   : > { %169 = sbr.rel (!%p80_p3) target bundleno = 31 (0x1f), region = 28  ;;  %s171_s26 = sand.u32 (%p80_p3), 1, %s763_s13  }
  0x11   : > { %s620_s27 = sshll.u32 (%p80_p3), %s775_s16, 1  ;;  %s619_s28 = sshll.u32 (%p80_p3), %s171_s26, 7 }
  0x12   : > { %s621_s29 = sshll.u32 (%p80_p3), %s779_s17, 6  ;;  %s173_s8 = scalar_lea.vmem (%p80_p3), [#allocation3], %s619_s28 }
  0x13   : > { %s179_s30 = sadd.s32 (%p80_p3), %s621_s29, %s620_s27 }
  0x14   : > { %s622_s4 = sshll.u32 (%p80_p3), %s179_s30, 2 }
  0x15   : > { %s866_s7 = scalar_lea.vmem %s939_s1, %s622_s4 }
  0x16   : > { %v240_v0 = vld [vmem:[%s866_s7] sm:$0xff]  ;;  %v242_v1 = vld [vmem:[%s866_s7 + $0x10] sm:$0xff] }
  0x17   : > { %v244_v2 = vld [vmem:[%s866_s7 + $0x20] sm:$0xff]  ;;  %241 = vst [vmem:[%s173_s8] sm:$0xff] %v240_v0  ;;  %243 = vst [vmem:[%s173_s8 + $0x8] sm:$0xff] %v242_v1  ;;  %v246_v3 = vld [vmem:[%s866_s7 + $0x30] sm:$0xff] }
  0x18   : > { %245 = vst [vmem:[%s173_s8 + $0x10] sm:$0xff] %v244_v2  ;;  %v248_v4 = vld [vmem:[%s866_s7 + $0x40] sm:$0xff]  ;;  %v250_v5 = vld [vmem:[%s866_s7 + $0x50] sm:$0xff]  ;;  %247 = vst [vmem:[%s173_s8 + $0x18] sm:$0xff] %v246_v3 }
  0x19   : > { %249 = vst [vmem:[%s173_s8 + $0x20] sm:$0xff] %v248_v4  ;;  %251 = vst [vmem:[%s173_s8 + $0x28] sm:$0xff] %v250_v5  ;;  %v252_v6 = vld [vmem:[%s866_s7 + $0x60] sm:$0xff]  ;;  %v254_v7 = vld [vmem:[%s866_s7 + $0x70] sm:$0xff] }
  0x1a   : > { %v256_v8 = vld [vmem:[%s866_s7 + $0x80] sm:$0xff]  ;;  %253 = vst [vmem:[%s173_s8 + $0x30] sm:$0xff] %v252_v6  ;;  %255 = vst [vmem:[%s173_s8 + $0x38] sm:$0xff] %v254_v7  ;;  %v258_v9 = vld [vmem:[%s866_s7 + $0x90] sm:$0xff] }
  0x1b   : > { %257 = vst [vmem:[%s173_s8 + $0x40] sm:$0xff] %v256_v8  ;;  %v260_v10 = vld [vmem:[%s866_s7 + $0xa0] sm:$0xff]  ;;  %v262_v11 = vld [vmem:[%s866_s7 + $0xb0] sm:$0xff]  ;;  %259 = vst [vmem:[%s173_s8 + $0x48] sm:$0xff] %v258_v9 }
  0x1c   : > { %261 = vst [vmem:[%s173_s8 + $0x50] sm:$0xff] %v260_v10  ;;  %263 = vst [vmem:[%s173_s8 + $0x58] sm:$0xff] %v262_v11  ;;  %v264_v12 = vld [vmem:[%s866_s7 + $0xc0] sm:$0xff]  ;;  %v266_v13 = vld [vmem:[%s866_s7 + $0xd0] sm:$0xff] }
  0x1d   : > { %v268_v14 = vld [vmem:[%s866_s7 + $0xe0] sm:$0xff]  ;;  %265 = vst [vmem:[%s173_s8 + $0x60] sm:$0xff] %v264_v12  ;;  %267 = vst [vmem:[%s173_s8 + $0x68] sm:$0xff] %v266_v13  ;;  %v270_v15 = vld [vmem:[%s866_s7 + $0xf0] sm:$0xff] }
  0x1e   : > { %269 = vst [vmem:[%s173_s8 + $0x70] sm:$0xff] %v268_v14  ;;  %271 = vst [vmem:[%s173_s8 + $0x78] sm:$0xff] %v270_v15 }
  0x1f PF: > { %p623_p7 = scmp.ge.s32.totalorder %s783_s18, 1  ;;  %p276_p8 = scmp.lt.s32.totalorder %s783_s18, 17 }
  0x21   : > { %p277_p9 = pnand %p623_p7, %p276_p8 }
  0x22   : > { %s283_s9 = sand.u32 (!%p277_p9), 1, %s759_s12   ;;  %p317_p10 = scmp.lt.s32.totalorder (!%p277_p9), %s771_s15, 7 }
  0x23   : > { %280 = sbr.rel (%p277_p9) target bundleno = 273 (0x111), region = 66  ;;  %s624_s21 = sshll.u32 (!%p277_p9), %s283_s9, 7 }
  0x24   : > { %s890_s22 = scalar_lea.vmem (!%p277_p9), [#allocation3], %s624_s21  ;;  %s626_s27 = sshll.u32 (!%p277_p9), %s767_s14, 1 }
  0x25   : > { %p329_p11 = scmp.lt.s32.totalorder (!%p277_p9), %s626_s27, 3 }
  0x28   : > { %v492_v16 = vld [vmem:[%s940_s2] sm:$0xff]  ;;  %v785_v17 = vmov 0   ;;  %v705_v18 = vld [vmem:[%s890_s22 + $0x74] ss:$8 sps:$4 sm:$0xff]   ;;  %v707_v19 = vld [vmem:[%s890_s22 + $0x70] ss:$8 sps:$4 sm:$0xff]  }
  0x29   : > { %474 = vmatprep.mubr.bf16.mxu0 %v785_v17  ;;  %704 = vset.pattern.permute.xlu0 %v785_v17  ;;  %v708_v20 = vld [vmem:[%s890_s22 + $0x64] ss:$8 sps:$4 sm:$0xff]   ;;  %v710_v21 = vld [vmem:[%s890_s22 + $0x60] ss:$8 sps:$4 sm:$0xff]   ;;  %v711_v22 = vld [vmem:[%s890_s22 + $0x54] ss:$8 sps:$4 sm:$0xff]  }
  0x2a   : > { %495 = vperm.xlu0 %704, %v492_v16   ;;  %442 = vmatprep.subr.bf16.mxu0 %v705_v18  ;;  %v713_v23 = vld [vmem:[%s890_s22 + $0x50] ss:$8 sps:$4 sm:$0xff]   ;;  %v714_v24 = vld [vmem:[%s890_s22 + $0x44] ss:$8 sps:$4 sm:$0xff]   ;;  %v716_v25 = vld [vmem:[%s890_s22 + $0x40] ss:$8 sps:$4 sm:$0xff]  }
  0x2b   : > { %443 = vmatpush1.bf16.msra.mxu0 %v707_v19  ;;  %v717_v26 = vld [vmem:[%s890_s22 + $0x34] ss:$8 sps:$4 sm:$0xff]   ;;  %v719_v27 = vld [vmem:[%s890_s22 + $0x30] ss:$8 sps:$4 sm:$0xff]   ;;  %v720_v28 = vld [vmem:[%s890_s22 + $0x24] ss:$8 sps:$4 sm:$0xff]  }
  0x2c   : > { %444 = vmatprep.subr.bf16.mxu0 %v708_v20  ;;  %v722_v29 = vld [vmem:[%s890_s22 + $0x20] ss:$8 sps:$4 sm:$0xff]   ;;  %v723_v30 = vld [vmem:[%s890_s22 + $0x14] ss:$8 sps:$4 sm:$0xff]   ;;  %s955_s15 = smov (!%p317_p10, %s771_s15), 7  ;;  %s957_s27 = smov (!%p329_p11, %s626_s27), 3 }
  0x2d   : > { %v725_v31 = vld [vmem:[%s890_s22 + $0x10] ss:$8 sps:$4 sm:$0xff]   ;;  %v726_v32 = vld [vmem:[%s890_s22 + $0x4] ss:$8 sps:$4 sm:$0xff]   ;;  %s625_s12 = sshll.u32 %s955_s15, 2 }
  0x2e   : > { %v728_v33 = vld [vmem:[%s890_s22] ss:$8 sps:$4 sm:$0xff]   ;;  %s323_s26 = scalar_lea.vmem %s938_s0, %s625_s12  ;;  %s332_s28 = sadd.s32 %s625_s12, %s957_s27 }
  0x2f   : > { %445 = vmatpush1.bf16.msra.mxu0 %v710_v21  ;;  %v345_v34 = vld [vmem:[%s323_s26] sm:$0xf]  ;;  %s628_s29 = sshll.u32 %s332_s28, 3 }
  0x30   : > { %446 = vmatprep.subr.bf16.mxu0 %v711_v22  ;;  %s334_s15 = scalar_lea.vmem %s941_s3, %s628_s29 }
  0x33   : > { %447 = vmatpush1.bf16.msra.mxu0 %v713_v23 }
  0x34   : > { %448 = vmatprep.subr.bf16.mxu0 %v714_v24 }
  0x37   : > { %449 = vmatpush1.bf16.msra.mxu0 %v716_v25 }
  0x38   : > { %450 = vmatprep.subr.bf16.mxu0 %v717_v26 }
  0x3b   : > { %451 = vmatpush1.bf16.msra.mxu0 %v719_v27 }
  0x3c   : > { %452 = vmatprep.subr.bf16.mxu0 %v720_v28 }
  0x3f   : > { %453 = vmatpush1.bf16.msra.mxu0 %v722_v29 }
  0x40   : > { %454 = vmatprep.subr.bf16.mxu0 %v723_v30 }
  0x43   : > { %455 = vmatpush1.bf16.msra.mxu0 %v725_v31 }
  0x44   : > { %456 = vmatprep.subr.bf16.mxu0 %v726_v32 }
  0x47   : > { %457 = vmatpush1.bf16.msra.mxu0 %v728_v33 }
  0x4a   : > { %475 = vmatmul.mubr.bf16.vlgmr.msra.gmra.mxu0 %v345_v34 }
  0xa5   : > { %v496_v35 = vpop.permute.xlu0 %495 }
 0x10a   : > { %v476_v36 = vpop.f32.mrf.mxu0 }
 0x10b   : > { %v498_v37 = vadd.f32 %v496_v35, %v476_v36 }
 0x10c   : > { %v478_v38 = vpop.f32.mrf.mxu0 }
 0x10d   : > { %500 = vst [vmem:[%s334_s15] sm:$0xff] %v498_v37  ;;  %v499_v39 = vadd.f32 %v496_v35, %v478_v38 }
 0x10e   : > { %v480_v40 = vpop.f32.mrf.mxu0 }
 0x10f   : > { %501 = vst [vmem:[%s334_s15 + $0x8] sm:$0xff] %v499_v39 }
 0x110   : > { %v481_v41 = vpop.f32.mrf.mxu0 }
 0x111 PF: > { %s13_s18 = sadd.s32 1, %s783_s18   ;;  %s942_s12 = smov %s763_s13 }
 0x112   : > { %p10_p12 = scmp.ge.s32.totalorder %s13_s18, 18   ;;  %s943_s13 = smov %s857_s25 }
 0x113   : > { %s944_s14 = smov %s775_s16  ;;  %s945_s15 = smov %s779_s17 }
 0x114   : > { %s946_s16 = smov %s949_s19  ;;  %s947_s17 = smov %s953_s20 }
 0x115   :  { %12 = sbr.rel (!%p10_p12) target bundleno = 4 (0x4), region = 116 }

</bundles_post_ra>
